<compile_context>
chip_gen: v5e
topology: v5e:2x2
jax: 0.10.0
libtpu: 0.0.40
codegen_flags: <defaults>
</compile_context>

<pallas_src>
import functools

import jax
import jax.numpy as jnp
from jax import lax
from jax.experimental import pallas as pl
from jax.experimental.pallas import tpu as pltpu
import numpy as np

FILTERS = (64, 128, 256, 512)


# ----------------------------- kernel helpers ------------------------------ #

def _conv1_vpu_relu(x, w1, b1):
    """First 1x1 conv with tiny C_in done on the VPU (broadcast-FMAs).

    x : (S, C_in) f32, w1 : (C_in, F) f32, b1 : (1, F) f32.
    Avoids a K=4 contraction padded to the MXU width.
    """
    c_in = w1.shape[0]
    acc = x[:, 0:1] * w1[0:1, :] + b1
    for k in range(1, c_in):           # static, tiny unrolled loop
        acc = acc + x[:, k:k + 1] * w1[k:k + 1, :]
    return jnp.maximum(acc, 0.0)


def _conv1x1_bf16_relu(x_f32, w_bf16, b_f32):
    """Pointwise conv as an MXU matmul: bf16 operands, f32 accumulation."""
    y = jnp.dot(x_f32.astype(jnp.bfloat16), w_bf16,
                preferred_element_type=jnp.float32) + b_f32
    return jnp.maximum(y, 0.0)


def _maxpool2x2(feat, h, w):
    """2x2 / stride-2 max pool of an (h*w, C) channels-last feature map.

    H-direction first (whole-W, sublane-tile-friendly slices), then the
    W-direction interleave on the already-halved data.
    """
    c = feat.shape[-1]
    h2, w2 = h // 2, w // 2
    # H pool: flat rows (2a*w + x) and ((2a+1)*w + x) are w apart.
    t = feat.reshape(h2, 2 * w, c)
    feat = jnp.maximum(t[:, :w, :], t[:, w:, :]).reshape(h2 * w, c)
    # W pool: rows (h, 2b) and (h, 2b+1) are now adjacent flattened rows.
    t = feat.reshape(h2 * w2, 2, c)
    feat = jnp.maximum(t[:, 0:1, :], t[:, 1:2, :]).reshape(h2 * w2, c)
    return feat


# --------------------------------- kernel ---------------------------------- #

def semantic_net_kernel(tile_h, w_dim, x_ref,
                        w1_ref, b1_ref, w2_ref, b2_ref,
                        w3_ref, b3_ref, w4_ref, b4_ref,
                        w5_ref, o_ref):
    """Fused conv1..conv5 + 4x maxpool for one spatial tile of one image.

    x_ref : (1, tile_h*W, C_in)  channels-last, spatial flattened
    wK/bK : (C_in_k, C_out_k) / (1, C_out_k); w2..w5 are bf16
    o_ref : (1, tile_h/16 * W/16, C_out) f32
    """
    f = _conv1_vpu_relu(x_ref[0], w1_ref[...], b1_ref[...])        # (S, 64) VPU
    f = _maxpool2x2(f, tile_h, w_dim)
    f = _conv1x1_bf16_relu(f, w2_ref[...], b2_ref[...])            # (.., 128)
    f = _maxpool2x2(f, tile_h // 2, w_dim // 2)
    f = _conv1x1_bf16_relu(f, w3_ref[...], b3_ref[...])            # (.., 256)
    f = _maxpool2x2(f, tile_h // 4, w_dim // 4)
    f = _conv1x1_bf16_relu(f, w4_ref[...], b4_ref[...])            # (.., 512)
    f = _maxpool2x2(f, tile_h // 8, w_dim // 8)
    # conv5: 1x1, bias=False, no activation
    out = jnp.dot(f.astype(jnp.bfloat16), w5_ref[...],
                  preferred_element_type=jnp.float32)
    o_ref[0] = out                                                  # lane-dense


# -------------------------------- wrapper ----------------------------------- #

def _pick_tile_rows(h, w, max_pixels=8192):
    """Largest pool-aligned (multiple of 16) row-tile within a VMEM-friendly
    pixel budget; also tries to keep the output block sublane-friendly."""
    rows = 16
    while rows * 2 <= h and h % (rows * 2) == 0 and rows * 2 * w <= max_pixels:
        rows *= 2
    # Keep output-block rows a multiple of 8 (or the full extent) when possible.
    while (rows * 2 <= h and h % (rows * 2) == 0
           and ((rows // 16) * (w // 16)) % 8 != 0):
        rows *= 2
    return rows


def semantic_net_forward(x_nchw, params, tile_rows=None):
    n, c_in, h, w = x_nchw.shape
    assert h % 16 == 0 and w % 16 == 0, "spatial dims must survive 4 pools"
    if tile_rows is None:
        tile_rows = _pick_tile_rows(h, w)
    assert tile_rows % 16 == 0 and h % tile_rows == 0
    num_tiles = h // tile_rows

    hw_tile = tile_rows * w
    h_out, w_out = h // 16, w // 16
    hw_out = h_out * w_out
    out_tile_rows = (tile_rows // 16) * w_out
    c_out = params["w5"].shape[1]

    # glue: NCHW -> (N, H*W, C) channels-last.
    # TODO(synk): drop this (and the output transpose) if the producer/consumer
    # can use channels-last directly.
    x = jnp.transpose(x_nchw, (0, 2, 3, 1)).reshape(n, h * w, c_in)

    weight_args = (params["w1"], params["b1"], params["w2"], params["b2"],
                   params["w3"], params["b3"], params["w4"], params["b4"],
                   params["w5"])

    def const_spec(arr):
        # weights/biases: whole-array VMEM-resident blocks, index never changes
        return pl.BlockSpec(arr.shape, lambda i, t: (0, 0))

    flops = 2 * n * (
        h * w * c_in * FILTERS[0]
        + (h * w // 4) * FILTERS[0] * FILTERS[1]
        + (h * w // 16) * FILTERS[1] * FILTERS[2]
        + (h * w // 64) * FILTERS[2] * FILTERS[3]
        + (h * w // 256) * FILTERS[3] * c_out)
    bytes_accessed = int(
        x.size * x.dtype.itemsize
        + sum(a.size * a.dtype.itemsize for a in weight_args)
        + n * hw_out * c_out * 4)

    out = pl.pallas_call(
        functools.partial(semantic_net_kernel, tile_rows, w),
        out_shape=jax.ShapeDtypeStruct((n, hw_out, c_out), jnp.float32),
        grid=(n, num_tiles),
        in_specs=[pl.BlockSpec((1, hw_tile, c_in), lambda i, t: (i, t, 0))]
                 + [const_spec(a) for a in weight_args],
        out_specs=pl.BlockSpec((1, out_tile_rows, c_out),
                               lambda i, t: (i, t, 0)),
        compiler_params=pltpu.CompilerParams(
            dimension_semantics=("parallel", "parallel"),
            vmem_limit_bytes=64 * 1024 * 1024),
        cost_estimate=pl.CostEstimate(flops=flops, transcendentals=0,
                                      bytes_accessed=bytes_accessed),
    )(x, *weight_args)

    # glue: channels-last -> NCHW to match the PyTorch module's output layout
    return jnp.transpose(out.reshape(n, h_out, w_out, c_out), (0, 3, 1, 2))


# --------------------------- pure-JAX reference ----------------------------- #

def reference_forward(x_nchw, params):
    """Mirrors the kernel's numerics: f32 conv1, bf16-rounded operands with
    f32 accumulation for conv2..conv5."""
    x = jnp.transpose(x_nchw, (0, 2, 3, 1)).astype(jnp.float32)   # NHWC

    def conv_f32(x, w, b):
        y = jnp.einsum("nhwc,cd->nhwd", x, w,
                       precision=lax.Precision.HIGHEST) + b
        return jnp.maximum(y, 0.0)

    def conv_bf16(x, w, b):
        xq = x.astype(jnp.bfloat16).astype(jnp.float32)
        wq = w.astype(jnp.float32)
        y = jnp.einsum("nhwc,cd->nhwd", xq, wq,
                       precision=lax.Precision.HIGHEST)
        if b is None:
            return y
        return jnp.maximum(y + b, 0.0)

    def pool(x):
        nb, hh, ww, cc = x.shape
        return x.reshape(nb, hh // 2, 2, ww // 2, 2, cc).max(axis=(2, 4))

    x = pool(conv_f32(x, params["w1"], params["b1"]))
    x = pool(conv_bf16(x, params["w2"], params["b2"]))
    x = pool(conv_bf16(x, params["w3"], params["b3"]))
    x = pool(conv_bf16(x, params["w4"], params["b4"]))
    x = conv_bf16(x, params["w5"], None)
    return jnp.transpose(x, (0, 3, 1, 2))                          # NCHW


# ---------------------------------- main ------------------------------------ #

if __name__ == "__main__":
    # small shapes: batch=2, input_channel=4, spatial=16x16 (-> 1x1 after 4
    # pools), output_channel=128 (lane-dense last dim for the output store)
    N, C_IN, H, W = 2, 4, 16, 16
    C_OUT = 128

    key = jax.random.PRNGKey(0)
    ks = jax.random.split(key, 10)

    x = jax.random.normal(ks[0], (N, C_IN, H, W), dtype=jnp.float32)

    def w_init(k, cin, cout, dtype):
        wv = jax.random.normal(k, (cin, cout), jnp.float32) * (2.0 / cin) ** 0.5
        return wv.astype(dtype)

    params = {
        # conv1 stays f32 (tiny, computed on the VPU)
        "w1": w_init(ks[1], C_IN, FILTERS[0], jnp.float32),
        "b1": 0.1 * jax.random.normal(ks[2], (1, FILTERS[0]), jnp.float32),
        # conv2..conv5 weights stored bf16 for MXU-native operands / halved DMA
        "w2": w_init(ks[3], FILTERS[0], FILTERS[1], jnp.bfloat16),
        "b2": 0.1 * jax.random.normal(ks[4], (1, FILTERS[1]), jnp.float32),
        "w3": w_init(ks[5], FILTERS[1], FILTERS[2], jnp.bfloat16),
        "b3": 0.1 * jax.random.normal(ks[6], (1, FILTERS[2]), jnp.float32),
        "w4": w_init(ks[7], FILTERS[2], FILTERS[3], jnp.bfloat16),
        "b4": 0.1 * jax.random.normal(ks[8], (1, FILTERS[3]), jnp.float32),
        # conv5: nn.Conv2d(512, C_OUT, kernel_size=1, bias=False)
        "w5": w_init(ks[9], FILTERS[3], C_OUT, jnp.bfloat16),
    }

    out = jax.block_until_ready(semantic_net_forward(x, params))
    ref = jax.block_until_ready(reference_forward(x, params))
    np.testing.assert_allclose(np.asarray(out), np.asarray(ref),
                               rtol=1e-3, atol=1e-3)

    print("KERNEL_OK")
</pallas_src>

<mosaic_0001>
module attributes {stable_mosaic.version = 11 : i64} {
  func.func @semantic_net_kernel(%arg0: i32, %arg1: i32, %arg2: memref<1x256x4xf32, #tpu.memory_space<vmem>>, %arg3: memref<4x64xf32, #tpu.memory_space<vmem>>, %arg4: memref<1x64xf32, #tpu.memory_space<vmem>>, %arg5: memref<64x128xbf16, #tpu.memory_space<vmem>>, %arg6: memref<1x128xf32, #tpu.memory_space<vmem>>, %arg7: memref<128x256xbf16, #tpu.memory_space<vmem>>, %arg8: memref<1x256xf32, #tpu.memory_space<vmem>>, %arg9: memref<256x512xbf16, #tpu.memory_space<vmem>>, %arg10: memref<1x512xf32, #tpu.memory_space<vmem>>, %arg11: memref<512x128xbf16, #tpu.memory_space<vmem>>, %arg12: memref<1x1x128xf32, #tpu.memory_space<vmem>>) attributes {dimension_semantics = [#tpu.dimension_semantics<parallel>, #tpu.dimension_semantics<parallel>], iteration_bounds = array<i64: 2, 1>, scalar_prefetch = 0 : i64, scratch_operands = 0 : i64, tpu.core_type = #tpu.core_type<tc>, window_params = [{transform_indices = @transform_0, window_bounds = array<i64: 1, 256, 4>}, {pipeline_mode = #tpu.pipeline_mode<synchronous>, transform_indices = @transform_1, window_bounds = array<i64: 4, 64>}, {pipeline_mode = #tpu.pipeline_mode<synchronous>, transform_indices = @transform_2, window_bounds = array<i64: 1, 64>}, {pipeline_mode = #tpu.pipeline_mode<synchronous>, transform_indices = @transform_3, window_bounds = array<i64: 64, 128>}, {pipeline_mode = #tpu.pipeline_mode<synchronous>, transform_indices = @transform_4, window_bounds = array<i64: 1, 128>}, {pipeline_mode = #tpu.pipeline_mode<synchronous>, transform_indices = @transform_5, window_bounds = array<i64: 128, 256>}, {pipeline_mode = #tpu.pipeline_mode<synchronous>, transform_indices = @transform_6, window_bounds = array<i64: 1, 256>}, {pipeline_mode = #tpu.pipeline_mode<synchronous>, transform_indices = @transform_7, window_bounds = array<i64: 256, 512>}, {pipeline_mode = #tpu.pipeline_mode<synchronous>, transform_indices = @transform_8, window_bounds = array<i64: 1, 512>}, {pipeline_mode = #tpu.pipeline_mode<synchronous>, transform_indices = @transform_9, window_bounds = array<i64: 512, 128>}, {transform_indices = @transform_10, window_bounds = array<i64: 1, 1, 128>}]} {
    %c0 = arith.constant 0 : index
    %c0_0 = arith.constant 0 : index
    %c0_1 = arith.constant 0 : index
    %0 = vector.load %arg2[%c0, %c0_0, %c0_1] : memref<1x256x4xf32, #tpu.memory_space<vmem>>, vector<1x256x4xf32>
    %1 = vector.shape_cast %0 : vector<1x256x4xf32> to vector<256x4xf32>
    %c0_2 = arith.constant 0 : index
    %c0_3 = arith.constant 0 : index
    %2 = vector.load %arg3[%c0_2, %c0_3] : memref<4x64xf32, #tpu.memory_space<vmem>>, vector<4x64xf32>
    %c0_4 = arith.constant 0 : index
    %c0_5 = arith.constant 0 : index
    %3 = vector.load %arg4[%c0_4, %c0_5] : memref<1x64xf32, #tpu.memory_space<vmem>>, vector<1x64xf32>
    %4 = vector.extract_strided_slice %1 {offsets = [0, 0], sizes = [256, 1], strides = [1, 1]} : vector<256x4xf32> to vector<256x1xf32>
    %5 = vector.extract_strided_slice %2 {offsets = [0, 0], sizes = [1, 64], strides = [1, 1]} : vector<4x64xf32> to vector<1x64xf32>
    %6 = vector.broadcast %4 : vector<256x1xf32> to vector<256x64xf32>
    %7 = vector.broadcast %5 : vector<1x64xf32> to vector<256x64xf32>
    %8 = arith.mulf %6, %7 : vector<256x64xf32>
    %9 = vector.broadcast %3 : vector<1x64xf32> to vector<256x64xf32>
    %10 = arith.addf %8, %9 : vector<256x64xf32>
    %11 = vector.extract_strided_slice %1 {offsets = [0, 1], sizes = [256, 1], strides = [1, 1]} : vector<256x4xf32> to vector<256x1xf32>
    %12 = vector.extract_strided_slice %2 {offsets = [1, 0], sizes = [1, 64], strides = [1, 1]} : vector<4x64xf32> to vector<1x64xf32>
    %13 = vector.broadcast %11 : vector<256x1xf32> to vector<256x64xf32>
    %14 = vector.broadcast %12 : vector<1x64xf32> to vector<256x64xf32>
    %15 = arith.mulf %13, %14 : vector<256x64xf32>
    %16 = arith.addf %10, %15 : vector<256x64xf32>
    %17 = vector.extract_strided_slice %1 {offsets = [0, 2], sizes = [256, 1], strides = [1, 1]} : vector<256x4xf32> to vector<256x1xf32>
    %18 = vector.extract_strided_slice %2 {offsets = [2, 0], sizes = [1, 64], strides = [1, 1]} : vector<4x64xf32> to vector<1x64xf32>
    %19 = vector.broadcast %17 : vector<256x1xf32> to vector<256x64xf32>
    %20 = vector.broadcast %18 : vector<1x64xf32> to vector<256x64xf32>
    %21 = arith.mulf %19, %20 : vector<256x64xf32>
    %22 = arith.addf %16, %21 : vector<256x64xf32>
    %23 = vector.extract_strided_slice %1 {offsets = [0, 3], sizes = [256, 1], strides = [1, 1]} : vector<256x4xf32> to vector<256x1xf32>
    %24 = vector.extract_strided_slice %2 {offsets = [3, 0], sizes = [1, 64], strides = [1, 1]} : vector<4x64xf32> to vector<1x64xf32>
    %25 = vector.broadcast %23 : vector<256x1xf32> to vector<256x64xf32>
    %26 = vector.broadcast %24 : vector<1x64xf32> to vector<256x64xf32>
    %27 = arith.mulf %25, %26 : vector<256x64xf32>
    %28 = arith.addf %22, %27 : vector<256x64xf32>
    %cst = arith.constant 0.000000e+00 : f32
    %29 = vector.broadcast %cst : f32 to vector<256x64xf32>
    %30 = arith.maximumf %28, %29 : vector<256x64xf32>
    %31 = vector.shape_cast %30 : vector<256x64xf32> to vector<8x32x64xf32>
    %32 = vector.extract_strided_slice %31 {offsets = [0, 0, 0], sizes = [8, 16, 64], strides = [1, 1, 1]} : vector<8x32x64xf32> to vector<8x16x64xf32>
    %33 = vector.extract_strided_slice %31 {offsets = [0, 16, 0], sizes = [8, 16, 64], strides = [1, 1, 1]} : vector<8x32x64xf32> to vector<8x16x64xf32>
    %34 = arith.maximumf %32, %33 : vector<8x16x64xf32>
    %35 = vector.shape_cast %34 : vector<8x16x64xf32> to vector<128x64xf32>
    %36 = vector.shape_cast %35 : vector<128x64xf32> to vector<64x2x64xf32>
    %37 = vector.extract_strided_slice %36 {offsets = [0, 0, 0], sizes = [64, 1, 64], strides = [1, 1, 1]} : vector<64x2x64xf32> to vector<64x1x64xf32>
    %38 = vector.extract_strided_slice %36 {offsets = [0, 1, 0], sizes = [64, 1, 64], strides = [1, 1, 1]} : vector<64x2x64xf32> to vector<64x1x64xf32>
    %39 = arith.maximumf %37, %38 : vector<64x1x64xf32>
    %40 = vector.shape_cast %39 : vector<64x1x64xf32> to vector<64x64xf32>
    %c0_6 = arith.constant 0 : index
    %c0_7 = arith.constant 0 : index
    %41 = vector.load %arg5[%c0_6, %c0_7] : memref<64x128xbf16, #tpu.memory_space<vmem>>, vector<64x128xbf16>
    %c0_8 = arith.constant 0 : index
    %c0_9 = arith.constant 0 : index
    %42 = vector.load %arg6[%c0_8, %c0_9] : memref<1x128xf32, #tpu.memory_space<vmem>>, vector<1x128xf32>
    %43 = arith.truncf %40 : vector<64x64xf32> to vector<64x64xbf16>
    %cst_10 = arith.constant dense<0.000000e+00> : vector<64x128xf32>
    %44 = tpu.matmul %43, %41, %cst_10 {dimension_numbers = #tpu.dot_dimension_numbers<[1], [0], [0], [1], [0, 0, 1, 1], [], []>} : vector<64x64xbf16>, vector<64x128xbf16>, vector<64x128xf32> -> vector<64x128xf32>
    %45 = vector.broadcast %42 : vector<1x128xf32> to vector<64x128xf32>
    %46 = arith.addf %44, %45 : vector<64x128xf32>
    %cst_11 = arith.constant 0.000000e+00 : f32
    %47 = vector.broadcast %cst_11 : f32 to vector<64x128xf32>
    %48 = arith.maximumf %46, %47 : vector<64x128xf32>
    %49 = vector.shape_cast %48 : vector<64x128xf32> to vector<4x16x128xf32>
    %50 = vector.extract_strided_slice %49 {offsets = [0, 0, 0], sizes = [4, 8, 128], strides = [1, 1, 1]} : vector<4x16x128xf32> to vector<4x8x128xf32>
    %51 = vector.extract_strided_slice %49 {offsets = [0, 8, 0], sizes = [4, 8, 128], strides = [1, 1, 1]} : vector<4x16x128xf32> to vector<4x8x128xf32>
    %52 = arith.maximumf %50, %51 : vector<4x8x128xf32>
    %53 = vector.shape_cast %52 : vector<4x8x128xf32> to vector<32x128xf32>
    %54 = vector.shape_cast %53 : vector<32x128xf32> to vector<16x2x128xf32>
    %55 = vector.extract_strided_slice %54 {offsets = [0, 0, 0], sizes = [16, 1, 128], strides = [1, 1, 1]} : vector<16x2x128xf32> to vector<16x1x128xf32>
    %56 = vector.extract_strided_slice %54 {offsets = [0, 1, 0], sizes = [16, 1, 128], strides = [1, 1, 1]} : vector<16x2x128xf32> to vector<16x1x128xf32>
    %57 = arith.maximumf %55, %56 : vector<16x1x128xf32>
    %58 = vector.shape_cast %57 : vector<16x1x128xf32> to vector<16x128xf32>
    %c0_12 = arith.constant 0 : index
    %c0_13 = arith.constant 0 : index
    %59 = vector.load %arg7[%c0_12, %c0_13] : memref<128x256xbf16, #tpu.memory_space<vmem>>, vector<128x256xbf16>
    %c0_14 = arith.constant 0 : index
    %c0_15 = arith.constant 0 : index
    %60 = vector.load %arg8[%c0_14, %c0_15] : memref<1x256xf32, #tpu.memory_space<vmem>>, vector<1x256xf32>
    %61 = arith.truncf %58 : vector<16x128xf32> to vector<16x128xbf16>
    %cst_16 = arith.constant dense<0.000000e+00> : vector<16x256xf32>
    %62 = tpu.matmul %61, %59, %cst_16 {dimension_numbers = #tpu.dot_dimension_numbers<[1], [0], [0], [1], [0, 0, 1, 1], [], []>} : vector<16x128xbf16>, vector<128x256xbf16>, vector<16x256xf32> -> vector<16x256xf32>
    %63 = vector.broadcast %60 : vector<1x256xf32> to vector<16x256xf32>
    %64 = arith.addf %62, %63 : vector<16x256xf32>
    %cst_17 = arith.constant 0.000000e+00 : f32
    %65 = vector.broadcast %cst_17 : f32 to vector<16x256xf32>
    %66 = arith.maximumf %64, %65 : vector<16x256xf32>
    %67 = vector.shape_cast %66 : vector<16x256xf32> to vector<2x8x256xf32>
    %68 = vector.extract_strided_slice %67 {offsets = [0, 0, 0], sizes = [2, 4, 256], strides = [1, 1, 1]} : vector<2x8x256xf32> to vector<2x4x256xf32>
    %69 = vector.extract_strided_slice %67 {offsets = [0, 4, 0], sizes = [2, 4, 256], strides = [1, 1, 1]} : vector<2x8x256xf32> to vector<2x4x256xf32>
    %70 = arith.maximumf %68, %69 : vector<2x4x256xf32>
    %71 = vector.shape_cast %70 : vector<2x4x256xf32> to vector<8x256xf32>
    %72 = vector.shape_cast %71 : vector<8x256xf32> to vector<4x2x256xf32>
    %73 = vector.extract_strided_slice %72 {offsets = [0, 0, 0], sizes = [4, 1, 256], strides = [1, 1, 1]} : vector<4x2x256xf32> to vector<4x1x256xf32>
    %74 = vector.extract_strided_slice %72 {offsets = [0, 1, 0], sizes = [4, 1, 256], strides = [1, 1, 1]} : vector<4x2x256xf32> to vector<4x1x256xf32>
    %75 = arith.maximumf %73, %74 : vector<4x1x256xf32>
    %76 = vector.shape_cast %75 : vector<4x1x256xf32> to vector<4x256xf32>
    %c0_18 = arith.constant 0 : index
    %c0_19 = arith.constant 0 : index
    %77 = vector.load %arg9[%c0_18, %c0_19] : memref<256x512xbf16, #tpu.memory_space<vmem>>, vector<256x512xbf16>
    %c0_20 = arith.constant 0 : index
    %c0_21 = arith.constant 0 : index
    %78 = vector.load %arg10[%c0_20, %c0_21] : memref<1x512xf32, #tpu.memory_space<vmem>>, vector<1x512xf32>
    %79 = arith.truncf %76 : vector<4x256xf32> to vector<4x256xbf16>
    %cst_22 = arith.constant dense<0.000000e+00> : vector<4x512xf32>
    %80 = tpu.matmul %79, %77, %cst_22 {dimension_numbers = #tpu.dot_dimension_numbers<[1], [0], [0], [1], [0, 0, 1, 1], [], []>} : vector<4x256xbf16>, vector<256x512xbf16>, vector<4x512xf32> -> vector<4x512xf32>
    %81 = vector.broadcast %78 : vector<1x512xf32> to vector<4x512xf32>
    %82 = arith.addf %80, %81 : vector<4x512xf32>
    %cst_23 = arith.constant 0.000000e+00 : f32
    %83 = vector.broadcast %cst_23 : f32 to vector<4x512xf32>
    %84 = arith.maximumf %82, %83 : vector<4x512xf32>
    %85 = vector.shape_cast %84 : vector<4x512xf32> to vector<1x4x512xf32>
    %86 = vector.extract_strided_slice %85 {offsets = [0, 0, 0], sizes = [1, 2, 512], strides = [1, 1, 1]} : vector<1x4x512xf32> to vector<1x2x512xf32>
    %87 = vector.extract_strided_slice %85 {offsets = [0, 2, 0], sizes = [1, 2, 512], strides = [1, 1, 1]} : vector<1x4x512xf32> to vector<1x2x512xf32>
    %88 = arith.maximumf %86, %87 : vector<1x2x512xf32>
    %89 = vector.shape_cast %88 : vector<1x2x512xf32> to vector<2x512xf32>
    %90 = vector.shape_cast %89 : vector<2x512xf32> to vector<1x2x512xf32>
    %91 = vector.extract_strided_slice %90 {offsets = [0, 0, 0], sizes = [1, 1, 512], strides = [1, 1, 1]} : vector<1x2x512xf32> to vector<1x1x512xf32>
    %92 = vector.extract_strided_slice %90 {offsets = [0, 1, 0], sizes = [1, 1, 512], strides = [1, 1, 1]} : vector<1x2x512xf32> to vector<1x1x512xf32>
    %93 = arith.maximumf %91, %92 : vector<1x1x512xf32>
    %94 = vector.shape_cast %93 : vector<1x1x512xf32> to vector<1x512xf32>
    %95 = arith.truncf %94 : vector<1x512xf32> to vector<1x512xbf16>
    %c0_24 = arith.constant 0 : index
    %c0_25 = arith.constant 0 : index
    %96 = vector.load %arg11[%c0_24, %c0_25] : memref<512x128xbf16, #tpu.memory_space<vmem>>, vector<512x128xbf16>
    %cst_26 = arith.constant dense<0.000000e+00> : vector<1x128xf32>
    %97 = tpu.matmul %95, %96, %cst_26 {dimension_numbers = #tpu.dot_dimension_numbers<[1], [0], [0], [1], [0, 0, 1, 1], [], []>} : vector<1x512xbf16>, vector<512x128xbf16>, vector<1x128xf32> -> vector<1x128xf32>
    %c0_27 = arith.constant 0 : index
    %c0_28 = arith.constant 0 : index
    %c0_29 = arith.constant 0 : index
    %98 = vector.load %arg12[%c0_27, %c0_28, %c0_29] : memref<1x1x128xf32, #tpu.memory_space<vmem>>, vector<1x1x128xf32>
    %99 = vector.shape_cast %98 : vector<1x1x128xf32> to vector<1x128xf32>
    %100 = vector.shape_cast %97 : vector<1x128xf32> to vector<1x1x128xf32>
    tpu.vector_store %arg12[%c0_27, %c0_28, %c0_29], %100 {strides = array<i32>} : memref<1x1x128xf32, #tpu.memory_space<vmem>>, vector<1x1x128xf32>,
    return
  }
  func.func @transform_0(%arg0: i32, %arg1: i32) -> (i32, i32, i32) {
    %c0_i32 = arith.constant 0 : i32
    %c0_i32_0 = arith.constant 0 : i32
    return %arg0, %arg1, %c0_i32 : i32, i32, i32
  }
  func.func @transform_1(%arg0: i32, %arg1: i32) -> (i32, i32) {
    %c0_i32 = arith.constant 0 : i32
    %c0_i32_0 = arith.constant 0 : i32
    %c0_i32_1 = arith.constant 0 : i32
    return %c0_i32, %c0_i32_0 : i32, i32
  }
  func.func @transform_2(%arg0: i32, %arg1: i32) -> (i32, i32) {
    %c0_i32 = arith.constant 0 : i32
    %c0_i32_0 = arith.constant 0 : i32
    %c0_i32_1 = arith.constant 0 : i32
    return %c0_i32, %c0_i32_0 : i32, i32
  }
  func.func @transform_3(%arg0: i32, %arg1: i32) -> (i32, i32) {
    %c0_i32 = arith.constant 0 : i32
    %c0_i32_0 = arith.constant 0 : i32
    %c0_i32_1 = arith.constant 0 : i32
    return %c0_i32, %c0_i32_0 : i32, i32
  }
  func.func @transform_4(%arg0: i32, %arg1: i32) -> (i32, i32) {
    %c0_i32 = arith.constant 0 : i32
    %c0_i32_0 = arith.constant 0 : i32
    %c0_i32_1 = arith.constant 0 : i32
    return %c0_i32, %c0_i32_0 : i32, i32
  }
  func.func @transform_5(%arg0: i32, %arg1: i32) -> (i32, i32) {
    %c0_i32 = arith.constant 0 : i32
    %c0_i32_0 = arith.constant 0 : i32
    %c0_i32_1 = arith.constant 0 : i32
    return %c0_i32, %c0_i32_0 : i32, i32
  }
  func.func @transform_6(%arg0: i32, %arg1: i32) -> (i32, i32) {
    %c0_i32 = arith.constant 0 : i32
    %c0_i32_0 = arith.constant 0 : i32
    %c0_i32_1 = arith.constant 0 : i32
    return %c0_i32, %c0_i32_0 : i32, i32
  }
  func.func @transform_7(%arg0: i32, %arg1: i32) -> (i32, i32) {
    %c0_i32 = arith.constant 0 : i32
    %c0_i32_0 = arith.constant 0 : i32
    %c0_i32_1 = arith.constant 0 : i32
    return %c0_i32, %c0_i32_0 : i32, i32
  }
  func.func @transform_8(%arg0: i32, %arg1: i32) -> (i32, i32) {
    %c0_i32 = arith.constant 0 : i32
    %c0_i32_0 = arith.constant 0 : i32
    %c0_i32_1 = arith.constant 0 : i32
    return %c0_i32, %c0_i32_0 : i32, i32
  }
  func.func @transform_9(%arg0: i32, %arg1: i32) -> (i32, i32) {
    %c0_i32 = arith.constant 0 : i32
    %c0_i32_0 = arith.constant 0 : i32
    %c0_i32_1 = arith.constant 0 : i32
    return %c0_i32, %c0_i32_0 : i32, i32
  }
  func.func @transform_10(%arg0: i32, %arg1: i32) -> (i32, i32, i32) {
    %c0_i32 = arith.constant 0 : i32
    %c0_i32_0 = arith.constant 0 : i32
    return %arg0, %arg1, %c0_i32 : i32, i32, i32
  }
}

</mosaic_0001>

<bundles_post_ra>
// kernel: tpu_custom_call.1
= control target key start
LH: loop header
LB: loop body
LE: loop exit
PB: predicated region body
PF: predicated region fallthrough
CT: control target
= control target key end

     0   :  { %s5882_s0 = inlined_call_operand.vmem [shape: f32[2,256,4], index: 0, kind: input, shape index: {}]   ;;  %s5883_s1 = inlined_call_operand.vmem [shape: f32[4,64], index: 1, kind: input, shape index: {}]   ;;  %s5884_s2 = inlined_call_operand.vmem [shape: f32[1,64], index: 2, kind: input, shape index: {}]   ;;  %s5885_s3 = inlined_call_operand.hbm [shape: bf16[64,128], index: 3, kind: input, shape index: {}]   ;;  %s5886_s4 = inlined_call_operand.vmem [shape: f32[1,128], index: 4, kind: input, shape index: {}]   ;;  %s5887_s5 = inlined_call_operand.hbm [shape: bf16[128,256], index: 5, kind: input, shape index: {}]   ;;  %s5888_s6 = inlined_call_operand.vmem [shape: f32[1,256], index: 6, kind: input, shape index: {}]   ;;  %s5889_s7 = inlined_call_operand.vmem [shape: bf16[256,512], index: 7, kind: input, shape index: {}]   ;;  %s5890_s8 = inlined_call_operand.vmem [shape: f32[1,512], index: 8, kind: input, shape index: {}]   ;;  %s5891_s9 = inlined_call_operand.hbm [shape: bf16[512,128], index: 9, kind: input, shape index: {}]   ;;  %s5892_s10 = inlined_call_operand.hbm [shape: f32[2,1,128], index: 10, kind: output, shape index: {}]  }
   0x1   :  { %5910 = sst [smem:[#allocation21_spill]] %s5887_s5 }
   0x2   :  { %15 = vsyncpa [#allocation3], 0 }
   0x3   :  { %16 = vsyncpa [#allocation6], 0 }
   0x4   :  { %17 = vsyncpa [#allocation4], 0 }
   0x5   :  { %19 = vsyncpa [#allocation4 + $0x1], 0  ;;  %s4572_s13 = smov 0   ;;  %s4574_s14 = smov 0  }
   0x6   :  { %s4576_s15 = smov 0   ;;  %s4578_s16 = smov 0  }
   0x7   :  { %s4580_s17 = smov 0   ;;  %s4582_s18 = smov 0  }
   0x8 LB: > { %5911 = sst [smem:[#allocation12_spill]] %s4484_s13  ;;  %s3476_s19 = sadd.s32 4294967295, %s4504_s18   ;;  %s4504_s18 = sphi %s4582_s18, %s25_s18   ;;  %s4500_s17 = sphi %s4580_s17, %s5938_s17   ;;  %s4496_s16 = sphi %s4578_s16, %s5937_s16   ;;  %s4492_s15 = sphi %s4576_s15, %s5936_s15   ;;  %s4488_s14 = sphi %s4574_s14, %s5940_s14   ;;  %s4484_s13 = sphi %s4572_s13, %s5939_s13  }
   0x9   : > { %5912 = sst [smem:[#allocation13_spill]] %s4492_s15  ;;  %s3477_s20 = sadd.s32 4294967294, %s4504_s18  }
   0xa   : > { %5913 = sst [smem:[#allocation14_spill]] %s4500_s17  ;;  %s37_s21 = sadd.s32 1, %s4500_s17 }
   0xb   : > { %5914 = sst [smem:[#allocation15_spill]] %s4504_s18  ;;  %s263_s22 = sadd.s32 1, %s4492_s15 }
   0xc   : > { %p39_p0 = scmp.ge.s32.totalorder %s37_s21, 2  ;;  %p273_p1 = scmp.ne.s32.totalorder %s4492_s15, %s4488_s14 }
   0xd   : > { %p274_p2 = scmp.eq.s32.totalorder %s3476_s19, 1  ;;  %p279_p3 = scmp.ne.s32.totalorder %s4488_s14, %s4484_s13 }
   0xe   : > { %s5942_s21 = smov (%p39_p0, %s37_s21), 0  ;;  %p280_p5 = scmp.eq.s32.totalorder %s3477_s20, 1 }
   0xf   : > { %5915 = sst [smem:[#allocation16_spill]] %s5942_s21  ;;  %p4612_p4 = por %p274_p2, %p273_p1 }
  0x10   : > { %s258_s24 = ssub.s32 %s4500_s17, %s5942_s21  ;;  %p3478_p6 = scmp.ge.s32.totalorder %s4504_s18, 1 }
  0x11   : > { %s5916_s23 = scalar_select %p4612_p4, 1, 0 }
  0x12   : > { %p261_p7 = scmp.eq.s32.totalorder %s258_s24, 0  ;;  %p4619_p8 = por %p280_p5, %p279_p3 }
  0x13   : > { %5917 = sst [smem:[#allocation17_spill]] %s5916_s23  ;;  %p287_p9 = scmp.lt.s32.totalorder %s4504_s18, 3 }
  0x14   : > { %s5918_s25 = scalar_select %p4619_p8, 1, 0 }
  0x15   : > { %s4625_s26 = scalar_select %p261_p7, %s4492_s15, %s263_s22  }
  0x16   : > { %5919 = sst [smem:[#allocation18_spill]] %s5918_s25  ;;  %p4627_p10 = pnand %p3478_p6, %p287_p9 }
  0x17   : > { %5920 = sst [smem:[#allocation19_spill]] %s4625_s26  ;;  %p4631_p11 = scmp.eq.s32.totalorder %s3476_s19, 0 }
  0x18   : > { %s5923_s5 = sld [smem:[#allocation21_spill]]  ;;  %p4174_p12 = pneg %p4627_p10 }
  0x19   : > { %s4506_s12 = smov [#allocation5]   ;;  %s4507_s19 = smov 128  }
  0x1a   : > { %s323_s20 = sshll.u32 %s4506_s12, 4  ;;  %p4642_p13 = pnand %p4631_p11, %p4174_p12  ;;  %s324_s20 = int_to_ptr.vmem [resolvable:$true] %s323_s20 }
  0x1b   : > { %s4508_s24 = smov 8   ;;  %s4509_s21 = smov [#allocation2]  }
  0x1c   : > { %s306_s12 = sshll.u32 %s4509_s21, 4  ;;  %s344_s15 = sshll.u32 %s5891_s9, 4  ;;  %s307_s12 = int_to_ptr.vmem [resolvable:$true] %s306_s12  ;;  %s345_s15 = int_to_ptr.hbm [resolvable:$true] %s344_s15 }
  0x1d   : > { %s4510_s25 = smov 64   ;;  %s4511_s13 = smov 4  }
  0x1e   : > { %s321_s11 = sshll.u32 %s5923_s5, 4  ;;  %s304_s5 = sshll.u32 %s5885_s3, 4  ;;  %s322_s11 = int_to_ptr.hbm [resolvable:$true] %s321_s11  ;;  %s305_s5 = int_to_ptr.hbm [resolvable:$true] %s304_s5 }
  0x1f   : > { %4180 = dma.hbm_to_vmem [thread:$0]  (!%p4642_p13), %s322_s11, 2048, %s324_s20, [#allocation6], %s4507_s19, %s4507_s19, %s4508_s24  }
  0x20   : > { %4177 = dma.hbm_to_vmem [thread:$0]  (!%p4642_p13), %s305_s5, 512, %s307_s12, [#allocation3], %s4510_s25, %s4510_s25, %s4511_s13  }
  0x21   : > { %s4512_s18 = smov [#allocation7]   ;;  %375 = sbr.rel (%p4627_p10) target bundleno = 1264 (0x4f0), region = 60 }
  0x22   : > { %s346_s23 = sshll.u32 %s4512_s18, 4  ;;  %s347_s23 = int_to_ptr.vmem [resolvable:$true] %s346_s23 }
  0x23   : > { %4183 = dma.hbm_to_vmem [thread:$0]  (!%p4642_p13), %s345_s15, 4096, %s347_s23, [#allocation6], %s4510_s25, %s4510_s25, %s4511_s13  }
  0x26   : > { %4471 = dma.done.wait (%p4631_p11), [#allocation3], 512  }
  0x27   : > { %4473 = vsyncadd (%p4631_p11), [#allocation3], 4294966784 }
  0x28   : > { %4475 = dma.done.wait (%p4631_p11), [#allocation6], 6144  }
  0x29   : > { %4477 = vsyncadd (%p4631_p11), [#allocation6], 4294961152  ;;  %p428_p0 = scmp.lt.s32.totalorder %s4496_s16, 1  ;;  %v5908_v0 = vmov 3   ;;  %v5902_v1 = vmov 1   ;;  %v5904_v2 = vmov 0   ;;  %s3371_s11 = scalar_lea.hbm %s5892_s10, %s4496_s16 }
  0x2a   : > { %4264 = vset.pattern.permute.xlu0 %v5908_v0  ;;  %4255 = vset.pattern.permute.xlu2 %v5902_v1  ;;  %v5906_v13 = vmov 2   ;;  %v470_v30 = vld [vmem:[%s5883_s1] sm:$0xf]  ;;  %vm1900_vm0 = vcmask 1041409   ;;  %vm1903_vm1 = vcmask 1042434   ;;  %vm1906_vm2 = vcmask 1043459  }
  0x2b   : > { %4254 = vset.pattern.permute.xlu1 %v5904_v2  ;;  %s429_s5 = scalar_select %p428_p0, %s4496_s16, 1  ;;  %v4777_v32 = vperm.slane %v470_v30, 0  ;;  %v4788_v36 = vperm.slane %v470_v30, 1  ;;  %v4793_v37 = vld [vmem:[%s5884_s2] ss:$0 sm:$0xff]  ;;  %v4795_v38 = vperm.slane %v470_v30, 2 }
  0x2c   : > { %vm1909_vm3 = vcmask 1044484   ;;  %vm1912_vm4 = vcmask 1045509   ;;  %vm1915_vm5 = vcmask 1046534   ;;  %vm1918_vm6 = vcmask 1047559   ;;  %s425_s25 = sand.u32 1, %s4488_s14   ;;  %s3375_s19 = sshll.u32 %s3371_s11, 4  ;;  %s3376_s19 = int_to_ptr.hbm [resolvable:$true] %s3375_s19 }
  0x2d   : > { %s4043_s13 = sshll.u32 %s429_s5, 8  ;;  %vm2046_vm7 = vcmask 523264   ;;  %vm2426_vm8 = vcmask 1041408   ;;  %vm2428_vm9 = vcmask 1043458   ;;  %s426_s20 = scalar_lea.vmem [#allocation8], %s425_s25 }
  0x2e   : > { %s4676_s18 = scalar_lea.vmem %s5882_s0, %s4043_s13  ;;  %s3373_s22 = sshll.u32 %s426_s20, 4  ;;  %s3374_s22 = int_to_ptr.vmem [resolvable:$true] %s3373_s22 }
  0x2f   : > { %v442_v3 = vld [vmem:[%s4676_s18 + $0x20] sm:$0xff]  ;;  %v4680_v4 = vld [vmem:[%s4676_s18 + $0x10] sm:$0xff]  ;;  %v4686_v7 = vld [vmem:[%s4676_s18 + $0x38] sm:$0xff]  ;;  %s3362_s24 = scalar_lea.sflag [#allocation4], %s425_s25  ;;  %s4432_s29 = sshra.s32 %s3376_s19, 4  ;;  %s4433_s29 = int_to_ptr.hbm [resolvable:$true] %s4432_s29 }
  0x30   : > { %v438_v5 = vld [vmem:[%s4676_s18] sm:$0xff]  ;;  %494 = vperm.xlu1 %4254, %v442_v3   ;;  %1095 = vperm.xlu0 %4264, %v4680_v4   ;;  %v444_v6 = vld [vmem:[%s4676_s18 + $0x30] sm:$0xff]  ;;  %v4691_v8 = vld [vmem:[%s4676_s18 + $0x58] sm:$0xff]  ;;  %s4434_s30 = scalar_lea.hbm %s4433_s29, 1  ;;  %s4438_s16 = scalar_lea.hbm %s5892_s10, 2 }
  0x31   : > { %701 = vperm.xlu2 %4255, %v438_v5   ;;  %v439_v9 = vld [vmem:[%s4676_s18 + $0x8] sm:$0xff]  ;;  %v4698_v10 = vld [vmem:[%s4676_s18 + $0xa0] sm:$0xff]  ;;  %v441_v12 = vld [vmem:[%s4676_s18 + $0x18] sm:$0xff]  ;;  %p4435_p1 = scmp.ne.s32.totalorder %s4433_s29, %s4434_s30  ;;  %p4439_p5 = scmp.lt.s32.totalorder %s4433_s29, %s5892_s10 }
  0x32   : > { %v4701_v11 = vld [vmem:[%s4676_s18 + $0x28] sm:$0xff]  ;;  %v4712_v14 = vld [vmem:[%s4676_s18 + $0x40] sm:$0xff]  ;;  %v4719_v15 = vld [vmem:[%s4676_s18 + $0x78] sm:$0xff]  ;;  %p4440_p6 = scmp.lt.s32.totalorder %s4438_s16, %s4434_s30 }
  0x33   : > { %v4725_v16 = vld [vmem:[%s4676_s18 + $0xb0] sm:$0xff]  ;;  %v4730_v17 = vld [vmem:[%s4676_s18 + $0x98] sm:$0xff]  ;;  %v4758_v24 = vld [vmem:[%s4676_s18 + $0x60] sm:$0xff]  ;;  %p4436_p2 = pnand %p4435_p1, %p4612_p4 }
  0x34   : > { %v464_v18 = vld [vmem:[%s4676_s18 + $0xd0] sm:$0xff]  ;;  %v4780_v33 = vld [vmem:[%s4676_s18 + $0x48] sm:$0xff]  ;;  %v4783_v34 = vld [vmem:[%s4676_s18 + $0xc0] sm:$0xff]  ;;  %p4441_p7 = por %p4440_p6, %p4439_p5 }
  0x35   : > { %v4747_v21 = vld [vmem:[%s4676_s18 + $0x50] sm:$0xff]  ;;  %v4805_v46 = vld [vmem:[%s4676_s18 + $0xe8] sm:$0xff]  ;;  %p4437_p3 = pneg %p4436_p2 }
  0x36   : > { %v4755_v23 = vld [vmem:[%s4676_s18 + $0x70] sm:$0xff]  ;;  %v4808_v48 = vld [vmem:[%s4676_s18 + $0x68] sm:$0xff] }
  0x37   : > { %p4442_p9 = pnand %p4441_p7, %p4437_p3 }
  0x38   : > { %504 = vperm.xlu1 %4254, %v444_v6   ;;  %1115 = vperm.xlu0 %4264, %v4686_v7  }
  0x39   : > { %709 = vperm.xlu2 %4255, %v4680_v4  }
  0x40   : > { %4256 = vset.pattern.permute.xlu1 %v5902_v1  ;;  %1131 = vperm.xlu0 %4264, %v4691_v8  }
  0x41   : > { %4257 = vset.pattern.permute.xlu2 %v5904_v2  ;;  %725 = vperm.xlu1 %4256, %v444_v6  }
  0x42   : > { %479 = vperm.xlu2 %4257, %v439_v9  }
  0x48   : > { %1167 = vperm.xlu0 %4264, %v4698_v10  }
  0x49   : > { %4258 = vset.pattern.permute.xlu1 %v5904_v2 }
  0x4a   : > { %499 = vperm.xlu2 %4257, %v4701_v11   ;;  %489 = vperm.xlu1 %4258, %v441_v12  }
  0x50   : > { %4298 = vset.pattern.permute.xlu0 %v5902_v1 }
  0x51   : > { %717 = vperm.xlu0 %4298, %v442_v3  }
  0x52   : > { %4260 = vset.pattern.permute.xlu2 %v5906_v13  ;;  %4259 = vset.pattern.permute.xlu1 %v5906_v13 }
  0x53   : > { %902 = vperm.xlu2 %4260, %v4680_v4   ;;  %894 = vperm.xlu1 %4259, %v438_v5  }
  0x59   : > { %705 = vperm.xlu0 %4298, %v439_v9  }
  0x5b   : > { %918 = vperm.xlu2 %4260, %v444_v6   ;;  %910 = vperm.xlu1 %4259, %v442_v3  }
  0x61   : > { %733 = vperm.xlu0 %4298, %v4712_v14  }
  0x63   : > { %4262 = vset.pattern.permute.xlu2 %v5902_v1  ;;  %4261 = vset.pattern.permute.xlu1 %v5902_v1 }
  0x64   : > { %721 = vperm.xlu2 %4262, %v4701_v11   ;;  %713 = vperm.xlu1 %4261, %v441_v12  }
  0x69   : > { %761 = vperm.xlu0 %4298, %v4719_v15  }
  0x6c   : > { %4263 = vset.pattern.permute.xlu2 %v5908_v0  ;;  %729 = vperm.xlu1 %4261, %v4686_v7  }
  0x6d   : > { %1087 = vperm.xlu2 %4263, %v438_v5  }
  0x71   : > { %789 = vperm.xlu0 %4298, %v4725_v16  }
  0x74   : > { %4265 = vset.pattern.permute.xlu1 %v5908_v0 }
  0x75   : > { %1111 = vperm.xlu2 %4263, %v444_v6   ;;  %1103 = vperm.xlu1 %4265, %v442_v3  }
  0x79   : > { %777 = vperm.xlu0 %4298, %v4730_v17  }
  0x7d   : > { %4267 = vset.pattern.permute.xlu2 %v5906_v13  ;;  %4266 = vset.pattern.permute.xlu1 %v5906_v13 }
  0x7e   : > { %906 = vperm.xlu2 %4267, %v441_v12   ;;  %898 = vperm.xlu1 %4266, %v439_v9  }
  0x81   : > { %805 = vperm.xlu0 %4298, %v464_v18  }
  0x86   : > { %4268 = vset.pattern.permute.xlu2 %v5908_v0  ;;  %922 = vperm.xlu1 %4266, %v4686_v7  }
  0x87   : > { %1091 = vperm.xlu2 %4268, %v439_v9  }
  0x89   : > { %4306 = vset.pattern.permute.xlu0 %v5904_v2 }
  0x8a   : > { %474 = vperm.xlu0 %4306, %v438_v5  }
  0x8b   : > { %v4739_v19 = vpop.permute.xlu2 %701 }
  0x8e   : > { %4269 = vset.pattern.permute.xlu1 %v5908_v0 }
  0x8f   : > { %1107 = vperm.xlu2 %4268, %v4701_v11   ;;  %1099 = vperm.xlu1 %4269, %v441_v12  }
  0x92   : > { %484 = vperm.xlu0 %4306, %v4680_v4   ;;  %v4837_v4 = vperm.slane %v470_v30, 3 }
  0x93   : > { %v4744_v20 = vpop.permute.xlu2 %709 }
  0x97   : > { %4271 = vset.pattern.permute.xlu2 %v5904_v2  ;;  %4270 = vset.pattern.permute.xlu1 %v5904_v2 }
  0x98   : > { %524 = vperm.xlu2 %4271, %v4747_v21   ;;  %514 = vperm.xlu1 %4270, %v4712_v14  }
  0x9a   : > { %509 = vperm.xlu0 %4306, %v4686_v7  }
  0x9c   : > { %v480_v22 = vpop.permute.xlu2 %479 }
  0x9d   : > { %v634_v59 = vmul.f32 %v4777_v32, %v480_v22 }
  0x9f   : > { %v669_v63 = vadd.f32 %v4793_v37, %v634_v59 }
  0xa0   : > { %544 = vperm.xlu2 %4271, %v4755_v23   ;;  %534 = vperm.xlu1 %4270, %v4758_v24  }
  0xa2   : > { %v495_v25 = vpop.permute.xlu1 %494  ;;  %529 = vperm.xlu0 %4306, %v4691_v8   ;;  %v4763_v26 = vpop.permute.xlu0 %1095 }
  0xa3   : > { %v637_v60 = vmul.f32 %v4777_v32, %v495_v25 }
  0xa4   : > { %v500_v27 = vpop.permute.xlu2 %499 }
  0xa5   : > { %v638_v49 = vmul.f32 %v4777_v32, %v500_v27  ;;  %v672_v3 = vadd.f32 %v4793_v37, %v637_v60 }
  0xa7   : > { %v673_v52 = vadd.f32 %v4793_v37, %v638_v49 }
  0xa8   : > { %4273 = vset.pattern.permute.xlu2 %v5902_v1  ;;  %4272 = vset.pattern.permute.xlu1 %v5902_v1 }
  0xa9   : > { %749 = vperm.xlu2 %4273, %v4758_v24   ;;  %741 = vperm.xlu1 %4272, %v4747_v21  }
  0xaa   : > { %v505_v28 = vpop.permute.xlu1 %504  ;;  %574 = vperm.xlu0 %4306, %v4698_v10   ;;  %v4770_v29 = vpop.permute.xlu0 %1115 }
  0xab   : > { %v639_v35 = vmul.f32 %v4777_v32, %v505_v28 }
  0xad   : > { %v4775_v31 = vpop.permute.xlu2 %902  ;;  %v674_v41 = vadd.f32 %v4793_v37, %v639_v35 }
  0xb1   : > { %4274 = vset.pattern.permute.xlu2 %v5904_v2  ;;  %757 = vperm.xlu1 %4272, %v4755_v23  }
  0xb2   : > { %519 = vperm.xlu2 %4274, %v4780_v33   ;;  %594 = vperm.xlu0 %4306, %v4783_v34   ;;  %v4799_v39 = vpop.permute.xlu0 %1131 }
  0xb3   : > { %v726_v40 = vpop.permute.xlu1 %725 }
  0xb4   : > { %v835_v42 = vmul.f32 %v4788_v36, %v726_v40 }
  0xb5   : > { %v919_v43 = vpop.permute.xlu2 %918 }
  0xb6   : > { %v867_v44 = vadd.f32 %v835_v42, %v674_v41  ;;  %v1028_v45 = vmul.f32 %v4795_v38, %v919_v43 }
  0xb8   : > { %v1060_v47 = vadd.f32 %v1028_v45, %v867_v44 }
  0xb9   : > { %4275 = vset.pattern.permute.xlu1 %v5904_v2 }
  0xba   : > { %549 = vperm.xlu2 %4274, %v4719_v15   ;;  %619 = vperm.xlu0 %4306, %v4805_v46   ;;  %v4814_v50 = vpop.permute.xlu0 %1167 }
  0xbb   : > { %539 = vperm.xlu1 %4275, %v4808_v48  }
  0xbc   : > { %v490_v51 = vpop.permute.xlu1 %489 }
  0xbd   : > { %v636_v27 = vmul.f32 %v4777_v32, %v490_v51 }
  0xbe   : > { %v722_v53 = vpop.permute.xlu2 %721 }
  0xbf   : > { %v834_v54 = vmul.f32 %v4788_v36, %v722_v53  ;;  %v671_v35 = vadd.f32 %v4793_v37, %v636_v27  ;;  %v4870_v53 = vld [vmem:[%s4676_s18 + $0x80] sm:$0xff] }
  0xc1   : > { %v4819_v55 = vadd.f32 %v834_v54, %v673_v52 }
  0xc2   : > { %4277 = vset.pattern.permute.xlu2 %v5906_v13  ;;  %4310 = vset.pattern.permute.xlu0 %v5906_v13 }
  0xc3   : > { %4276 = vset.pattern.permute.xlu1 %v5906_v13  ;;  %934 = vperm.xlu2 %4277, %v4747_v21   ;;  %v718_v56 = vpop.permute.xlu0 %717 }
  0xc4   : > { %914 = vperm.xlu0 %4310, %v4701_v11   ;;  %926 = vperm.xlu1 %4276, %v4712_v14   ;;  %v833_v61 = vmul.f32 %v4788_v36, %v718_v56 }
  0xc5   : > { %v4827_v57 = vpop.permute.xlu1 %894 }
  0xc6   : > { %v865_v7 = vadd.f32 %v833_v61, %v672_v3 }
  0xc7   : > { %v4829_v58 = vpop.permute.xlu2 %1087 }
  0xcb   : > { %4278 = vset.pattern.permute.xlu2 %v5902_v1  ;;  %v706_v62 = vpop.permute.xlu0 %705 }
  0xcc   : > { %v830_v5 = vmul.f32 %v4788_v36, %v706_v62  ;;  %942 = vperm.xlu0 %4310, %v4758_v24   ;;  %950 = vperm.xlu1 %4276, %v4755_v23  }
  0xcd   : > { %737 = vperm.xlu2 %4278, %v4780_v33   ;;  %v911_v6 = vpop.permute.xlu1 %910 }
  0xce   : > { %v862_v9 = vadd.f32 %v830_v5, %v669_v63  ;;  %v1026_v11 = vmul.f32 %v4795_v38, %v911_v6 }
  0xcf   : > { %v1112_v12 = vpop.permute.xlu2 %1111 }
  0xd0   : > { %v1058_v18 = vadd.f32 %v1026_v11, %v865_v7  ;;  %v1221_v22 = vmul.f32 %v4837_v4, %v1112_v12  ;;  %v829_v11 = vmul.f32 %v4788_v36, %v4739_v19  ;;  %v1215_v19 = vmul.f32 %v4837_v4, %v4829_v58 }
  0xd1   : > { %v1217_v58 = vmul.f32 %v4837_v4, %v4763_v26 }
  0xd2   : > { %v1253_v25 = vadd.f32 %v1221_v22, %v1060_v47 }
  0xd3   : > { %v4846_v28 = vpop.permute.xlu0 %733 }
  0xd4   : > { %930 = vperm.xlu0 %4310, %v4780_v33   ;;  %4279 = vset.pattern.permute.xlu1 %v5902_v1 }
  0xd5   : > { %753 = vperm.xlu2 %4278, %v4808_v48   ;;  %745 = vperm.xlu1 %4279, %v4691_v8  }
  0xd6   : > { %v714_v30 = vpop.permute.xlu1 %713 }
  0xd7   : > { %v832_v40 = vmul.f32 %v4788_v36, %v714_v30 }
  0xd8   : > { %v907_v42 = vpop.permute.xlu2 %906 }
  0xd9   : > { %v864_v41 = vadd.f32 %v832_v40, %v671_v35 }
  0xdb   : > { %v4854_v43 = vpop.permute.xlu0 %761 }
  0xdc   : > { %958 = vperm.xlu0 %4310, %v4870_v53  }
  0xdd   : > { %4281 = vset.pattern.permute.xlu2 %v5908_v0  ;;  %4280 = vset.pattern.permute.xlu1 %v5908_v0 }
  0xde   : > { %1127 = vperm.xlu2 %4281, %v4747_v21   ;;  %1119 = vperm.xlu1 %4280, %v4712_v14   ;;  %v4860_v44 = vpop.permute.xlu1 %729  ;;  %v1285_v21 = vmax.f32 %v1253_v25, 0.0 }
  0xe1   : > { %v1092_v45 = vpop.permute.xlu2 %1091 }
  0xe2   : > { %v1216_v6 = vmul.f32 %v4837_v4, %v1092_v45 }
  0xe3   : > { %v4862_v47 = vpop.permute.xlu0 %789 }
  0xe6   : > { %1143 = vperm.xlu2 %4281, %v4755_v23   ;;  %1135 = vperm.xlu1 %4280, %v4758_v24  }
  0xe7   : > { %v1104_v49 = vpop.permute.xlu1 %1103 }
  0xe8   : > { %v1219_v51 = vmul.f32 %v4837_v4, %v1104_v49 }
  0xe9   : > { %v4867_v52 = vpop.permute.xlu2 %1107 }
  0xea   : > { %v1251_v54 = vadd.f32 %v1219_v51, %v1058_v18 }
  0xeb   : > { %v4873_v14 = vpop.permute.xlu0 %777 }
  0xec   : > { %v1283_v56 = vmax.f32 %v1251_v54, 0.0 }
  0xee   : > { %v4875_v59 = vmax.f32 %v1283_v56, %v1285_v21  ;;  %4283 = vset.pattern.permute.xlu2 %v5906_v13  ;;  %4282 = vset.pattern.permute.xlu1 %v5906_v13  ;;  %v1024_v21 = vmul.f32 %v4795_v38, %v4775_v31 }
  0xef   : > { %946 = vperm.xlu2 %4283, %v4808_v48   ;;  %938 = vperm.xlu1 %4282, %v4691_v8   ;;  %v1025_v8 = vmul.f32 %v4795_v38, %v907_v42 }
  0xf0   : > { %v899_v23 = vpop.permute.xlu1 %898 }
  0xf1   : > { %v1023_v62 = vmul.f32 %v4795_v38, %v899_v23  ;;  %v1057_v25 = vadd.f32 %v1025_v8, %v864_v41  ;;  %v831_v41 = vmul.f32 %v4788_v36, %v4744_v20  ;;  %v4921_v20 = vld [vmem:[%s4676_s18 + $0xb8] sm:$0xff] }
  0xf2   : > { %v4881_v24 = vpop.permute.xlu2 %524  ;;  %986 = vperm.xlu0 %4310, %v4921_v20  }
  0xf3   : > { %v4883_v60 = vpop.permute.xlu0 %805  ;;  %v1055_v7 = vadd.f32 %v1023_v62, %v862_v9  ;;  %v837_v62 = vmul.f32 %v4788_v36, %v4846_v28 }
  0xf5   : > { %v1248_v27 = vadd.f32 %v1216_v6, %v1055_v7 }
  0xf7   : > { %4284 = vset.pattern.permute.xlu2 %v5908_v0  ;;  %954 = vperm.xlu1 %4282, %v4719_v15   ;;  %v1280_v45 = vmax.f32 %v1248_v27, 0.0 }
  0xf8   : > { %1123 = vperm.xlu2 %4284, %v4780_v33   ;;  %v923_v61 = vpop.permute.xlu1 %922  ;;  %v1022_v33 = vmul.f32 %v4795_v38, %v4827_v57  ;;  %v4907_v57 = vld [vmem:[%s4676_s18 + $0x90] sm:$0xff] }
  0xfa   : > { %v4889_v63 = vpop.permute.xlu2 %544 }
  0xfc   : > { %v475_v3 = vpop.permute.xlu0 %474 }
  0xfd   : > { %v633_v5 = vmul.f32 %v4777_v32, %v475_v3 }
  0xff   : > { %v668_v12 = vadd.f32 %v4793_v37, %v633_v5  ;;  %4285 = vset.pattern.permute.xlu1 %v5908_v0 }
 0x100   : > { %1147 = vperm.xlu2 %4284, %v4719_v15   ;;  %1139 = vperm.xlu1 %4285, %v4808_v48  }
 0x101   : > { %v861_v18 = vadd.f32 %v829_v11, %v668_v12  ;;  %v1100_v22 = vpop.permute.xlu1 %1099  ;;  %v836_v12 = vmul.f32 %v4788_v36, %v4860_v44 }
 0x102   : > { %v1218_v9 = vmul.f32 %v4837_v4, %v1100_v22 }
 0x103   : > { %v1054_v30 = vadd.f32 %v1022_v33, %v861_v18  ;;  %v750_v35 = vpop.permute.xlu2 %749 }
 0x104   : > { %v1250_v40 = vadd.f32 %v1218_v9, %v1057_v25  ;;  %v485_v42 = vpop.permute.xlu0 %484  ;;  %v1222_v9 = vmul.f32 %v4837_v4, %v4770_v29 }
 0x105   : > { %v1247_v15 = vadd.f32 %v1215_v19, %v1054_v30  ;;  %v635_v48 = vmul.f32 %v4777_v32, %v485_v42  ;;  %v1029_v30 = vmul.f32 %v4795_v38, %v923_v61 }
 0x106   : > { %v1282_v49 = vmax.f32 %v1250_v40, 0.0 }
 0x107   : > { %v670_v51 = vadd.f32 %v4793_v37, %v635_v48  ;;  %v1279_v28 = vmax.f32 %v1247_v15, 0.0 }
 0x108   : > { %v1312_v54 = vmax.f32 %v1280_v45, %v1282_v49  ;;  %4287 = vset.pattern.permute.xlu2 %v5904_v2  ;;  %4286 = vset.pattern.permute.xlu1 %v5904_v2 }
 0x109   : > { %v863_v56 = vadd.f32 %v831_v41, %v670_v51  ;;  %564 = vperm.xlu2 %4287, %v4907_v57   ;;  %554 = vperm.xlu1 %4286, %v4870_v53  }
 0x10a   : > { %v515_v23 = vpop.permute.xlu1 %514  ;;  %v1346_v11 = vrot.slane %v1312_v54, 2  ;;  %v1347_v33 = vrot.slane %v1312_v54, 4  ;;  %v1348_v18 = vrot.slane %v1312_v54, 6  ;;  %v3493_v19 = vrot.slane %v1312_v54, 9 }
 0x10b   : > { %v1056_v3 = vadd.f32 %v1024_v21, %v863_v56  ;;  %v641_v5 = vmul.f32 %v4777_v32, %v515_v23  ;;  %v841_v21 = vmul.f32 %v4788_v36, %v750_v35  ;;  %v643_v35 = vmul.f32 %v4777_v32, %v4881_v24 }
 0x10c   : > { %v510_v26 = vpop.permute.xlu0 %509  ;;  %v4927_v8 = vpop.permute.xlu2 %519  ;;  %v3494_v44 = vrot.slane %v1346_v11, 9  ;;  %v3495_v48 = vrot.slane %v1347_v33, 9  ;;  %v3496_v45 = vrot.slane %v1348_v18, 9  ;;  %v1635_v29 = vmax.f32 %v1312_v54, %v3493_v19 }
 0x10d   : > { %v1249_v31 = vadd.f32 %v1217_v58, %v1056_v3  ;;  %v676_v6 = vadd.f32 %v4793_v37, %v641_v5  ;;  %v640_v7 = vmul.f32 %v4777_v32, %v510_v26  ;;  %v678_v24 = vadd.f32 %v4793_v37, %v643_v35 }
 0x10e   : > { %v647_v35 = vmul.f32 %v4777_v32, %v4889_v63 }
 0x10f   : > { %v1281_v22 = vmax.f32 %v1249_v31, 0.0  ;;  %v675_v25 = vadd.f32 %v4793_v37, %v640_v7  ;;  %v4934_v27 = vadd.f32 %v837_v62, %v676_v6  ;;  %v1636_v31 = vmax.f32 %v1346_v11, %v3494_v44 }
 0x111   : > { %v1311_v40 = vmax.f32 %v1279_v28, %v1281_v22  ;;  %v868_v42 = vadd.f32 %v836_v12, %v675_v25  ;;  %4288 = vset.pattern.permute.xlu2 %v5902_v1  ;;  %584 = vperm.xlu1 %4286, %v4725_v16   ;;  %v1637_v28 = vmax.f32 %v1347_v33, %v3495_v48 }
 0x112   : > { %765 = vperm.xlu2 %4288, %v4870_v53   ;;  %v535_v15 = vpop.permute.xlu1 %534  ;;  %v1638_v22 = vmax.f32 %v1348_v18, %v3496_v45  ;;  %v1709_v11 = vpack.c.bf16 %v1636_v31, %v1636_v31 }
 0x113   : > { %v1343_v49 = vrot.slane %v1311_v40, 2  ;;  %v1344_v41 = vrot.slane %v1311_v40, 4  ;;  %v3489_v51 = vrot.slane %v1311_v40, 9  ;;  %v1061_v58 = vadd.f32 %v1029_v30, %v868_v42 }
 0x114   : > { %v645_v61 = vmul.f32 %v4777_v32, %v535_v15  ;;  %v4944_v56 = vpop.permute.xlu0 %529  ;;  %v4946_v23 = vpop.permute.xlu2 %549  ;;  %v1345_v62 = vrot.slane %v1311_v40, 6  ;;  %v1708_v42 = vpack.c.bf16 %v1635_v29, %v1635_v29  ;;  %v1710_v15 = vpack.c.bf16 %v1637_v28, %v1637_v28 }
 0x115   : > { %v3490_v3 = vrot.slane %v1343_v49, 9  ;;  %v1631_v5 = vmax.f32 %v1311_v40, %v3489_v51  ;;  %v4948_v26 = vadd.f32 %v1222_v9, %v1061_v58  ;;  %v3491_v7 = vrot.slane %v1344_v41, 9 }
 0x116   : > { %v680_v6 = vadd.f32 %v4793_v37, %v645_v61  ;;  %v3492_v12 = vrot.slane %v1345_v62, 9  ;;  %v1711_v48 = vpack.c.bf16 %v1638_v22, %v1638_v22  ;;  %v1839_v29 = vunpack.c.l.b16 %v1708_v42 }
 0x117   : > { %v1632_v54 = vmax.f32 %v1343_v49, %v3490_v3  ;;  %v1633_v19 = vmax.f32 %v1344_v41, %v3491_v7  ;;  %v1704_v9 = vpack.c.bf16 %v1631_v5, %v1631_v5  ;;  %v1841_v31 = vunpack.c.l.b16 %v1710_v15 }
 0x118   : > { %v4953_v25 = vadd.f32 %v841_v21, %v680_v6  ;;  %v1634_v30 = vmax.f32 %v1345_v62, %v3492_v12  ;;  %v1840_v62 = vunpack.c.l.b16 %v1709_v11  ;;  %v1842_v7 = vunpack.c.l.b16 %v1711_v48 }
 0x119   : > { %4289 = vset.pattern.permute.xlu1 %v5902_v1  ;;  %v1705_v40 = vpack.c.bf16 %v1632_v54, %v1632_v54  ;;  %v1706_v33 = vpack.c.bf16 %v1633_v19, %v1633_v19  ;;  %v1835_v61 = vunpack.c.l.b16 %v1704_v9  ;;  %v4970_v54 = vld [vmem:[%s4676_s18 + $0x88] sm:$0xff]  ;;  %v1908_v19 = vrot.slane %v1839_v29, 4  ;;  %v4047_v9 = vld [vmem:[#allocation2 + $0x18] sm:$0xff] }
 0x11a   : > { %781 = vperm.xlu2 %4288, %v4698_v10   ;;  %773 = vperm.xlu1 %4289, %v4907_v57   ;;  %v1707_v44 = vpack.c.bf16 %v1634_v30, %v1634_v30  ;;  %v1911_v42 = vrot.slane %v1840_v62, 3  ;;  %v1914_v11 = vrot.slane %v1841_v31, 2  ;;  %v682_v15 = vadd.f32 %v4793_v37, %v647_v35  ;;  %v4993_v29 = vld [vmem:[%s4676_s18 + $0xa8] sm:$0xff] }
 0x11b   : > { %v742_v18 = vpop.permute.xlu1 %741  ;;  %v1836_v45 = vunpack.c.l.b16 %v1705_v40  ;;  %v1837_v51 = vunpack.c.l.b16 %v1706_v33  ;;  %2063 = vmatpush.bf16.msra.mxu0 %v4047_v9  ;;  %v1349_v62 = vrot.slane %v4875_v59, 2  ;;  %v1351_v35 = vrot.slane %v4875_v59, 6 }
 0x11c   : > { %v839_v49 = vmul.f32 %v4788_v36, %v742_v18  ;;  %v4960_v41 = vpop.permute.xlu0 %574  ;;  %v1838_v58 = vunpack.c.l.b16 %v1707_v44  ;;  %v1917_v44 = vrot.slane %v1842_v7, 1  ;;  %v1350_v7 = vrot.slane %v4875_v59, 4 }
 0x11d   : > { %v4962_v21 = vpop.permute.xlu2 %934  ;;  %v1899_v3 = vrot.slane %v1836_v45, 7  ;;  %v1902_v6 = vrot.slane %v1837_v51, 6  ;;  %v4046_v51 = vld [vmem:[#allocation2 + $0x10] sm:$0xff] }
 0x11e   : > { %v4964_v5 = vadd.f32 %v839_v49, %v678_v24  ;;  %v1905_v28 = vrot.slane %v1838_v58, 5 }
 0x11f   : > { %v1901_v12 = vsel %vm1900_vm0, %v1899_v3, %v1835_v61  ;;  %2064 = vmatpush.bf16.msra.mxu0 %v4046_v51  ;;  %v4045_v61 = vld [vmem:[#allocation2 + $0x8] sm:$0xff] }
 0x120   : > { %v1904_v22 = vsel %vm1903_vm1, %v1902_v6, %v1901_v12  ;;  %v4044_v6 = vld [vmem:[#allocation2] sm:$0xff] }
 0x121   : > { %v1907_v30 = vsel %vm1906_vm2, %v1905_v28, %v1904_v22  ;;  %v3498_v28 = vrot.slane %v1349_v62, 9  ;;  %v3499_v22 = vrot.slane %v1350_v7, 9 }
 0x122   : > { %4291 = vset.pattern.permute.xlu2 %v5904_v2  ;;  %4290 = vset.pattern.permute.xlu1 %v5904_v2  ;;  %v1910_v40 = vsel %vm1909_vm3, %v1908_v19, %v1907_v30  ;;  %v3497_v30 = vrot.slane %v4875_v59, 9 }
 0x123   : > { %569 = vperm.xlu2 %4291, %v4730_v17   ;;  %559 = vperm.xlu1 %4290, %v4970_v54   ;;  %v758_v63 = vpop.permute.xlu1 %757  ;;  %v1913_v33 = vsel %vm1912_vm4, %v1911_v42, %v1910_v40  ;;  %v1640_v19 = vmax.f32 %v1349_v62, %v3498_v28  ;;  %v3500_v40 = vrot.slane %v1351_v35, 9 }
 0x124   : > { %v843_v24 = vmul.f32 %v4788_v36, %v758_v63  ;;  %v4982_v18 = vpop.permute.xlu0 %594  ;;  %v1916_v48 = vsel %vm1915_vm5, %v1914_v11, %v1913_v33  ;;  %2065 = vmatpush.bf16.msra.mxu0 %v4045_v61  ;;  %v1641_v11 = vmax.f32 %v1350_v7, %v3499_v22  ;;  %v1286_v7 = vmax.f32 %v4948_v26, 0.0 }
 0x125   : > { %v4986_v45 = vsel %vm1918_vm6, %v1917_v44, %v1916_v48  ;;  %v1713_v33 = vpack.c.bf16 %v1640_v19, %v1640_v19  ;;  %v1639_v48 = vmax.f32 %v4875_v59, %v3497_v30 }
 0x126   : > { %v4988_v49 = vadd.f32 %v843_v24, %v682_v15  ;;  %v1220_v15 = vmul.f32 %v4837_v4, %v4867_v52  ;;  %v1714_v51 = vpack.c.bf16 %v1641_v11, %v1641_v11 }
 0x127   : > { %v4990_v58 = vpop.permute.xlu2 %737  ;;  %v1844_v62 = vunpack.c.l.b16 %v1713_v33  ;;  %v1712_v28 = vpack.c.bf16 %v1639_v48, %v1639_v48 }
 0x128   : > { %2066 = vmatpush.bf16.msra.mxu0 %v4044_v6  ;;  %v1845_v52 = vunpack.c.l.b16 %v1714_v51 }
 0x129   : > { %v1843_v30 = vunpack.c.l.b16 %v1712_v28 }
 0x12b   : > { %589 = vperm.xlu2 %4291, %v4921_v20   ;;  %579 = vperm.xlu1 %4290, %v4993_v29  }
 0x12c   : > { %v4998_v3 = vpop.permute.xlu0 %619 }
 0x12d   : > { %5925 = vst [vmem:[#allocation20_spill] sm:$0xff] %v4998_v3  ;;  %v5000_v31 = vpop.permute.xlu1 %539 }
 0x12f   : > { %v5003_v12 = vpop.permute.xlu2 %753 }
 0x133   : > { %4293 = vset.pattern.permute.xlu2 %v5906_v13  ;;  %4292 = vset.pattern.permute.xlu1 %v5906_v13 }
 0x134   : > { %974 = vperm.xlu2 %4293, %v4698_v10   ;;  %966 = vperm.xlu1 %4292, %v4907_v57   ;;  %v1642_v10 = vmax.f32 %v1351_v35, %v3500_v40 }
 0x136   : > { %v915_v42 = vpop.permute.xlu0 %914  ;;  %v927_v9 = vpop.permute.xlu1 %926 }
 0x137   : > { %v1027_v63 = vmul.f32 %v4795_v38, %v915_v42  ;;  %v1920_v42 = vrot.slane %v1844_v62, 7 }
 0x138   : > { %v1128_v44 = vpop.permute.xlu2 %1127 }
 0x139   : > { %v1059_v24 = vadd.f32 %v1027_v63, %v4819_v55  ;;  %v1715_v55 = vpack.c.bf16 %v1642_v10, %v1642_v10  ;;  %v1921_v51 = vsel %vm1900_vm0, %v1920_v42, %v1843_v30 }
 0x13b   : > { %v1252_v61 = vadd.f32 %v1220_v15, %v1059_v24  ;;  %v1846_v15 = vunpack.c.l.b16 %v1715_v55  ;;  %v1922_v24 = vrot.slane %v1845_v52, 6 }
 0x13c   : > { %4294 = vset.pattern.permute.xlu2 %v5902_v1  ;;  %982 = vperm.xlu1 %4292, %v4725_v16  }
 0x13d   : > { %v1284_v6 = vmax.f32 %v1252_v61, 0.0  ;;  %769 = vperm.xlu2 %4294, %v4970_v54   ;;  %v1923_v52 = vsel %vm1903_vm1, %v1922_v24, %v1921_v51  ;;  %v1924_v2 = vrot.slane %v1846_v15, 5  ;;  %v1030_v24 = vmul.f32 %v4795_v38, %v927_v9 }
 0x13e   : > { %v951_v22 = vpop.permute.xlu1 %950  ;;  %v5926_v15 = vmov 3  }
 0x13f   : > { %v1314_v19 = vmax.f32 %v1284_v6, %v1286_v7  ;;  %v1925_v3 = vsel %vm1906_vm2, %v1924_v2, %v1923_v52 }
 0x140   : > { %v5020_v59 = vpop.permute.xlu2 %1143 }
 0x141   : > { %v3501_v35 = vrot.slane %v1314_v19, 9  ;;  %v1352_v40 = vrot.slane %v1314_v19, 2  ;;  %v1353_v11 = vrot.slane %v1314_v19, 4  ;;  %v1354_v63 = vrot.slane %v1314_v19, 6 }
 0x143   : > { %v1643_v33 = vmax.f32 %v1314_v19, %v3501_v35  ;;  %v3502_v26 = vrot.slane %v1352_v40, 9  ;;  %v3503_v61 = vrot.slane %v1353_v11, 9  ;;  %v3504_v48 = vrot.slane %v1354_v63, 9 }
 0x144   : > { %4295 = vset.pattern.permute.xlu1 %v5902_v1 }
 0x145   : > { %793 = vperm.xlu2 %4294, %v4921_v20   ;;  %785 = vperm.xlu1 %4295, %v4993_v29   ;;  %v1716_v10 = vpack.c.bf16 %v1643_v33, %v1643_v33  ;;  %v1644_v62 = vmax.f32 %v1352_v40, %v3502_v26  ;;  %v1645_v6 = vmax.f32 %v1353_v11, %v3503_v61 }
 0x146   : > { %v1646_v7 = vmax.f32 %v1354_v63, %v3504_v48  ;;  %v1032_v40 = vmul.f32 %v4795_v38, %v4962_v21  ;;  %v1225_v61 = vmul.f32 %v4837_v4, %v1128_v44  ;;  %v1062_v44 = vadd.f32 %v1030_v24, %v4934_v27 }
 0x147   : > { %v5026_v28 = vpop.permute.xlu1 %745  ;;  %v1847_v19 = vunpack.c.l.b16 %v1716_v10  ;;  %v1717_v55 = vpack.c.bf16 %v1644_v62, %v1644_v62  ;;  %v1718_v35 = vpack.c.bf16 %v1645_v6, %v1645_v6  ;;  %v1036_v10 = vmul.f32 %v4795_v38, %v951_v22  ;;  %v5058_v22 = vld [vmem:[%s4676_s18 + $0xf0] sm:$0xff] }
 0x148   : > { %v1719_v1 = vpack.c.bf16 %v1646_v7, %v1646_v7  ;;  %v1229_v27 = vmul.f32 %v4837_v4, %v5020_v59  ;;  %1014 = vperm.xlu0 %4310, %v5058_v22  }
 0x149   : > { %v5029_v13 = vpop.permute.xlu2 %946  ;;  %v1926_v42 = vrot.slane %v1847_v19, 4  ;;  %v1848_v30 = vunpack.c.l.b16 %v1717_v55  ;;  %v1849_v0 = vunpack.c.l.b16 %v1718_v35  ;;  %v1068_v52 = vadd.f32 %v1036_v10, %v4988_v49 }
 0x14a   : > { %v1850_v11 = vunpack.c.l.b16 %v1719_v1  ;;  %v1064_v1 = vadd.f32 %v1032_v40, %v4964_v5  ;;  %v5927_v55 = vmov 2  }
 0x14b   : > { %v1927_v63 = vsel %vm1909_vm3, %v1926_v42, %v1925_v3  ;;  %v1928_v33 = vrot.slane %v1848_v30, 3  ;;  %v1930_v26 = vrot.slane %v1849_v0, 2  ;;  %v642_v42 = vmul.f32 %v4777_v32, %v4927_v8 }
 0x14c   : > { %v1932_v21 = vrot.slane %v1850_v11, 1  ;;  %v1257_v48 = vadd.f32 %v1225_v61, %v1064_v1  ;;  %v1261_v59 = vadd.f32 %v1229_v27, %v1068_v52 }
 0x14d   : > { %4297 = vset.pattern.permute.xlu2 %v5926_v15  ;;  %4296 = vset.pattern.permute.xlu1 %v5926_v15  ;;  %v1929_v2 = vsel %vm1912_vm4, %v1928_v33, %v1927_v63  ;;  %v644_v63 = vmul.f32 %v4777_v32, %v4944_v56  ;;  %v677_v8 = vadd.f32 %v4793_v37, %v642_v42 }
 0x14e   : > { %1159 = vperm.xlu2 %4297, %v4907_v57   ;;  %1151 = vperm.xlu1 %4296, %v4870_v53   ;;  %v1931_v3 = vsel %vm1915_vm5, %v1930_v26, %v1929_v2  ;;  %v943_v53 = vpop.permute.xlu0 %942  ;;  %v1289_v5 = vmax.f32 %v1257_v48, 0.0 }
 0x14f   : > { %v1933_v9 = vsel %vm1918_vm6, %v1932_v21, %v1931_v3  ;;  %v1034_v19 = vmul.f32 %v4795_v38, %v943_v53  ;;  %v838_v21 = vmul.f32 %v4788_v36, %v4990_v58  ;;  %v648_v58 = vmul.f32 %v4777_v32, %v4946_v23 }
 0x150   : > { %v1120_v0 = vpop.permute.xlu1 %1119  ;;  %v2018_v57 = vpack.c.b16 %v1933_v9, %v4986_v45  ;;  %v679_v9 = vadd.f32 %v4793_v37, %v644_v63 }
 0x151   : > { %v1223_v51 = vmul.f32 %v4837_v4, %v1120_v0  ;;  %v1066_v40 = vadd.f32 %v1034_v19, %v4953_v25  ;;  %v1293_v25 = vmax.f32 %v1261_v59, 0.0  ;;  %v5074_v0 = vld [vmem:[%s4676_s18 + $0xd8] sm:$0xff]  ;;  %v870_v10 = vadd.f32 %v838_v21, %v677_v8 }
 0x152   : > { %v1124_v62 = vpop.permute.xlu2 %1123  ;;  %3569 = vmatmul.msk.bf16.vlgmr.msra.gmra.mxu0 %vm2046_vm7, %v2018_v57  ;;  %1002 = vperm.xlu0 %4310, %v5074_v0   ;;  %v646_v19 = vmul.f32 %v4777_v32, %v5000_v31 }
 0x153   : > { %v1255_v6 = vadd.f32 %v1223_v51, %v1062_v44  ;;  %v840_v44 = vmul.f32 %v4788_v36, %v5026_v28  ;;  %v1226_v28 = vmul.f32 %v4837_v4, %v4799_v39 }
 0x154   : > { %v681_v31 = vadd.f32 %v4793_v37, %v646_v19 }
 0x155   : > { %v1287_v7 = vmax.f32 %v1255_v6, 0.0  ;;  %v1224_v6 = vmul.f32 %v4837_v4, %v1124_v62  ;;  %v872_v27 = vadd.f32 %v840_v44, %v679_v9  ;;  %v683_v62 = vadd.f32 %v4793_v37, %v648_v58 }
 0x156   : > { %4299 = vset.pattern.permute.xlu2 %v5927_v55  ;;  %1175 = vperm.xlu1 %4296, %v4725_v16   ;;  %v931_v26 = vpop.permute.xlu0 %930 }
 0x157   : > { %v1315_v45 = vmax.f32 %v1287_v7, %v1289_v5  ;;  %962 = vperm.xlu2 %4299, %v4970_v54   ;;  %v1031_v56 = vmul.f32 %v4795_v38, %v931_v26  ;;  %v844_v7 = vmul.f32 %v4788_v36, %v4854_v43  ;;  %v653_v43 = vmul.f32 %v4777_v32, %v4960_v41 }
 0x158   : > { %v1136_v35 = vpop.permute.xlu1 %1135 }
 0x159   : > { %v1355_v30 = vrot.slane %v1315_v45, 2  ;;  %v1356_v49 = vrot.slane %v1315_v45, 4  ;;  %v1227_v11 = vmul.f32 %v4837_v4, %v1136_v35  ;;  %v1357_v24 = vrot.slane %v1315_v45, 6 }
 0x15a   : > { %v5065_v16 = vpop.permute.xlu2 %1147  ;;  %v3505_v48 = vrot.slane %v1315_v45, 9  ;;  %v1063_v52 = vadd.f32 %v1031_v56, %v870_v10  ;;  %v876_v41 = vadd.f32 %v844_v7, %v683_v62  ;;  %v5110_v21 = vadd.f32 %v4793_v37, %v653_v43  ;;  %4318 = vset.pattern.permute.xlu0 %v5926_v15 }
 0x15b   : > { %v3506_v33 = vrot.slane %v1355_v30, 9  ;;  %v3507_v61 = vrot.slane %v1356_v49, 9  ;;  %v1259_v2 = vadd.f32 %v1227_v11, %v1066_v40  ;;  %v3508_v51 = vrot.slane %v1357_v24, 9  ;;  %1183 = vperm.xlu0 %4318, %v4783_v34  }
 0x15c   : > { %v1647_v35 = vmax.f32 %v1315_v45, %v3505_v48  ;;  %v1256_v59 = vadd.f32 %v1224_v6, %v1063_v52  ;;  %v842_v45 = vmul.f32 %v4788_v36, %v5003_v12  ;;  %v1230_v37 = vmul.f32 %v4837_v4, %v5065_v16 }
 0x15d   : > { %v1648_v1 = vmax.f32 %v1355_v30, %v3506_v33  ;;  %v1291_v3 = vmax.f32 %v1259_v2, 0.0  ;;  %v1649_v57 = vmax.f32 %v1356_v49, %v3507_v61  ;;  %v1650_v49 = vmax.f32 %v1357_v24, %v3508_v51 }
 0x15e   : > { %4300 = vset.pattern.permute.xlu1 %v5927_v55  ;;  %v1720_v26 = vpack.c.bf16 %v1647_v35, %v1647_v35  ;;  %v1288_v12 = vmax.f32 %v1256_v59, 0.0  ;;  %v874_v9 = vadd.f32 %v842_v45, %v681_v31 }
 0x15f   : > { %978 = vperm.xlu2 %4299, %v4993_v29   ;;  %970 = vperm.xlu1 %4300, %v4730_v17   ;;  %v5084_v53 = vmax.f32 %v1291_v3, %v1293_v25  ;;  %v1721_v23 = vpack.c.bf16 %v1648_v1, %v1648_v1  ;;  %v1722_v40 = vpack.c.bf16 %v1649_v57, %v1649_v57 }
 0x160   : > { %v1723_v8 = vpack.c.bf16 %v1650_v49, %v1650_v49 }
 0x161   : > { %v939_v5 = vpop.permute.xlu1 %938  ;;  %v1361_v39 = vrot.slane %v5084_v53, 2  ;;  %v1852_v63 = vunpack.c.l.b16 %v1721_v23  ;;  %v1362_v33 = vrot.slane %v5084_v53, 4  ;;  %v1853_v24 = vunpack.c.l.b16 %v1722_v40 }
 0x162   : > { %v1033_v42 = vmul.f32 %v4795_v38, %v939_v5  ;;  %v1363_v25 = vrot.slane %v5084_v53, 6  ;;  %v3513_v51 = vrot.slane %v5084_v53, 9  ;;  %v1854_v6 = vunpack.c.l.b16 %v1723_v8 }
 0x163   : > { %v5095_v30 = vpop.permute.xlu2 %564  ;;  %v3514_v2 = vrot.slane %v1361_v39, 9  ;;  %v1934_v56 = vrot.slane %v1852_v63, 7  ;;  %v3515_v44 = vrot.slane %v1362_v33, 9  ;;  %v1936_v5 = vrot.slane %v1853_v24, 6  ;;  %1203 = vperm.xlu0 %4318, %v4805_v46  }
 0x164   : > { %v1065_v11 = vadd.f32 %v1033_v42, %v872_v27  ;;  %v1655_v49 = vmax.f32 %v5084_v53, %v3513_v51  ;;  %v1938_v43 = vrot.slane %v1854_v6, 5 }
 0x165   : > { %v1656_v57 = vmax.f32 %v1361_v39, %v3514_v2  ;;  %v1657_v34 = vmax.f32 %v1362_v33, %v3515_v44 }
 0x166   : > { %v1258_v61 = vadd.f32 %v1226_v28, %v1065_v11  ;;  %v3516_v28 = vrot.slane %v1363_v25, 9 }
 0x167   : > { %4302 = vset.pattern.permute.xlu2 %v5926_v15  ;;  %4301 = vset.pattern.permute.xlu1 %v5926_v15  ;;  %v1729_v40 = vpack.c.bf16 %v1656_v57, %v1656_v57  ;;  %v1730_v33 = vpack.c.bf16 %v1657_v34, %v1657_v34  ;;  %v5143_v34 = vld [vmem:[%s4676_s18 + $0xd0] sm:$0xff] }
 0x168   : > { %1163 = vperm.xlu2 %4302, %v4730_v17   ;;  %1155 = vperm.xlu1 %4301, %v4970_v54   ;;  %v1290_v1 = vmax.f32 %v1258_v61, 0.0  ;;  %v1035_v17 = vmul.f32 %v4795_v38, %v5029_v13  ;;  %v1851_v54 = vunpack.c.l.b16 %v1720_v26  ;;  %v1658_v63 = vmax.f32 %v1363_v25, %v3516_v28 }
 0x169   : > { %v955_v3 = vpop.permute.xlu1 %954  ;;  %v1860_v8 = vunpack.c.l.b16 %v1729_v40  ;;  %v5928_v28 = vmov 0  }
 0x16a   : > { %v1037_v48 = vmul.f32 %v4795_v38, %v955_v3  ;;  %v1316_v58 = vmax.f32 %v1288_v12, %v1290_v1  ;;  %v1935_v13 = vsel %vm1900_vm0, %v1934_v56, %v1851_v54  ;;  %v1067_v35 = vadd.f32 %v1035_v17, %v874_v9  ;;  %v5133_v17 = vld [vmem:[%s4676_s18 + $0xe0] sm:$0xff] }
 0x16b   : > { %v1937_v45 = vsel %vm1903_vm1, %v1936_v5, %v1935_v13  ;;  %v1948_v5 = vrot.slane %v1860_v8, 7 }
 0x16c   : > { %v5121_v10 = vpop.permute.xlu2 %765  ;;  %v3509_v7 = vrot.slane %v1316_v58, 9  ;;  %v1358_v19 = vrot.slane %v1316_v58, 2  ;;  %v1359_v23 = vrot.slane %v1316_v58, 4  ;;  %v1069_v52 = vadd.f32 %v1037_v48, %v876_v41 }
 0x16d   : > { %v1360_v27 = vrot.slane %v1316_v58, 6  ;;  %v1728_v41 = vpack.c.bf16 %v1655_v49, %v1655_v49  ;;  %v1939_v3 = vsel %vm1906_vm2, %v1938_v43, %v1937_v45  ;;  %v1861_v48 = vunpack.c.l.b16 %v1730_v33 }
 0x16e   : > { %v3510_v42 = vrot.slane %v1358_v19, 9  ;;  %v3511_v16 = vrot.slane %v1359_v23, 9  ;;  %v1651_v62 = vmax.f32 %v1316_v58, %v3509_v7  ;;  %v1262_v26 = vadd.f32 %v1230_v37, %v1069_v52 }
 0x16f   : > { %v3512_v39 = vrot.slane %v1360_v27, 9  ;;  %v1731_v52 = vpack.c.bf16 %v1658_v63, %v1658_v63 }
 0x170   : > { %1179 = vperm.xlu2 %4302, %v4921_v20   ;;  %1171 = vperm.xlu1 %4301, %v4993_v29   ;;  %v1652_v59 = vmax.f32 %v1358_v19, %v3510_v42  ;;  %v1653_v11 = vmax.f32 %v1359_v23, %v3511_v16  ;;  %v1724_v31 = vpack.c.bf16 %v1651_v62, %v1651_v62  ;;  %v1294_v46 = vmax.f32 %v1262_v26, 0.0 }
 0x171   : > { %v1654_v24 = vmax.f32 %v1360_v27, %v3512_v39  ;;  %v1859_v19 = vunpack.c.l.b16 %v1728_v41  ;;  %v845_v39 = vmul.f32 %v4788_v36, %v5121_v10 }
 0x172   : > { %v1140_v61 = vpop.permute.xlu1 %1139  ;;  %v1725_v20 = vpack.c.bf16 %v1652_v59, %v1652_v59  ;;  %v1726_v2 = vpack.c.bf16 %v1653_v11, %v1653_v11  ;;  %v1855_v29 = vunpack.c.l.b16 %v1724_v31 }
 0x173   : > { %v1228_v53 = vmul.f32 %v4837_v4, %v1140_v61  ;;  %v1727_v1 = vpack.c.bf16 %v1654_v24, %v1654_v24  ;;  %v1949_v11 = vsel %vm1900_vm0, %v1948_v5, %v1859_v19  ;;  %v5156_v61 = vld [vmem:[%s5884_s2] ss:$0 sm:$0xff] }
 0x174   : > { %v782_v12 = vpop.permute.xlu2 %781  ;;  %v1856_v56 = vunpack.c.l.b16 %v1725_v20  ;;  %v1857_v44 = vunpack.c.l.b16 %v1726_v2  ;;  %v1940_v37 = vrot.slane %v1855_v29, 4 }
 0x175   : > { %v1260_v9 = vadd.f32 %v1228_v53, %v1067_v35  ;;  %v849_v25 = vmul.f32 %v4788_v36, %v782_v12  ;;  %v1858_v54 = vunpack.c.l.b16 %v1727_v1  ;;  %v1950_v35 = vrot.slane %v1861_v48, 6 }
 0x176   : > { %v1942_v57 = vrot.slane %v1856_v56, 3  ;;  %v1944_v6 = vrot.slane %v1857_v44, 2  ;;  %v1941_v7 = vsel %vm1909_vm3, %v1940_v37, %v1939_v3  ;;  %v1862_v53 = vunpack.c.l.b16 %v1731_v52 }
 0x177   : > { %v1292_v58 = vmax.f32 %v1260_v9, 0.0  ;;  %v5136_v51 = vadd.f32 %v849_v25, %v5110_v21  ;;  %v1946_v13 = vrot.slane %v1858_v54, 1  ;;  %v1951_v12 = vsel %vm1903_vm1, %v1950_v35, %v1949_v11 }
 0x178   : > { %4304 = vset.pattern.permute.xlu2 %v5928_v28  ;;  %4303 = vset.pattern.permute.xlu1 %v5928_v28  ;;  %v1943_v21 = vsel %vm1912_vm4, %v1942_v57, %v1941_v7  ;;  %v5929_v1 = vmov 1   ;;  %v848_v44 = vmul.f32 %v4788_v36, %v4873_v14  ;;  %v1952_v54 = vrot.slane %v1862_v53, 5 }
 0x179   : > { %v1318_v23 = vmax.f32 %v1292_v58, %v1294_v46  ;;  %614 = vperm.xlu2 %4304, %v5133_v17   ;;  %604 = vperm.xlu1 %4303, %v5143_v34   ;;  %v1945_v27 = vsel %vm1915_vm5, %v1944_v6, %v1943_v21  ;;  %v4326_v46 = vld [vmem:[%s4676_s18 + $0xc0] sm:$0xff]  ;;  %v851_v7 = vmul.f32 %v4788_v36, %v4862_v47 }
 0x17a   : > { %v1947_v59 = vsel %vm1918_vm6, %v1946_v13, %v1945_v27 }
 0x17b   : > { %v3517_v42 = vrot.slane %v1318_v23, 9  ;;  %v555_v16 = vpop.permute.xlu1 %554  ;;  %v1364_v62 = vrot.slane %v1318_v23, 2  ;;  %v1365_v49 = vrot.slane %v1318_v23, 4  ;;  %v1366_v40 = vrot.slane %v1318_v23, 6 }
 0x17c   : > { %v649_v43 = vmul.f32 %v4777_v32, %v555_v16 }
 0x17d   : > { %v1659_v31 = vmax.f32 %v1318_v23, %v3517_v42  ;;  %v570_v45 = vpop.permute.xlu2 %569  ;;  %v3518_v63 = vrot.slane %v1364_v62, 9  ;;  %v3519_v33 = vrot.slane %v1365_v49, 9  ;;  %v3520_v26 = vrot.slane %v1366_v40, 9 }
 0x17e   : > { %v684_v24 = vadd.f32 %v5156_v61, %v649_v43  ;;  %v652_v10 = vmul.f32 %v4777_v32, %v570_v45  ;;  %v1953_v23 = vsel %vm1906_vm2, %v1952_v54, %v1951_v12  ;;  %v4327_v12 = vld [vmem:[%s4676_s18 + $0xe8] sm:$0xff] }
 0x17f   : > { %v1660_v20 = vmax.f32 %v1364_v62, %v3518_v63  ;;  %v1661_v2 = vmax.f32 %v1365_v49, %v3519_v33  ;;  %v1662_v29 = vmax.f32 %v1366_v40, %v3520_v26  ;;  %v1732_v41 = vpack.c.bf16 %v1659_v31, %v1659_v31  ;;  %v5194_v33 = vld [vmem:[%s4676_s18 + $0xc8] sm:$0xff] }
 0x180   : > { %v5160_v8 = vadd.f32 %v845_v39, %v684_v24  ;;  %v687_v48 = vadd.f32 %v5156_v61, %v652_v10  ;;  %v651_v49 = vmul.f32 %v4777_v32, %v5095_v30  ;;  %v1235_v26 = vmul.f32 %v4837_v4, %v4814_v50 }
 0x181   : > { %4305 = vset.pattern.permute.xlu2 %v5929_v1  ;;  %624 = vperm.xlu1 %4303, %v5058_v22   ;;  %v1733_v3 = vpack.c.bf16 %v1660_v20, %v1660_v20  ;;  %v1734_v9 = vpack.c.bf16 %v1661_v2, %v1661_v2  ;;  %v1735_v25 = vpack.c.bf16 %v1662_v29, %v1662_v29  ;;  %v1863_v56 = vunpack.c.l.b16 %v1732_v41  ;;  %v5210_v20 = vld [vmem:[%s4676_s18 + $0xf8] sm:$0xff] }
 0x182   : > { %797 = vperm.xlu2 %4305, %v4326_v46   ;;  %v5177_v35 = vadd.f32 %v848_v44, %v687_v48  ;;  %v686_v11 = vadd.f32 %v5156_v61, %v651_v49 }
 0x183   : > { %v585_v37 = vpop.permute.xlu1 %584  ;;  %v1864_v58 = vunpack.c.l.b16 %v1733_v3  ;;  %v1865_v57 = vunpack.c.l.b16 %v1734_v9  ;;  %v1866_v6 = vunpack.c.l.b16 %v1735_v25  ;;  %v1954_v5 = vrot.slane %v1863_v56, 4  ;;  %v959_v56 = vpop.permute.xlu0 %958 }
 0x184   : > { %v655_v19 = vmul.f32 %v4777_v32, %v585_v37 }
 0x185   : > { %v5173_v21 = vpop.permute.xlu2 %589  ;;  %v1955_v14 = vsel %vm1909_vm3, %v1954_v5, %v1953_v23  ;;  %v1956_v52 = vrot.slane %v1864_v58, 3  ;;  %v1958_v27 = vrot.slane %v1865_v57, 2  ;;  %v1960_v16 = vrot.slane %v1866_v6, 1 }
 0x186   : > { %v690_v13 = vadd.f32 %v5156_v61, %v655_v19 }
 0x187   : > { %v1957_v42 = vsel %vm1912_vm4, %v1956_v52, %v1955_v14 }
 0x188   : > { %v1959_v47 = vsel %vm1915_vm5, %v1958_v27, %v1957_v42  ;;  %v5181_v62 = vadd.f32 %v851_v7, %v690_v13 }
 0x189   : > { %4307 = vset.pattern.permute.xlu1 %v5929_v1  ;;  %v1961_v40 = vsel %vm1918_vm6, %v1960_v16, %v1959_v47 }
 0x18a   : > { %821 = vperm.xlu2 %4305, %v5058_v22   ;;  %813 = vperm.xlu1 %4307, %v5133_v17   ;;  %v2019_v39 = vpack.c.b16 %v1961_v40, %v1947_v59 }
 0x18c   : > { %v774_v43 = vpop.permute.xlu1 %773  ;;  %3570 = vmatmul.msk.bf16.gmra.mxu0 %vm2046_vm7, %v2019_v39 }
 0x18d   : > { %v847_v31 = vmul.f32 %v4788_v36, %v774_v43 }
 0x18e   : > { %v975_v45 = vpop.permute.xlu2 %974 }
 0x18f   : > { %v879_v63 = vadd.f32 %v847_v31, %v686_v11  ;;  %v1042_v30 = vmul.f32 %v4795_v38, %v975_v45  ;;  %v656_v31 = vmul.f32 %v4777_v32, %v5173_v21 }
 0x191   : > { %v1074_v24 = vadd.f32 %v1042_v30, %v5136_v51 }
 0x192   : > { %4309 = vset.pattern.permute.xlu2 %v5928_v28  ;;  %4308 = vset.pattern.permute.xlu1 %v5928_v28 }
 0x193   : > { %v5201_v59 = vadd.f32 %v1235_v26, %v1074_v24  ;;  %609 = vperm.xlu2 %4309, %v5074_v0   ;;  %599 = vperm.xlu1 %4308, %v5194_v33  }
 0x195   : > { %v5205_v10 = vpop.permute.xlu1 %559  ;;  %v1299_v16 = vmax.f32 %v5201_v59, 0.0 }
 0x196   : > { %v650_v43 = vmul.f32 %v4777_v32, %v5205_v10 }
 0x197   : > { %v5207_v53 = vpop.permute.xlu2 %769 }
 0x19b   : > { %4311 = vset.pattern.permute.xlu2 %v5927_v55  ;;  %629 = vperm.xlu1 %4308, %v5210_v20  }
 0x19c   : > { %990 = vperm.xlu2 %4311, %v4326_v46  }
 0x19d   : > { %v5214_v50 = vpop.permute.xlu1 %579 }
 0x19e   : > { %v654_v21 = vmul.f32 %v4777_v32, %v5214_v50 }
 0x19f   : > { %v5216_v51 = vpop.permute.xlu2 %793 }
 0x1a3   : > { %4312 = vset.pattern.permute.xlu1 %v5927_v55 }
 0x1a4   : > { %1006 = vperm.xlu2 %4311, %v5133_v17   ;;  %998 = vperm.xlu1 %4312, %v5143_v34  }
 0x1a6   : > { %v967_v28 = vpop.permute.xlu1 %966 }
 0x1a7   : > { %v1040_v9 = vmul.f32 %v4795_v38, %v967_v28  ;;  %v685_v28 = vadd.f32 %v5156_v61, %v650_v43 }
 0x1a8   : > { %v1160_v2 = vpop.permute.xlu2 %1159 }
 0x1a9   : > { %v1072_v44 = vadd.f32 %v1040_v9, %v879_v63  ;;  %v1233_v48 = vmul.f32 %v4837_v4, %v1160_v2  ;;  %v691_v2 = vadd.f32 %v5156_v61, %v656_v31 }
 0x1ab   : > { %v1265_v37 = vadd.f32 %v1233_v48, %v1072_v44 }
 0x1ac   : > { %4314 = vset.pattern.permute.xlu2 %v5929_v1  ;;  %4313 = vset.pattern.permute.xlu1 %v5929_v1  ;;  %v1038_v1 = vmul.f32 %v4795_v38, %v959_v56  ;;  %v852_v56 = vmul.f32 %v4788_v36, %v5216_v51 }
 0x1ad   : > { %809 = vperm.xlu2 %4314, %v5074_v0   ;;  %801 = vperm.xlu1 %4313, %v5194_v33   ;;  %v1297_v5 = vmax.f32 %v1265_v37, 0.0 }
 0x1ae   : > { %v983_v29 = vpop.permute.xlu1 %982  ;;  %v1070_v54 = vadd.f32 %v1038_v1, %v5160_v8 }
 0x1af   : > { %v1044_v19 = vmul.f32 %v4795_v38, %v983_v29  ;;  %v987_v29 = vpop.permute.xlu0 %986 }
 0x1b0   : > { %v1045_v51 = vmul.f32 %v4795_v38, %v987_v29 }
 0x1b1   : > { %v5225_v41 = vpop.permute.xlu2 %962  ;;  %v1076_v8 = vadd.f32 %v1044_v19, %v5181_v62  ;;  %v657_v62 = vmul.f32 %v4777_v32, %v4982_v18  ;;  %v846_v18 = vmul.f32 %v4788_v36, %v5207_v53  ;;  %v884_v19 = vadd.f32 %v852_v56, %v691_v2 }
 0x1b2   : > { %v1039_v1 = vmul.f32 %v4795_v38, %v5225_v41 }
 0x1b3   : > { %v692_v59 = vadd.f32 %v5156_v61, %v657_v62 }
 0x1b5   : > { %825 = vperm.xlu2 %4314, %v5210_v20   ;;  %817 = vperm.xlu1 %4313, %v4327_v12  }
 0x1b7   : > { %v5229_v3 = vpop.permute.xlu1 %785 }
 0x1b9   : > { %v5232_v25 = vpop.permute.xlu2 %978 }
 0x1bd   : > { %4316 = vset.pattern.permute.xlu2 %v5926_v15  ;;  %4315 = vset.pattern.permute.xlu1 %v5926_v15 }
 0x1be   : > { %1199 = vperm.xlu2 %4316, %v5133_v17   ;;  %1191 = vperm.xlu1 %4315, %v5143_v34  }
 0x1c0   : > { %v1152_v46 = vpop.permute.xlu1 %1151 }
 0x1c1   : > { %v1231_v58 = vmul.f32 %v4837_v4, %v1152_v46 }
 0x1c2   : > { %v1164_v57 = vpop.permute.xlu2 %1163 }
 0x1c3   : > { %v1263_v6 = vadd.f32 %v1231_v58, %v1070_v54  ;;  %v1234_v46 = vmul.f32 %v4837_v4, %v1164_v57  ;;  %v878_v54 = vadd.f32 %v846_v18, %v685_v28  ;;  %v689_v58 = vadd.f32 %v5156_v61, %v654_v21 }
 0x1c5   : > { %v1295_v7 = vmax.f32 %v1263_v6, 0.0 }
 0x1c6   : > { %4317 = vset.pattern.permute.xlu2 %v5927_v55  ;;  %1207 = vperm.xlu1 %4315, %v5058_v22  }
 0x1c7   : > { %v1319_v23 = vmax.f32 %v1295_v7, %v1297_v5  ;;  %994 = vperm.xlu2 %4317, %v5194_v33   ;;  %v1071_v7 = vadd.f32 %v1039_v1, %v878_v54 }
 0x1c8   : > { %v1176_v17 = vpop.permute.xlu1 %1175 }
 0x1c9   : > { %v1367_v34 = vrot.slane %v1319_v23, 2  ;;  %v1237_v14 = vmul.f32 %v4837_v4, %v1176_v17  ;;  %v1368_v52 = vrot.slane %v1319_v23, 4  ;;  %v1369_v49 = vrot.slane %v1319_v23, 6 }
 0x1ca   : > { %v5248_v27 = vpop.permute.xlu2 %1179  ;;  %v3521_v45 = vrot.slane %v1319_v23, 9 }
 0x1cb   : > { %v3522_v13 = vrot.slane %v1367_v34, 9  ;;  %v1269_v42 = vadd.f32 %v1237_v14, %v1076_v8  ;;  %v3523_v22 = vrot.slane %v1368_v52, 9  ;;  %v3524_v30 = vrot.slane %v1369_v49, 9 }
 0x1cd   : > { %v1301_v47 = vmax.f32 %v1269_v42, 0.0  ;;  %v1664_v40 = vmax.f32 %v1367_v34, %v3522_v13  ;;  %v1666_v53 = vmax.f32 %v1369_v49, %v3524_v30 }
 0x1ce   : > { %4319 = vset.pattern.permute.xlu1 %v5927_v55  ;;  %v1665_v55 = vmax.f32 %v1368_v52, %v3523_v22 }
 0x1cf   : > { %1018 = vperm.xlu2 %4317, %v5210_v20   ;;  %1010 = vperm.xlu1 %4319, %v4327_v12   ;;  %v5253_v39 = vmax.f32 %v1299_v16, %v1301_v47  ;;  %v1737_v26 = vpack.c.bf16 %v1664_v40, %v1664_v40  ;;  %v1663_v12 = vmax.f32 %v1319_v23, %v3521_v45 }
 0x1d0   : > { %v1738_v44 = vpack.c.bf16 %v1665_v55, %v1665_v55  ;;  %v1739_v8 = vpack.c.bf16 %v1666_v53, %v1666_v53  ;;  %v1043_v16 = vmul.f32 %v4795_v38, %v5232_v25  ;;  %v1238_v40 = vmul.f32 %v4837_v4, %v5248_v27 }
 0x1d1   : > { %v971_v11 = vpop.permute.xlu1 %970  ;;  %v1373_v10 = vrot.slane %v5253_v39, 2  ;;  %v1374_v9 = vrot.slane %v5253_v39, 4  ;;  %v1868_v48 = vunpack.c.l.b16 %v1737_v26  ;;  %v1375_v41 = vrot.slane %v5253_v39, 6 }
 0x1d2   : > { %v1041_v24 = vmul.f32 %v4795_v38, %v971_v11  ;;  %v1736_v6 = vpack.c.bf16 %v1663_v12, %v1663_v12  ;;  %v1077_v55 = vadd.f32 %v1045_v51, %v884_v19  ;;  %v1870_v25 = vunpack.c.l.b16 %v1739_v8 }
 0x1d3   : > { %v5261_v63 = vpop.permute.xlu2 %614  ;;  %v3530_v37 = vrot.slane %v1373_v10, 9  ;;  %v3531_v5 = vrot.slane %v1374_v9, 9  ;;  %v1962_v23 = vrot.slane %v1868_v48, 7  ;;  %v3532_v14 = vrot.slane %v1375_v41, 9 }
 0x1d4   : > { %v1073_v50 = vadd.f32 %v1041_v24, %v5177_v35  ;;  %v1869_v35 = vunpack.c.l.b16 %v1738_v44  ;;  %v1867_v47 = vunpack.c.l.b16 %v1736_v6  ;;  %v5302_v24 = vmul.f32 %v4788_v36, %v4883_v60 }
 0x1d5   : > { %v1672_v52 = vmax.f32 %v1373_v10, %v3530_v37  ;;  %v1673_v22 = vmax.f32 %v1374_v9, %v3531_v5  ;;  %v1674_v30 = vmax.f32 %v1375_v41, %v3532_v14  ;;  %v1270_v2 = vadd.f32 %v1238_v40, %v1077_v55 }
 0x1d6   : > { %v1266_v17 = vadd.f32 %v1234_v46, %v1073_v50  ;;  %v1964_v62 = vrot.slane %v1869_v35, 6  ;;  %v1963_v45 = vsel %vm1900_vm0, %v1962_v23, %v1867_v47  ;;  %v1966_v53 = vrot.slane %v1870_v25, 5 }
 0x1d7   : > { %4321 = vset.pattern.permute.xlu2 %v5926_v15  ;;  %4320 = vset.pattern.permute.xlu1 %v5926_v15  ;;  %v850_v15 = vmul.f32 %v4788_v36, %v5229_v3  ;;  %v1745_v26 = vpack.c.bf16 %v1672_v52, %v1672_v52  ;;  %v1746_v28 = vpack.c.bf16 %v1673_v22, %v1673_v22  ;;  %v1302_v51 = vmax.f32 %v1270_v2, 0.0 }
 0x1d8   : > { %1195 = vperm.xlu2 %4321, %v5074_v0   ;;  %1187 = vperm.xlu1 %4320, %v5194_v33   ;;  %v3529_v0 = vrot.slane %v5253_v39, 9  ;;  %v1298_v43 = vmax.f32 %v1266_v17, 0.0  ;;  %v1747_v44 = vpack.c.bf16 %v1674_v30, %v1674_v30 }
 0x1d9   : > { %v882_v3 = vadd.f32 %v850_v15, %v689_v58  ;;  %v1876_v56 = vunpack.c.l.b16 %v1745_v26  ;;  %v1877_v60 = vunpack.c.l.b16 %v1746_v28 }
 0x1da   : > { %v1156_v57 = vpop.permute.xlu1 %1155  ;;  %v1671_v49 = vmax.f32 %v5253_v39, %v3529_v0  ;;  %v1878_v0 = vunpack.c.l.b16 %v1747_v44 }
 0x1db   : > { %v1232_v33 = vmul.f32 %v4837_v4, %v1156_v57  ;;  %v1075_v39 = vadd.f32 %v1043_v16, %v882_v3  ;;  %v1976_v57 = vrot.slane %v1876_v56, 7 }
 0x1dc   : > { %v798_v34 = vpop.permute.xlu2 %797  ;;  %v1744_v10 = vpack.c.bf16 %v1671_v49, %v1671_v49  ;;  %v1980_v2 = vrot.slane %v1878_v0, 5 }
 0x1dd   : > { %v1264_v13 = vadd.f32 %v1232_v33, %v1071_v7  ;;  %v853_v42 = vmul.f32 %v4788_v36, %v798_v34  ;;  %v1978_v34 = vrot.slane %v1877_v60, 6 }
 0x1de   : > { %v1875_v54 = vunpack.c.l.b16 %v1744_v10 }
 0x1df   : > { %v1296_v11 = vmax.f32 %v1264_v13, 0.0  ;;  %v5296_v31 = vadd.f32 %v853_v42, %v692_v59 }
 0x1e0   : > { %1211 = vperm.xlu1 %4320, %v5210_v20   ;;  %v1965_v20 = vsel %vm1903_vm1, %v1964_v62, %v1963_v45  ;;  %v1977_v30 = vsel %vm1900_vm0, %v1976_v57, %v1875_v54 }
 0x1e1   : > { %v1320_v27 = vmax.f32 %v1296_v11, %v1298_v43  ;;  %v1967_v5 = vsel %vm1906_vm2, %v1966_v53, %v1965_v20  ;;  %v1979_v56 = vsel %vm1903_vm1, %v1978_v34, %v1977_v30 }
 0x1e2   : > { %v1172_v18 = vpop.permute.xlu1 %1171 }
 0x1e3   : > { %v1236_v59 = vmul.f32 %v4837_v4, %v1172_v18  ;;  %v3525_v21 = vrot.slane %v1320_v27, 9  ;;  %v1370_v29 = vrot.slane %v1320_v27, 2  ;;  %v1371_v12 = vrot.slane %v1320_v27, 4 }
 0x1e4   : > { %v1372_v9 = vrot.slane %v1320_v27, 6  ;;  %v822_v33 = vpop.permute.xlu2 %821 }
 0x1e5   : > { %v1268_v1 = vadd.f32 %v1236_v59, %v1075_v39  ;;  %v1667_v48 = vmax.f32 %v1320_v27, %v3525_v21  ;;  %v3526_v46 = vrot.slane %v1370_v29, 9  ;;  %v3527_v50 = vrot.slane %v1371_v12, 9 }
 0x1e6   : > { %v3528_v37 = vrot.slane %v1372_v9, 9 }
 0x1e7   : > { %v1300_v41 = vmax.f32 %v1268_v1, 0.0  ;;  %v1668_v58 = vmax.f32 %v1370_v29, %v3526_v46  ;;  %v1669_v15 = vmax.f32 %v1371_v12, %v3527_v50  ;;  %v1740_v6 = vpack.c.bf16 %v1667_v48, %v1667_v48 }
 0x1e8   : > { %v1670_v35 = vmax.f32 %v1372_v9, %v3528_v37  ;;  %v859_v50 = vmul.f32 %v4788_v36, %v822_v33  ;;  %v661_v33 = vmul.f32 %v4777_v32, %v5261_v63 }
 0x1e9   : > { %v1322_v7 = vmax.f32 %v1300_v41, %v1302_v51  ;;  %v1741_v19 = vpack.c.bf16 %v1668_v58, %v1668_v58  ;;  %v1742_v23 = vpack.c.bf16 %v1669_v15, %v1669_v15  ;;  %v1871_v17 = vunpack.c.l.b16 %v1740_v6 }
 0x1ea   : > { %v1743_v16 = vpack.c.bf16 %v1670_v35, %v1670_v35  ;;  %v1981_v58 = vsel %vm1906_vm2, %v1980_v2, %v1979_v56  ;;  %v696_v34 = vadd.f32 %v5156_v61, %v661_v33 }
 0x1eb   : > { %v3533_v8 = vrot.slane %v1322_v7, 9  ;;  %v605_v14 = vpop.permute.xlu1 %604  ;;  %v1376_v52 = vrot.slane %v1322_v7, 2  ;;  %v1377_v13 = vrot.slane %v1322_v7, 4  ;;  %v1378_v42 = vrot.slane %v1322_v7, 6 }
 0x1ec   : > { %v659_v3 = vmul.f32 %v4777_v32, %v605_v14  ;;  %v1872_v47 = vunpack.c.l.b16 %v1741_v19  ;;  %v1873_v22 = vunpack.c.l.b16 %v1742_v23  ;;  %v1874_v45 = vunpack.c.l.b16 %v1743_v16 }
 0x1ed   : > { %v1675_v49 = vmax.f32 %v1322_v7, %v3533_v8  ;;  %v3534_v40 = vrot.slane %v1376_v52, 9  ;;  %v3535_v62 = vrot.slane %v1377_v13, 9  ;;  %v3536_v43 = vrot.slane %v1378_v42, 9  ;;  %v610_v54 = vpop.permute.xlu2 %609 }
 0x1ee   : > { %v694_v11 = vadd.f32 %v5156_v61, %v659_v3  ;;  %v1968_v55 = vrot.slane %v1871_v17, 4  ;;  %v1970_v18 = vrot.slane %v1872_v47, 3  ;;  %v1972_v10 = vrot.slane %v1873_v22, 2  ;;  %v1015_v47 = vpop.permute.xlu0 %1014 }
 0x1ef   : > { %v1676_v26 = vmax.f32 %v1376_v52, %v3534_v40  ;;  %v1677_v25 = vmax.f32 %v1377_v13, %v3535_v62  ;;  %v1678_v39 = vmax.f32 %v1378_v42, %v3536_v43  ;;  %v1748_v28 = vpack.c.bf16 %v1675_v49, %v1675_v49 }
 0x1f0   : > { %v1969_v27 = vsel %vm1909_vm3, %v1968_v55, %v1967_v5  ;;  %v1974_v9 = vrot.slane %v1874_v45, 1  ;;  %v887_v1 = vadd.f32 %v5302_v24, %v694_v11 }
 0x1f1   : > { %v1749_v59 = vpack.c.bf16 %v1676_v26, %v1676_v26  ;;  %v1750_v20 = vpack.c.bf16 %v1677_v25, %v1677_v25  ;;  %v1751_v21 = vpack.c.bf16 %v1678_v39, %v1678_v39  ;;  %v1879_v29 = vunpack.c.l.b16 %v1748_v28 }
 0x1f2   : > { %v1971_v12 = vsel %vm1912_vm4, %v1970_v18, %v1969_v27 }
 0x1f3   : > { %v625_v44 = vpop.permute.xlu1 %624  ;;  %v1880_v53 = vunpack.c.l.b16 %v1749_v59  ;;  %v1881_v60 = vunpack.c.l.b16 %v1750_v20  ;;  %v1882_v48 = vunpack.c.l.b16 %v1751_v21  ;;  %v1973_v46 = vsel %vm1915_vm5, %v1972_v10, %v1971_v12 }
 0x1f4   : > { %v663_v51 = vmul.f32 %v4777_v32, %v625_v44  ;;  %v1975_v41 = vsel %vm1918_vm6, %v1974_v9, %v1973_v46  ;;  %v1982_v37 = vrot.slane %v1879_v29, 4  ;;  %v1052_v21 = vmul.f32 %v4795_v38, %v1015_v47 }
 0x1f5   : > { %v1984_v15 = vrot.slane %v1880_v53, 3  ;;  %v1986_v6 = vrot.slane %v1881_v60, 2  ;;  %v1988_v7 = vrot.slane %v1882_v48, 1 }
 0x1f6   : > { %v698_v24 = vadd.f32 %v5156_v61, %v663_v51  ;;  %v1983_v5 = vsel %vm1909_vm3, %v1982_v37, %v1981_v58  ;;  %v991_v14 = vpop.permute.xlu2 %990  ;;  %v1003_v40 = vpop.permute.xlu0 %1002 }
 0x1f7   : > { %v1985_v57 = vsel %vm1912_vm4, %v1984_v15, %v1983_v5  ;;  %v1046_v11 = vmul.f32 %v4795_v38, %v991_v14 }
 0x1f8   : > { %v891_v35 = vadd.f32 %v859_v50, %v698_v24  ;;  %v1987_v0 = vsel %vm1915_vm5, %v1986_v6, %v1985_v57  ;;  %v660_v50 = vmul.f32 %v4777_v32, %v610_v54 }
 0x1f9   : > { %v1989_v19 = vsel %vm1918_vm6, %v1988_v7, %v1987_v0  ;;  %v1078_v55 = vadd.f32 %v1046_v11, %v5296_v31 }
 0x1fa   : > { %v2020_v23 = vpack.c.b16 %v1989_v19, %v1975_v41  ;;  %v1084_v60 = vadd.f32 %v1052_v21, %v891_v35  ;;  %v695_v24 = vadd.f32 %v5156_v61, %v660_v50 }
 0x1fc   : > { %v814_v17 = vpop.permute.xlu1 %813  ;;  %3571 = vmatmul.msk.bf16.gmra.mxu0 %vm2046_vm7, %v2020_v23  ;;  %v5930_v23 = vld [vmem:[#allocation20_spill] sm:$0xff] }
 0x1fd   : > { %v857_v8 = vmul.f32 %v4788_v36, %v814_v17  ;;  %v662_v54 = vmul.f32 %v4777_v32, %v5930_v23  ;;  %v1049_v17 = vmul.f32 %v4795_v38, %v1003_v40 }
 0x1fe   : > { %v1007_v42 = vpop.permute.xlu2 %1006  ;;  %v1184_v45 = vpop.permute.xlu0 %1183 }
 0x1ff   : > { %v889_v52 = vadd.f32 %v857_v8, %v696_v34  ;;  %v1239_v30 = vmul.f32 %v4837_v4, %v1184_v45  ;;  %v1050_v2 = vmul.f32 %v4795_v38, %v1007_v42 }
 0x201   : > { %v1271_v28 = vadd.f32 %v1239_v30, %v1078_v55  ;;  %v1082_v12 = vadd.f32 %v1050_v2, %v889_v52  ;;  %v697_v55 = vadd.f32 %v5156_v61, %v662_v54 }
 0x203   : > { %v1303_v59 = vmax.f32 %v1271_v28, 0.0 }
 0x205   : > { %v600_v13 = vpop.permute.xlu1 %599 }
 0x206   : > { %v658_v5 = vmul.f32 %v4777_v32, %v600_v13 }
 0x207   : > { %v810_v16 = vpop.permute.xlu2 %809 }
 0x208   : > { %v856_v57 = vmul.f32 %v4788_v36, %v810_v16  ;;  %v693_v14 = vadd.f32 %v5156_v61, %v658_v5 }
 0x20a   : > { %v888_v52 = vadd.f32 %v856_v57, %v695_v24 }
 0x20c   : > { %v1081_v28 = vadd.f32 %v1049_v17, %v888_v52 }
 0x20d   : > { %v630_v3 = vpop.permute.xlu1 %629 }
 0x20e   : > { %v664_v13 = vmul.f32 %v4777_v32, %v630_v3 }
 0x20f   : > { %v5329_v49 = vpop.permute.xlu2 %825 }
 0x210   : > { %v860_v32 = vmul.f32 %v4788_v36, %v5329_v49 }
 0x216   : > { %v999_v22 = vpop.permute.xlu1 %998 }
 0x217   : > { %v1048_v26 = vmul.f32 %v4795_v38, %v999_v22 }
 0x218   : > { %v1200_v62 = vpop.permute.xlu2 %1199 }
 0x219   : > { %v1080_v27 = vadd.f32 %v1048_v26, %v887_v1  ;;  %v1243_v29 = vmul.f32 %v4837_v4, %v1200_v62 }
 0x21b   : > { %v1275_v44 = vadd.f32 %v1243_v29, %v1082_v12 }
 0x21d   : > { %v1307_v41 = vmax.f32 %v1275_v44, 0.0 }
 0x21f   : > { %v802_v63 = vpop.permute.xlu1 %801 }
 0x220   : > { %v854_v33 = vmul.f32 %v4788_v36, %v802_v63 }
 0x221   : > { %v995_v25 = vpop.permute.xlu2 %994 }
 0x222   : > { %v886_v62 = vadd.f32 %v854_v33, %v693_v14  ;;  %v1047_v63 = vmul.f32 %v4795_v38, %v995_v25 }
 0x227   : > { %v818_v43 = vpop.permute.xlu1 %817 }
 0x228   : > { %v858_v40 = vmul.f32 %v4788_v36, %v818_v43 }
 0x229   : > { %v1019_v53 = vpop.permute.xlu2 %1018 }
 0x22a   : > { %v1053_v36 = vmul.f32 %v4795_v38, %v1019_v53 }
 0x230   : > { %v1192_v39 = vpop.permute.xlu1 %1191 }
 0x231   : > { %v1241_v18 = vmul.f32 %v4837_v4, %v1192_v39  ;;  %v699_v39 = vadd.f32 %v5156_v61, %v664_v13 }
 0x232   : > { %v1196_v8 = vpop.permute.xlu2 %1195 }
 0x233   : > { %v1273_v10 = vadd.f32 %v1241_v18, %v1080_v27  ;;  %v1242_v45 = vmul.f32 %v4837_v4, %v1196_v8  ;;  %v892_v50 = vadd.f32 %v860_v32, %v699_v39 }
 0x235   : > { %v1305_v20 = vmax.f32 %v1273_v10, 0.0  ;;  %v1204_v10 = vpop.permute.xlu0 %1203  ;;  %v1274_v29 = vadd.f32 %v1242_v45, %v1081_v28  ;;  %v1085_v5 = vadd.f32 %v1053_v36, %v892_v50 }
 0x237   : > { %v1323_v31 = vmax.f32 %v1303_v59, %v1305_v20  ;;  %v1079_v20 = vadd.f32 %v1047_v63, %v886_v62 }
 0x238   : > { %v1208_v9 = vpop.permute.xlu1 %1207 }
 0x239   : > { %v1379_v56 = vrot.slane %v1323_v31, 2  ;;  %v1245_v1 = vmul.f32 %v4837_v4, %v1208_v9  ;;  %v1380_v48 = vrot.slane %v1323_v31, 4  ;;  %v1381_v37 = vrot.slane %v1323_v31, 6 }
 0x23a   : > { %v3537_v19 = vrot.slane %v1323_v31, 9 }
 0x23b   : > { %v1277_v46 = vadd.f32 %v1245_v1, %v1084_v60  ;;  %v3538_v51 = vrot.slane %v1379_v56, 9  ;;  %v3539_v15 = vrot.slane %v1380_v48, 9  ;;  %v3540_v0 = vrot.slane %v1381_v37, 9 }
 0x23c   : > { %v1679_v11 = vmax.f32 %v1323_v31, %v3537_v19  ;;  %v890_v31 = vadd.f32 %v858_v40, %v697_v55 }
 0x23d   : > { %v1309_v58 = vmax.f32 %v1277_v46, 0.0  ;;  %v1680_v7 = vmax.f32 %v1379_v56, %v3538_v51  ;;  %v1681_v34 = vmax.f32 %v1380_v48, %v3539_v15  ;;  %v1682_v16 = vmax.f32 %v1381_v37, %v3540_v0 }
 0x23e   : > { %v1752_v21 = vpack.c.bf16 %v1679_v11, %v1679_v11  ;;  %v1244_v56 = vmul.f32 %v4837_v4, %v1204_v10 }
 0x23f   : > { %v1325_v6 = vmax.f32 %v1307_v41, %v1309_v58  ;;  %v1753_v42 = vpack.c.bf16 %v1680_v7, %v1680_v7  ;;  %v1754_v30 = vpack.c.bf16 %v1681_v34, %v1681_v34  ;;  %v1755_v59 = vpack.c.bf16 %v1682_v16, %v1682_v16 }
 0x240   : > { %v1883_v51 = vunpack.c.l.b16 %v1752_v21  ;;  %v1306_v41 = vmax.f32 %v1274_v29, 0.0 }
 0x241   : > { %v1011_v35 = vpop.permute.xlu1 %1010  ;;  %v1385_v47 = vrot.slane %v1325_v6, 2  ;;  %v1386_v22 = vrot.slane %v1325_v6, 4  ;;  %v1387_v26 = vrot.slane %v1325_v6, 6  ;;  %v1884_v3 = vunpack.c.l.b16 %v1753_v42 }
 0x242   : > { %v1051_v25 = vmul.f32 %v4795_v38, %v1011_v35  ;;  %v1885_v12 = vunpack.c.l.b16 %v1754_v30  ;;  %v3545_v61 = vrot.slane %v1325_v6, 9  ;;  %v1886_v46 = vunpack.c.l.b16 %v1755_v59 }
 0x243   : > { %v3546_v27 = vrot.slane %v1385_v47, 9  ;;  %v3547_v18 = vrot.slane %v1386_v22, 9  ;;  %v3548_v9 = vrot.slane %v1387_v26, 9  ;;  %v1990_v49 = vrot.slane %v1884_v3, 7 }
 0x244   : > { %v1083_v48 = vadd.f32 %v1051_v25, %v890_v31  ;;  %v1687_v58 = vmax.f32 %v1325_v6, %v3545_v61  ;;  %v1992_v24 = vrot.slane %v1885_v12, 6  ;;  %v1994_v33 = vrot.slane %v1886_v46, 5 }
 0x245   : > { %v1688_v60 = vmax.f32 %v1385_v47, %v3546_v27  ;;  %v1689_v1 = vmax.f32 %v1386_v22, %v3547_v18  ;;  %v1690_v15 = vmax.f32 %v1387_v26, %v3548_v9  ;;  %v1991_v7 = vsel %vm1900_vm0, %v1990_v49, %v1883_v51 }
 0x246   : > { %v1276_v35 = vadd.f32 %v1244_v56, %v1083_v48  ;;  %v1760_v34 = vpack.c.bf16 %v1687_v58, %v1687_v58  ;;  %v1993_v6 = vsel %vm1903_vm1, %v1992_v24, %v1991_v7 }
 0x247   : > { %v1761_v38 = vpack.c.bf16 %v1688_v60, %v1688_v60  ;;  %v1762_v53 = vpack.c.bf16 %v1689_v1, %v1689_v1  ;;  %v1763_v14 = vpack.c.bf16 %v1690_v15, %v1690_v15  ;;  %v1995_v26 = vsel %vm1906_vm2, %v1994_v33, %v1993_v6 }
 0x248   : > { %v1308_v62 = vmax.f32 %v1276_v35, 0.0 }
 0x249   : > { %v1892_v47 = vunpack.c.l.b16 %v1761_v38  ;;  %v1893_v22 = vunpack.c.l.b16 %v1762_v53  ;;  %v1894_v25 = vunpack.c.l.b16 %v1763_v14 }
 0x24a   : > { %v1188_v2 = vpop.permute.xlu1 %1187 }
 0x24b   : > { %v1240_v43 = vmul.f32 %v4837_v4, %v1188_v2  ;;  %v2004_v27 = vrot.slane %v1892_v47, 7  ;;  %v2006_v10 = vrot.slane %v1893_v22, 6  ;;  %v2008_v38 = vrot.slane %v1894_v25, 5 }
 0x24d   : > { %v1272_v44 = vadd.f32 %v1240_v43, %v1079_v20 }
 0x24f   : > { %v1304_v37 = vmax.f32 %v1272_v44, 0.0 }
 0x251   : > { %v1324_v57 = vmax.f32 %v1304_v37, %v1306_v41 }
 0x252   : > { %v1212_v0 = vpop.permute.xlu1 %1211 }
 0x253   : > { %v3541_v19 = vrot.slane %v1324_v57, 9  ;;  %v1246_v23 = vmul.f32 %v4837_v4, %v1212_v0  ;;  %v1382_v54 = vrot.slane %v1324_v57, 2  ;;  %v1383_v17 = vrot.slane %v1324_v57, 4 }
 0x254   : > { %v1384_v8 = vrot.slane %v1324_v57, 6  ;;  %v1891_v4 = vunpack.c.l.b16 %v1760_v34 }
 0x255   : > { %v1683_v52 = vmax.f32 %v1324_v57, %v3541_v19  ;;  %v1278_v13 = vadd.f32 %v1246_v23, %v1085_v5  ;;  %v3542_v42 = vrot.slane %v1382_v54, 9  ;;  %v3543_v16 = vrot.slane %v1383_v17, 9 }
 0x256   : > { %v3544_v63 = vrot.slane %v1384_v8, 9  ;;  %v2005_v1 = vsel %vm1900_vm0, %v2004_v27, %v1891_v4  ;;  %v3649_v4 = vld [vmem:[#allocation5 + $0x78] sm:$0xf0] }
 0x257   : > { %v1310_v11 = vmax.f32 %v1278_v13, 0.0  ;;  %v1684_v45 = vmax.f32 %v1382_v54, %v3542_v42  ;;  %v1685_v55 = vmax.f32 %v1383_v17, %v3543_v16  ;;  %v1756_v40 = vpack.c.bf16 %v1683_v52, %v1683_v52  ;;  %v2068_v42 = vpop.f32.mrf.mxu0 }
 0x258   : > { %v1686_v30 = vmax.f32 %v1384_v8, %v3544_v63  ;;  %v2007_v7 = vsel %vm1903_vm1, %v2006_v10, %v2005_v1  ;;  %v5380_v63 = vld [vmem:[%s5886_s4] ss:$0 sm:$0xff] }
 0x259   : > { %v1326_v39 = vmax.f32 %v1308_v62, %v1310_v11  ;;  %v1757_v32 = vpack.c.bf16 %v1684_v45, %v1684_v45  ;;  %v1758_v3 = vpack.c.bf16 %v1685_v55, %v1685_v55  ;;  %v1887_v28 = vunpack.c.l.b16 %v1756_v40  ;;  %v3647_v11 = vld [vmem:[#allocation5 + $0x70] sm:$0xf]  ;;  %v4063_v45 = vld [vmem:[#allocation5 + $0x74] sm:$0xf0]  ;;  %v4062_v55 = vld [vmem:[#allocation5 + $0x74] sm:$0xf] }
 0x25a   : > { %v1759_v18 = vpack.c.bf16 %v1686_v30, %v1686_v30  ;;  %v2009_v23 = vsel %vm1906_vm2, %v2008_v38, %v2007_v7  ;;  %v3648_v40 = vor.u32 %v4063_v45, %v3647_v11  ;;  %v3639_v30 = vld [vmem:[#allocation5 + $0x60] sm:$0xf]  ;;  %v2069_v27 = vadd.f32 %v5380_v63, %v2068_v42  ;;  %v4050_v42 = vld [vmem:[#allocation5 + $0x14] sm:$0xf] }
 0x25b   : > { %v3549_v2 = vrot.slane %v1326_v39, 9  ;;  %v1388_v59 = vrot.slane %v1326_v39, 2  ;;  %v1389_v20 = vrot.slane %v1326_v39, 4  ;;  %v1390_v21 = vrot.slane %v1326_v39, 6  ;;  %v3607_v38 = vld [vmem:[#allocation5 + $0x20] sm:$0xf] }
 0x25c   : > { %v1888_v29 = vunpack.c.l.b16 %v1757_v32  ;;  %v1889_v43 = vunpack.c.l.b16 %v1758_v3  ;;  %v1890_v31 = vunpack.c.l.b16 %v1759_v18  ;;  %v1996_v12 = vrot.slane %v1887_v28, 4  ;;  %v4060_v3 = vld [vmem:[#allocation5 + $0x64] sm:$0xf]  ;;  %v3641_v28 = vld [vmem:[#allocation5 + $0x68] sm:$0xf0]  ;;  %2372 = vmatpush.bf16.msra.mxu1 %v3648_v40 }
 0x25d   : > { %v1691_v61 = vmax.f32 %v1326_v39, %v3549_v2  ;;  %v3550_v9 = vrot.slane %v1388_v59, 9  ;;  %v3551_v36 = vrot.slane %v1389_v20, 9  ;;  %v3552_v49 = vrot.slane %v1390_v21, 9 }
 0x25e   : > { %v1997_v56 = vsel %vm1909_vm3, %v1996_v12, %v1995_v26  ;;  %v1998_v44 = vrot.slane %v1888_v29, 3  ;;  %v2000_v60 = vrot.slane %v1889_v43, 2  ;;  %v2002_v37 = vrot.slane %v1890_v31, 1  ;;  %v4061_v26 = vld [vmem:[#allocation5 + $0x64] sm:$0xf0] }
 0x25f   : > { %v1692_v48 = vmax.f32 %v1388_v59, %v3550_v9  ;;  %v1693_v46 = vmax.f32 %v1389_v20, %v3551_v36  ;;  %v1694_v50 = vmax.f32 %v1390_v21, %v3552_v49  ;;  %v1764_v51 = vpack.c.bf16 %v1691_v61, %v1691_v61  ;;  %v2070_v16 = vpop.f32.mrf.mxu0  ;;  %v3631_v21 = vld [vmem:[#allocation5 + $0x50] sm:$0xf]  ;;  %v4059_v29 = vld [vmem:[#allocation5 + $0x54] sm:$0xf0]  ;;  %v4058_v43 = vld [vmem:[#allocation5 + $0x54] sm:$0xf] }
 0x260   : > { %v1999_v41 = vsel %vm1912_vm4, %v1998_v44, %v1997_v56  ;;  %v2071_v39 = vadd.f32 %v5380_v63, %v2070_v16  ;;  %v3652_v32 = vor.u32 %v4062_v55, %v3649_v4  ;;  %v3640_v18 = vor.u32 %v4061_v26, %v3639_v30  ;;  %v3633_v12 = vld [vmem:[#allocation5 + $0x58] sm:$0xf0]  ;;  %v3623_v56 = vld [vmem:[#allocation5 + $0x40] sm:$0xf]  ;;  %v4057_v44 = vld [vmem:[#allocation5 + $0x44] sm:$0xf0] }
 0x261   : > { %v1765_v58 = vpack.c.bf16 %v1692_v48, %v1692_v48  ;;  %v1766_v15 = vpack.c.bf16 %v1693_v46, %v1693_v46  ;;  %v1767_v24 = vpack.c.bf16 %v1694_v50, %v1694_v50  ;;  %v1895_v5 = vunpack.c.l.b16 %v1764_v51  ;;  %v3625_v48 = vld [vmem:[#allocation5 + $0x48] sm:$0xf0]  ;;  %v3615_v46 = vld [vmem:[#allocation5 + $0x30] sm:$0xf]  ;;  %v4055_v50 = vld [vmem:[#allocation5 + $0x34] sm:$0xf0] }
 0x262   : > { %v2001_v57 = vsel %vm1915_vm5, %v2000_v60, %v1999_v41  ;;  %2386 = vmatpush.bf16.msra.mxu2 %v3652_v32  ;;  %v3644_v10 = vor.u32 %v4060_v3, %v3641_v28  ;;  %v2089_v2 = vmax.f32 %v2071_v39, 0.0  ;;  %v2088_v59 = vmax.f32 %v2069_v27, 0.0  ;;  %2373 = vmatpush.bf16.msra.mxu1 %v3640_v18  ;;  %v4056_v60 = vld [vmem:[#allocation5 + $0x44] sm:$0xf]  ;;  %v3601_v16 = vld [vmem:[#allocation5 + $0x18] sm:$0xf0] }
 0x263   : > { %v1896_v53 = vunpack.c.l.b16 %v1765_v58  ;;  %v1897_v35 = vunpack.c.l.b16 %v1766_v15  ;;  %v1898_v0 = vunpack.c.l.b16 %v1767_v24  ;;  %v2003_v33 = vsel %vm1918_vm6, %v2002_v37, %v2001_v57  ;;  %v4054_v37 = vld [vmem:[#allocation5 + $0x34] sm:$0xf]  ;;  %v3617_v58 = vld [vmem:[#allocation5 + $0x38] sm:$0xf0]  ;;  %v3591_v4 = vld [vmem:[#allocation5] sm:$0xf] }
 0x264   : > { %v2010_v19 = vrot.slane %v1895_v5, 4  ;;  %v3632_v31 = vor.u32 %v4059_v29, %v3631_v21  ;;  %v5385_v61 = vmax.f32 %v2088_v59, %v2089_v2  ;;  %v3636_v9 = vor.u32 %v4058_v43, %v3633_v12  ;;  %v4049_v30 = vld [vmem:[#allocation5 + $0x4] sm:$0xf0]  ;;  %v4048_v32 = vld [vmem:[#allocation5 + $0x4] sm:$0xf] }
 0x265   : > { %v2012_v54 = vrot.slane %v1896_v53, 3  ;;  %v2014_v17 = vrot.slane %v1897_v35, 2  ;;  %v2016_v14 = vrot.slane %v1898_v0, 1  ;;  %v3624_v1 = vor.u32 %v4057_v44, %v3623_v56  ;;  %v4053_v53 = vld [vmem:[#allocation5 + $0x24] sm:$0xf0] }
 0x266   : > { %v2011_v34 = vsel %vm1909_vm3, %v2010_v19, %v2009_v23  ;;  %2387 = vmatpush.bf16.msra.mxu2 %v3644_v10  ;;  %2374 = vmatpush.bf16.msra.mxu1 %v3632_v31  ;;  %v2104_v51 = vrot.slane %v5385_v61, 2  ;;  %v3628_v41 = vor.u32 %v4056_v60, %v3625_v48  ;;  %v3616_v5 = vor.u32 %v4055_v50, %v3615_v46  ;;  %v3609_v19 = vld [vmem:[#allocation5 + $0x28] sm:$0xf0]  ;;  %v3771_v31 = vld [vmem:[%s5889_s7 + $0xe0] sm:$0xf] }
 0x267   : > { %v2013_v8 = vsel %vm1912_vm4, %v2012_v54, %v2011_v34  ;;  %v2073_v47 = vpop.f32.mrf.mxu0  ;;  %v2105_v57 = vrot.slane %v5385_v61, 4  ;;  %v3620_v7 = vor.u32 %v4054_v37, %v3617_v58  ;;  %v3573_v45 = vrot.slane %v5385_v61, 9  ;;  %v3593_v3 = vld [vmem:[#allocation5 + $0x8] sm:$0xf0]  ;;  %v4094_v12 = vld [vmem:[%s5889_s7 + $0xec] sm:$0xf0] }
 0x268   : > { %v2015_v6 = vsel %vm1915_vm5, %v2014_v17, %v2013_v8  ;;  %v2074_v35 = vadd.f32 %v5380_v63, %v2073_v47  ;;  %v3574_v23 = vrot.slane %v2104_v51, 9  ;;  %v3608_v17 = vor.u32 %v4053_v53, %v3607_v38  ;;  %v4090_v44 = vld [vmem:[%s5889_s7 + $0xcc] sm:$0xf0]  ;;  %v3899_v50 = vld [vmem:[%s5889_s7 + $0x1e0] sm:$0xf] }
 0x269   : > { %v2017_v52 = vsel %vm1918_vm6, %v2016_v14, %v2015_v6  ;;  %v3575_v34 = vrot.slane %v2105_v57, 9  ;;  %v3599_v14 = vld [vmem:[#allocation5 + $0x10] sm:$0xf]  ;;  %v4051_v6 = vld [vmem:[#allocation5 + $0x14] sm:$0xf0]  ;;  %v2106_v47 = vrot.slane %v5385_v61, 6  ;;  %v3604_v40 = vor.u32 %v4050_v42, %v3601_v16 }
 0x26a   : > { %v2021_v13 = vpack.c.b16 %v2017_v52, %v2003_v33  ;;  %2388 = vmatpush.bf16.msra.mxu2 %v3636_v9  ;;  %2375 = vmatpush.bf16.msra.mxu1 %v3624_v1  ;;  %v4052_v33 = vld [vmem:[#allocation5 + $0x24] sm:$0xf]  ;;  %v2090_v52 = vmax.f32 %v2074_v35, 0.0  ;;  %v3600_v11 = vor.u32 %v4051_v6, %v3599_v14  ;;  %v2176_v2 = vmax.f32 %v5385_v61, %v3573_v45  ;;  %v3755_v9 = vld [vmem:[%s5889_s7 + $0xc0] sm:$0xf] }
 0x26b   : > { %v3612_v8 = vor.u32 %v4052_v33, %v3609_v19  ;;  %v2178_v26 = vmax.f32 %v2105_v57, %v3575_v34  ;;  %v3576_v28 = vrot.slane %v2106_v47, 9  ;;  %v3772_v56 = vor.u32 %v4094_v12, %v3771_v31  ;;  %v4126_v58 = vld [vmem:[%s5889_s7 + $0x1ec] sm:$0xf0]  ;;  %v3773_v35 = vld [vmem:[%s5889_s7 + $0xf0] sm:$0xf0] }
 0x26c   : > { %3572 = vmatmul.msk.bf16.gmra.mxu0 %vm2046_vm7, %v2021_v13  ;;  %v3756_v37 = vor.u32 %v4090_v44, %v3755_v9  ;;  %v4086_v38 = vld [vmem:[%s5889_s7 + $0xac] sm:$0xf0]  ;;  %v3900_v53 = vor.u32 %v4126_v58, %v3899_v50 }
 0x26d   : > { %v2211_v21 = vpack.c.bf16 %v2178_v26, %v2178_v26  ;;  %2908 = vmatpush.bf16.msra.mxu3 %v3772_v56 }
 0x26e   : > { %2389 = vmatpush.bf16.msra.mxu2 %v3628_v41  ;;  %2376 = vmatpush.bf16.msra.mxu1 %v3616_v5 }
 0x26f   : > { %v2075_v22 = vpop.f32.mrf.mxu0 }
 0x270   : > { %v2076_v15 = vadd.f32 %v5380_v63, %v2075_v22  ;;  %v2177_v22 = vmax.f32 %v2104_v51, %v3574_v23  ;;  %v2209_v51 = vpack.c.bf16 %v2176_v2, %v2176_v2 }
 0x271   : > { %2909 = vmatpush.bf16.msra.mxu3 %v3756_v37 }
 0x272   : > { %v2091_v54 = vmax.f32 %v2076_v15, 0.0  ;;  %2390 = vmatpush.bf16.msra.mxu2 %v3620_v7  ;;  %2377 = vmatpush.bf16.msra.mxu1 %v3608_v17  ;;  %v2210_v27 = vpack.c.bf16 %v2177_v22, %v2177_v22  ;;  %v4092_v15 = vld [vmem:[%s5889_s7 + $0xe4] sm:$0xf]  ;;  %v3739_v7 = vld [vmem:[%s5889_s7 + $0xa0] sm:$0xf]  ;;  %v2246_v6 = vunpack.c.l.b16 %v2209_v51 }
 0x276   : > { %2391 = vmatpush.bf16.msra.mxu2 %v3612_v8  ;;  %2378 = vmatpush.bf16.msra.mxu1 %v3600_v11  ;;  %v3723_v11 = vld [vmem:[%s5889_s7 + $0x80] sm:$0xf] }
 0x279   : > { %v2078_v62 = vpop.f32.mrf.mxu0 }
 0x27a   : > { %v2079_v36 = vadd.f32 %v5380_v63, %v2078_v62  ;;  %v5396_v62 = vmax.f32 %v2090_v52, %v2091_v54  ;;  %2392 = vmatpush.bf16.msra.mxu2 %v3604_v40  ;;  %v3776_v54 = vor.u32 %v4092_v15, %v3773_v35 }
 0x27c   : > { %v2092_v24 = vmax.f32 %v2079_v36, 0.0  ;;  %v3577_v18 = vrot.slane %v5396_v62, 9  ;;  %v2107_v10 = vrot.slane %v5396_v62, 2  ;;  %v2247_v36 = vunpack.c.l.b16 %v2210_v27 }
 0x27d   : > { %v2108_v61 = vrot.slane %v5396_v62, 4  ;;  %v2109_v41 = vrot.slane %v5396_v62, 6 }
 0x27e   : > { %v3578_v48 = vrot.slane %v2107_v10, 9  ;;  %v2180_v46 = vmax.f32 %v5396_v62, %v3577_v18  ;;  %v2262_v33 = vrot.slane %v2247_v36, 7 }
 0x27f   : > { %v3579_v19 = vrot.slane %v2108_v61, 9  ;;  %v3580_v22 = vrot.slane %v2109_v41, 9 }
 0x280   : > { %v2181_v8 = vmax.f32 %v2107_v10, %v3578_v48  ;;  %v2213_v14 = vpack.c.bf16 %v2180_v46, %v2180_v46 }
 0x281   : > { %v2080_v25 = vpop.f32.mrf.mxu0  ;;  %v2183_v10 = vmax.f32 %v2109_v41, %v3580_v22 }
 0x282   : > { %v2081_v20 = vadd.f32 %v5380_v63, %v2080_v25  ;;  %v3592_v25 = vor.u32 %v4049_v30, %v3591_v4  ;;  %v2263_v4 = vsel %vm1900_vm0, %v2262_v33, %v2246_v6 }
 0x284   : > { %v2093_v49 = vmax.f32 %v2081_v20, 0.0  ;;  %v3596_v20 = vor.u32 %v4048_v32, %v3593_v3  ;;  %2379 = vmatpush.bf16.msra.mxu1 %v3592_v25  ;;  %v2250_v32 = vunpack.c.l.b16 %v2213_v14 }
 0x286   : > { %v5392_v0 = vmax.f32 %v2092_v24, %v2093_v49  ;;  %v2179_v49 = vmax.f32 %v2106_v47, %v3576_v28  ;;  %2393 = vmatpush.bf16.msra.mxu2 %v3596_v20  ;;  %v2248_v24 = vunpack.c.l.b16 %v2211_v21  ;;  %v2268_v31 = vrot.slane %v2250_v32, 4  ;;  %v4122_v32 = vld [vmem:[%s5889_s7 + $0x1cc] sm:$0xf0] }
 0x288   : > { %v2110_v13 = vrot.slane %v5392_v0, 2  ;;  %v2111_v55 = vrot.slane %v5392_v0, 4  ;;  %v2112_v60 = vrot.slane %v5392_v0, 6  ;;  %v3581_v1 = vrot.slane %v5392_v0, 9  ;;  %2921 = vmatpush.bf16.msrb.mxu1 %v3900_v53 }
 0x289   : > { %v2212_v23 = vpack.c.bf16 %v2179_v49, %v2179_v49  ;;  %v2264_v62 = vrot.slane %v2248_v24, 6  ;;  %v2216_v49 = vpack.c.bf16 %v2183_v10, %v2183_v10  ;;  %v4074_v10 = vld [vmem:[%s5889_s7 + $0x4c] sm:$0xf0] }
 0x28a   : > { %v3582_v39 = vrot.slane %v2110_v13, 9  ;;  %v3583_v59 = vrot.slane %v2111_v55, 9  ;;  %v3584_v17 = vrot.slane %v2112_v60, 9  ;;  %v2184_v34 = vmax.f32 %v5392_v0, %v3581_v1  ;;  %2934 = vmatpush.bf16.msrb.mxu2 %v3776_v54  ;;  %v4082_v0 = vld [vmem:[%s5889_s7 + $0x8c] sm:$0xf0] }
 0x28b   : > { %v2249_v40 = vunpack.c.l.b16 %v2212_v23  ;;  %v3724_v27 = vor.u32 %v4082_v0, %v3723_v11  ;;  %v2265_v20 = vsel %vm1903_vm1, %v2264_v62, %v2263_v4  ;;  %v3707_v4 = vld [vmem:[%s5889_s7 + $0x60] sm:$0xf] }
 0x28c   : > { %v2185_v29 = vmax.f32 %v2110_v13, %v3582_v39  ;;  %v2186_v5 = vmax.f32 %v2111_v55, %v3583_v59  ;;  %v3740_v13 = vor.u32 %v4086_v38, %v3739_v7  ;;  %v2182_v55 = vmax.f32 %v2108_v61, %v3579_v19 }
 0x28d   : > { %v2217_v30 = vpack.c.bf16 %v2184_v34, %v2184_v34  ;;  %v2187_v26 = vmax.f32 %v2112_v60, %v3584_v17  ;;  %v2214_v39 = vpack.c.bf16 %v2181_v8, %v2181_v8  ;;  %v2253_v19 = vunpack.c.l.b16 %v2216_v49  ;;  %v4080_v49 = vld [vmem:[%s5889_s7 + $0x84] sm:$0xf] }
 0x28e   : > { %v2218_v57 = vpack.c.bf16 %v2185_v29, %v2185_v29  ;;  %v2219_v42 = vpack.c.bf16 %v2186_v5, %v2186_v5  ;;  %2910 = vmatpush.bf16.msra.mxu3 %v3740_v13  ;;  %v2215_v59 = vpack.c.bf16 %v2182_v55, %v2182_v55 }
 0x28f   : > { %v2254_v21 = vunpack.c.l.b16 %v2217_v30  ;;  %v2220_v29 = vpack.c.bf16 %v2187_v26, %v2187_v26  ;;  %v2274_v22 = vrot.slane %v2253_v19, 1  ;;  %v4078_v30 = vld [vmem:[%s5889_s7 + $0x6c] sm:$0xf0]  ;;  %v3883_v26 = vld [vmem:[%s5889_s7 + $0x1c0] sm:$0xf] }
 0x290   : > { %v2255_v16 = vunpack.c.l.b16 %v2218_v57  ;;  %v2256_v18 = vunpack.c.l.b16 %v2219_v42  ;;  %v2252_v51 = vunpack.c.l.b16 %v2215_v59  ;;  %v3867_v59 = vld [vmem:[%s5889_s7 + $0x1a0] sm:$0xf]  ;;  %v4091_v19 = vld [vmem:[%s5889_s7 + $0xd4] sm:$0xf0] }
 0x291   : > { %v2257_v41 = vunpack.c.l.b16 %v2220_v29  ;;  %v3741_v29 = vld [vmem:[%s5889_s7 + $0xb0] sm:$0xf0] }
 0x292   : > { %v2276_v25 = vrot.slane %v2255_v16, 7  ;;  %2911 = vmatpush.bf16.msra.mxu3 %v3724_v27  ;;  %v2278_v60 = vrot.slane %v2256_v18, 6  ;;  %v2272_v54 = vrot.slane %v2252_v51, 2  ;;  %v3884_v27 = vor.u32 %v4122_v32, %v3883_v26  ;;  %v3659_v51 = vld [vmem:[%s5889_s7] sm:$0xf] }
 0x293   : > { %v2280_v17 = vrot.slane %v2257_v41, 5  ;;  %v4066_v41 = vld [vmem:[%s5889_s7 + $0xc] sm:$0xf0]  ;;  %v3677_v26 = vld [vmem:[%s5889_s7 + $0x30] sm:$0xf0] }
 0x294   : > { %v2277_v44 = vsel %vm1900_vm0, %v2276_v25, %v2254_v21  ;;  %2922 = vmatpush.bf16.msrb.mxu1 %v3884_v27  ;;  %v3691_v25 = vld [vmem:[%s5889_s7 + $0x40] sm:$0xf]  ;;  %v4083_v27 = vld [vmem:[%s5889_s7 + $0x94] sm:$0xf0] }
 0x295   : > { %v2279_v7 = vsel %vm1903_vm1, %v2278_v60, %v2277_v44  ;;  %v3725_v44 = vld [vmem:[%s5889_s7 + $0x90] sm:$0xf0]  ;;  %v3779_v60 = vld [vmem:[%s5889_s7 + $0xe8] sm:$0xf] }
 0x2e9   : > { %v2083_v43 = vpop.f32.mrf.mxu0 }
 0x2ea   : > { %v2084_v52 = vadd.f32 %v5380_v63, %v2083_v43  ;;  %v2251_v43 = vunpack.c.l.b16 %v2214_v39  ;;  %v3708_v39 = vor.u32 %v4078_v30, %v3707_v4 }
 0x2ec   : > { %v2094_v3 = vmax.f32 %v2084_v52, 0.0  ;;  %v2270_v58 = vrot.slane %v2251_v43, 3  ;;  %v2281_v52 = vsel %vm1906_vm2, %v2280_v17, %v2279_v7  ;;  %2912 = vmatpush.bf16.msra.mxu3 %v3708_v39  ;;  %v4124_v7 = vld [vmem:[%s5889_s7 + $0x1e4] sm:$0xf]  ;;  %v3819_v17 = vld [vmem:[%s5889_s7 + $0x140] sm:$0xf] }
 0x2ed   : > { %v4116_v39 = vld [vmem:[%s5889_s7 + $0x1a4] sm:$0xf] }
 0x2f1   : > { %v2085_v47 = vpop.f32.mrf.mxu0 }
 0x2f2   : > { %v2086_v45 = vadd.f32 %v5380_v63, %v2085_v47  ;;  %v2266_v63 = vrot.slane %v2249_v40, 5 }
 0x2f4   : > { %v2095_v28 = vmax.f32 %v2086_v45, 0.0  ;;  %v2267_v56 = vsel %vm1906_vm2, %v2266_v63, %v2265_v20  ;;  %v4118_v20 = vld [vmem:[%s5889_s7 + $0x1ac] sm:$0xf0]  ;;  %v4084_v63 = vld [vmem:[%s5889_s7 + $0xa4] sm:$0xf] }
 0x2f5   : > { %v2269_v37 = vsel %vm1909_vm3, %v2268_v31, %v2267_v56  ;;  %v3868_v21 = vor.u32 %v4118_v20, %v3867_v59  ;;  %v3744_v43 = vor.u32 %v4084_v63, %v3741_v29  ;;  %v3675_v31 = vld [vmem:[%s5889_s7 + $0x20] sm:$0xf]  ;;  %v4098_v59 = vld [vmem:[%s5889_s7 + $0x10c] sm:$0xf0]  ;;  %v3661_v29 = vld [vmem:[%s5889_s7 + $0x10] sm:$0xf0] }
 0x2f6   : > { %v2099_v2 = vmax.f32 %v2094_v3, %v2095_v28  ;;  %v2271_v23 = vsel %vm1912_vm4, %v2270_v58, %v2269_v37  ;;  %v4088_v3 = vld [vmem:[%s5889_s7 + $0xc4] sm:$0xf]  ;;  %v3757_v28 = vld [vmem:[%s5889_s7 + $0xd0] sm:$0xf0]  ;;  %v3660_v37 = vor.u32 %v4066_v41, %v3659_v51  ;;  %v3835_v58 = vld [vmem:[%s5889_s7 + $0x160] sm:$0xf] }
 0x2f7   : > { %v2273_v47 = vsel %vm1915_vm5, %v2272_v54, %v2271_v23  ;;  %v3760_v18 = vor.u32 %v4088_v3, %v3757_v28  ;;  %2923 = vmatpush.bf16.msrb.mxu1 %v3868_v21  ;;  %v3869_v3 = vld [vmem:[%s5889_s7 + $0x1b0] sm:$0xf0]  ;;  %v3731_v28 = vld [vmem:[%s5889_s7 + $0x88] sm:$0xf]  ;;  %v4064_v21 = vld [vmem:[%s5889_s7 + $0x4] sm:$0xf] }
 0x2f8   : > { %v3585_v12 = vrot.slane %v2099_v2, 9  ;;  %v2113_v9 = vrot.slane %v2099_v2, 2  ;;  %v2114_v36 = vrot.slane %v2099_v2, 4  ;;  %v2115_v61 = vrot.slane %v2099_v2, 6 }
 0x2f9   : > { %v2275_v45 = vsel %vm1918_vm6, %v2274_v22, %v2273_v47  ;;  %2935 = vmatpush.bf16.msrb.mxu2 %v3760_v18  ;;  %v3747_v22 = vld [vmem:[%s5889_s7 + $0xa8] sm:$0xf] }
 0x2fa   : > { %v3586_v1 = vrot.slane %v2113_v9, 9  ;;  %v3587_v48 = vrot.slane %v2114_v36, 9  ;;  %v3588_v46 = vrot.slane %v2115_v61, 9  ;;  %v2188_v50 = vmax.f32 %v2099_v2, %v3585_v12  ;;  %v4070_v12 = vld [vmem:[%s5889_s7 + $0x2c] sm:$0xf0] }
 0x2fb   : > { %v3692_v2 = vor.u32 %v4074_v10, %v3691_v25  ;;  %v3872_v25 = vor.u32 %v4116_v39, %v3869_v3  ;;  %v3732_v10 = vor.u32 %v4083_v27, %v3731_v28 }
 0x2fc   : > { %v2189_v15 = vmax.f32 %v2113_v9, %v3586_v1  ;;  %v2190_v24 = vmax.f32 %v2114_v36, %v3587_v48  ;;  %v2191_v5 = vmax.f32 %v2115_v61, %v3588_v46  ;;  %v2221_v57 = vpack.c.bf16 %v2188_v50, %v2188_v50  ;;  %v3851_v36 = vld [vmem:[%s5889_s7 + $0x180] sm:$0xf]  ;;  %v4114_v61 = vld [vmem:[%s5889_s7 + $0x18c] sm:$0xf0]  ;;  %v4095_v1 = vld [vmem:[%s5889_s7 + $0xf4] sm:$0xf0] }
 0x2fd   : > { %2913 = vmatpush.bf16.msra.mxu3 %v3692_v2  ;;  %2936 = vmatpush.bf16.msrb.mxu2 %v3744_v43  ;;  %v3676_v9 = vor.u32 %v4070_v12, %v3675_v31  ;;  %v3852_v56 = vor.u32 %v4114_v61, %v3851_v36  ;;  %v3728_v48 = vor.u32 %v4080_v49, %v3725_v44  ;;  %v5524_v50 = vld [vmem:[%s5888_s6] sm:$0x3]  ;;  %v4112_v43 = vld [vmem:[%s5889_s7 + $0x184] sm:$0xf]  ;;  %v3715_v36 = vld [vmem:[%s5889_s7 + $0x68] sm:$0xf] }
 0x2fe   : > { %v2222_v38 = vpack.c.bf16 %v2189_v15, %v2189_v15  ;;  %v2223_v53 = vpack.c.bf16 %v2190_v24, %v2190_v24  ;;  %v2224_v35 = vpack.c.bf16 %v2191_v5, %v2191_v5  ;;  %v2258_v33 = vunpack.c.l.b16 %v2221_v57  ;;  %v4110_v15 = vld [vmem:[%s5889_s7 + $0x16c] sm:$0xf0]  ;;  %v4076_v24 = vld [vmem:[%s5889_s7 + $0x64] sm:$0xf]  ;;  %v3709_v57 = vld [vmem:[%s5889_s7 + $0x70] sm:$0xf0] }
 0x2ff   : > { %v3780_v46 = vor.u32 %v4095_v1, %v3779_v60  ;;  %2924 = vmatpush.bf16.msrb.mxu1 %v3852_v56  ;;  %v3836_v5 = vor.u32 %v4110_v15, %v3835_v58  ;;  %v2226_v23 = vperm.slane %v5524_v50, 0  ;;  %v2227_v4 = vperm.slane %v5524_v50, 1  ;;  %v3787_v2 = vld [vmem:[%s5889_s7 + $0x100] sm:$0xf]  ;;  %v4079_v61 = vld [vmem:[%s5889_s7 + $0x74] sm:$0xf0] }
 0x300   : > { %v2259_v34 = vunpack.c.l.b16 %v2222_v38  ;;  %v2260_v8 = vunpack.c.l.b16 %v2223_v53  ;;  %v2261_v14 = vunpack.c.l.b16 %v2224_v35  ;;  %v2282_v6 = vrot.slane %v2258_v33, 4  ;;  %v3901_v38 = vld [vmem:[%s5889_s7 + $0x1f0] sm:$0xf0]  ;;  %v3763_v33 = vld [vmem:[%s5889_s7 + $0xc8] sm:$0xf] }
 0x301   : > { %2914 = vmatpush.bf16.msra.mxu3 %v3676_v9  ;;  %2937 = vmatpush.bf16.msrb.mxu2 %v3728_v48  ;;  %v3712_v53 = vor.u32 %v4076_v24, %v3709_v57  ;;  %v3904_v35 = vor.u32 %v4124_v7, %v3901_v38  ;;  %v3764_v54 = vor.u32 %v4091_v19, %v3763_v33  ;;  %v3853_v9 = vld [vmem:[%s5889_s7 + $0x190] sm:$0xf0]  ;;  %v3907_v60 = vld [vmem:[%s5889_s7 + $0x1e8] sm:$0xf]  ;;  %v4127_v1 = vld [vmem:[%s5889_s7 + $0x1f4] sm:$0xf0] }
 0x302   : > { %v2283_v13 = vsel %vm1909_vm3, %v2282_v6, %v2281_v52  ;;  %v2284_v42 = vrot.slane %v2259_v34, 3  ;;  %v2286_v16 = vrot.slane %v2260_v8, 2  ;;  %v2288_v11 = vrot.slane %v2261_v14, 1  ;;  %2960 = vmatpush.bf16.msrb.mxu0 %v3780_v46  ;;  %v4106_v34 = vld [vmem:[%s5889_s7 + $0x14c] sm:$0xf0] }
 0x303   : > { %2925 = vmatpush.bf16.msrb.mxu1 %v3836_v5  ;;  %v4072_v8 = vld [vmem:[%s5889_s7 + $0x44] sm:$0xf]  ;;  %v3820_v14 = vor.u32 %v4106_v34, %v3819_v17  ;;  %v3693_v6 = vld [vmem:[%s5889_s7 + $0x50] sm:$0xf0]  ;;  %v3788_v63 = vor.u32 %v4098_v59, %v3787_v2  ;;  %v3664_v12 = vor.u32 %v4064_v21, %v3661_v29  ;;  %v3856_v56 = vor.u32 %v4112_v43, %v3853_v9  ;;  %v4093_v48 = vld [vmem:[%s5889_s7 + $0xec] sm:$0xf] }
 0x304   : > { %v2285_v62 = vsel %vm1912_vm4, %v2284_v42, %v2283_v13  ;;  %v4120_v52 = vld [vmem:[%s5889_s7 + $0x1c4] sm:$0xf]  ;;  %v3885_v13 = vld [vmem:[%s5889_s7 + $0x1d0] sm:$0xf0]  ;;  %v3716_v44 = vor.u32 %v4079_v61, %v3715_v36  ;;  %v3781_v58 = vld [vmem:[%s5889_s7 + $0xf8] sm:$0xf0] }
 0x305   : > { %v2287_v0 = vsel %vm1915_vm5, %v2286_v16, %v2285_v62  ;;  %2915 = vmatpush.bf16.msra.mxu3 %v3660_v37  ;;  %2938 = vmatpush.bf16.msrb.mxu2 %v3712_v53  ;;  %v3696_v16 = vor.u32 %v4072_v8, %v3693_v6  ;;  %v3888_v47 = vor.u32 %v4120_v52, %v3885_v13  ;;  %v4087_v62 = vld [vmem:[%s5889_s7 + $0xb4] sm:$0xf0]  ;;  %v4108_v15 = vld [vmem:[%s5889_s7 + $0x164] sm:$0xf]  ;;  %v3837_v5 = vld [vmem:[%s5889_s7 + $0x170] sm:$0xf0] }
 0x306   : > { %v2289_v55 = vsel %vm1918_vm6, %v2288_v11, %v2287_v0  ;;  %2961 = vmatpush.bf16.msrb.mxu0 %v3764_v54  ;;  %v3748_v0 = vor.u32 %v4087_v62, %v3747_v22  ;;  %v3908_v37 = vor.u32 %v4127_v1, %v3907_v60  ;;  %v3784_v24 = vor.u32 %v4093_v48, %v3781_v58  ;;  %v3699_v57 = vld [vmem:[%s5889_s7 + $0x48] sm:$0xf]  ;;  %v4075_v7 = vld [vmem:[%s5889_s7 + $0x54] sm:$0xf0]  ;;  %v4089_v54 = vld [vmem:[%s5889_s7 + $0xcc] sm:$0xf] }
 0x307   : > { %v2290_v40 = vpack.c.b16 %v2289_v55, %v2275_v45  ;;  %2926 = vmatpush.bf16.msrb.mxu1 %v3820_v14  ;;  %v3803_v45 = vld [vmem:[%s5889_s7 + $0x120] sm:$0xf]  ;;  %v4102_v55 = vld [vmem:[%s5889_s7 + $0x12c] sm:$0xf0]  ;;  %v3840_v53 = vor.u32 %v4108_v15, %v3837_v5  ;;  %v3891_v33 = vld [vmem:[%s5889_s7 + $0x1c8] sm:$0xf] }
 0x308   : > { %v3804_v30 = vor.u32 %v4102_v55, %v3803_v45  ;;  %v4123_v19 = vld [vmem:[%s5889_s7 + $0x1d4] sm:$0xf0]  ;;  %v3765_v17 = vld [vmem:[%s5889_s7 + $0xd8] sm:$0xf0]  ;;  %v4104_v34 = vld [vmem:[%s5889_s7 + $0x144] sm:$0xf] }
 0x309   : > { %2380 = vmatmul.bf16.vlgmr.msra.gmra.mxu1 %v2290_v40  ;;  %2394 = vmatmul.bf16.vlgmr.msra.gmra.mxu2 %v2290_v40  ;;  %v4068_v40 = vld [vmem:[%s5889_s7 + $0x24] sm:$0xf]  ;;  %v3768_v6 = vor.u32 %v4089_v54, %v3765_v17  ;;  %v3821_v52 = vld [vmem:[%s5889_s7 + $0x150] sm:$0xf0]  ;;  %v3683_v13 = vld [vmem:[%s5889_s7 + $0x28] sm:$0xf] }
 0x30a   : > { %2947 = vmatpush.bf16.msrb.mxu3 %v3904_v35  ;;  %2939 = vmatpush.bf16.msrb.mxu2 %v3696_v16  ;;  %v3680_v32 = vor.u32 %v4068_v40, %v3677_v26  ;;  %v3700_v35 = vor.u32 %v4075_v7, %v3699_v57  ;;  %v3875_v22 = vld [vmem:[%s5889_s7 + $0x1a8] sm:$0xf]  ;;  %v4119_v62 = vld [vmem:[%s5889_s7 + $0x1b4] sm:$0xf0]  ;;  %v3824_v45 = vor.u32 %v4104_v34, %v3821_v52  ;;  %v4085_v40 = vld [vmem:[%s5889_s7 + $0xac] sm:$0xf] }
 0x30b   : > { %2962 = vmatpush.bf16.msrb.mxu0 %v3748_v0  ;;  %2927 = vmatpush.bf16.msrb.mxu1 %v3804_v30  ;;  %v3749_v30 = vld [vmem:[%s5889_s7 + $0xb8] sm:$0xf0]  ;;  %v3876_v26 = vor.u32 %v4119_v62, %v3875_v22  ;;  %v4100_v50 = vld [vmem:[%s5889_s7 + $0x124] sm:$0xf]  ;;  %v4115_v59 = vld [vmem:[%s5889_s7 + $0x194] sm:$0xf0] }
 0x30c   : > { %v3752_v39 = vor.u32 %v4085_v40, %v3749_v30  ;;  %v4111_v60 = vld [vmem:[%s5889_s7 + $0x174] sm:$0xf0]  ;;  %v4077_v1 = vld [vmem:[%s5889_s7 + $0x6c] sm:$0xf]  ;;  %v3717_v48 = vld [vmem:[%s5889_s7 + $0x78] sm:$0xf0] }
 0x30d   : > { %v3720_v57 = vor.u32 %v4077_v1, %v3717_v48  ;;  %v3827_v7 = vld [vmem:[%s5889_s7 + $0x148] sm:$0xf]  ;;  %v4069_v22 = vld [vmem:[%s5889_s7 + $0x2c] sm:$0xf]  ;;  %v3685_v62 = vld [vmem:[%s5889_s7 + $0x38] sm:$0xf0] }
 0x30e   : > { %2948 = vmatpush.bf16.msrb.mxu3 %v3888_v47  ;;  %2940 = vmatpush.bf16.msrb.mxu2 %v3680_v32  ;;  %v4071_v47 = vld [vmem:[%s5889_s7 + $0x34] sm:$0xf0]  ;;  %v3667_v32 = vld [vmem:[%s5889_s7 + $0x8] sm:$0xf] }
 0x30f   : > { %2963 = vmatpush.bf16.msrb.mxu0 %v3732_v10  ;;  %2928 = vmatpush.bf16.msrb.mxu1 %v3788_v63  ;;  %v3684_v55 = vor.u32 %v4071_v47, %v3683_v13  ;;  %v3811_v13 = vld [vmem:[%s5889_s7 + $0x128] sm:$0xf] }
 0x312   : > { %2949 = vmatpush.bf16.msrb.mxu3 %v3872_v25  ;;  %2941 = vmatpush.bf16.msrb.mxu2 %v3664_v12  ;;  %v3859_v25 = vld [vmem:[%s5889_s7 + $0x188] sm:$0xf]  ;;  %v4096_v12 = vld [vmem:[%s5889_s7 + $0x104] sm:$0xf] }
 0x313   : > { %2964 = vmatpush.bf16.msrb.mxu0 %v3716_v44  ;;  %2973 = vmatpush.bf16.msra.mxu1 %v3908_v37  ;;  %v3860_v36 = vor.u32 %v4115_v59, %v3859_v25  ;;  %v4065_v25 = vld [vmem:[%s5889_s7 + $0xc] sm:$0xf] }
 0x316   : > { %2950 = vmatpush.bf16.msrb.mxu3 %v3856_v56  ;;  %2986 = vmatpush.bf16.msra.mxu2 %v3784_v24  ;;  %v3843_v56 = vld [vmem:[%s5889_s7 + $0x168] sm:$0xf] }
 0x317   : > { %2965 = vmatpush.bf16.msrb.mxu0 %v3700_v35  ;;  %v3844_v5 = vor.u32 %v4111_v60, %v3843_v56  ;;  %v4107_v35 = vld [vmem:[%s5889_s7 + $0x154] sm:$0xf0] }
 0x31a   : > { %2951 = vmatpush.bf16.msrb.mxu3 %v3840_v53  ;;  %2987 = vmatpush.bf16.msra.mxu2 %v3768_v6  ;;  %v3828_v6 = vor.u32 %v4107_v35, %v3827_v7  ;;  %v4121_v7 = vld [vmem:[%s5889_s7 + $0x1cc] sm:$0xf] }
 0x31b   : > { %2966 = vmatpush.bf16.msrb.mxu0 %v3684_v55 }
 0x31e   : > { %2952 = vmatpush.bf16.msrb.mxu3 %v3824_v45  ;;  %2988 = vmatpush.bf16.msra.mxu2 %v3752_v39 }
 0x386   : > { %v2381_v42 = vpop.f32.mrf.mxu1 }
 0x387   : > { %v5581_v11 = vadd.f32 %v2381_v42, %v2226_v23 }
 0x389   : > { %v2400_v18 = vmax.f32 %v5581_v11, 0.0 }
 0x38b   : > { %v2408_v46 = vrot.slane %v2400_v18, 4 }
 0x38c   : > { %v2395_v20 = vpop.f32.mrf.mxu2 }
 0x38d   : > { %v2396_v31 = vadd.f32 %v2395_v20, %v2227_v4  ;;  %v2416_v42 = vmax.f32 %v2400_v18, %v2408_v46  ;;  %v4067_v18 = vld [vmem:[%s5889_s7 + $0x14] sm:$0xf0]  ;;  %v4081_v20 = vld [vmem:[%s5889_s7 + $0x8c] sm:$0xf] }
 0x38e   : > { %v2383_v49 = vpop.f32.mrf.mxu1  ;;  %v3668_v43 = vor.u32 %v4067_v18, %v3667_v32  ;;  %v4099_v32 = vld [vmem:[%s5889_s7 + $0x114] sm:$0xf0] }
 0x38f   : > { %v2401_v51 = vmax.f32 %v2396_v31, 0.0  ;;  %v5644_v41 = vadd.f32 %v2383_v49, %v2226_v23  ;;  %v3892_v23 = vor.u32 %v4123_v19, %v3891_v33  ;;  %v3733_v31 = vld [vmem:[%s5889_s7 + $0x98] sm:$0xf0]  ;;  %v3789_v49 = vld [vmem:[%s5889_s7 + $0x110] sm:$0xf0] }
 0x390   : > { %v3736_v61 = vor.u32 %v4081_v20, %v3733_v31  ;;  %2967 = vmatpush.bf16.msrb.mxu0 %v3668_v43  ;;  %v3792_v58 = vor.u32 %v4096_v12, %v3789_v49  ;;  %v4073_v33 = vld [vmem:[%s5889_s7 + $0x4c] sm:$0xf]  ;;  %v3701_v19 = vld [vmem:[%s5889_s7 + $0x58] sm:$0xf0] }
 0x391   : > { %v2409_v38 = vrot.slane %v2401_v51, 4  ;;  %v2402_v14 = vmax.f32 %v5644_v41, 0.0  ;;  %2974 = vmatpush.bf16.msra.mxu1 %v3892_v23  ;;  %v3704_v52 = vor.u32 %v4073_v33, %v3701_v19  ;;  %v4117_v33 = vld [vmem:[%s5889_s7 + $0x1ac] sm:$0xf]  ;;  %v3877_v19 = vld [vmem:[%s5889_s7 + $0x1b8] sm:$0xf0] }
 0x392   : > { %2989 = vmatpush.bf16.msra.mxu2 %v3736_v61 }
 0x393   : > { %v2417_v8 = vmax.f32 %v2401_v51, %v2409_v38  ;;  %v2410_v2 = vrot.slane %v2402_v14, 4 }
 0x394   : > { %v2397_v16 = vpop.f32.mrf.mxu2 }
 0x395   : > { %v2424_v11 = vrot.slane %v2417_v8, 6  ;;  %v2398_v0 = vadd.f32 %v2397_v16, %v2227_v4  ;;  %v3805_v4 = vld [vmem:[%s5889_s7 + $0x130] sm:$0xf0]  ;;  %2975 = vmatpush.bf16.msra.mxu1 %v3876_v26  ;;  %v2418_v41 = vmax.f32 %v2402_v14, %v2410_v2 }
 0x396   : > { %v3808_v29 = vor.u32 %v4100_v50, %v3805_v4  ;;  %2990 = vmatpush.bf16.msra.mxu2 %v3720_v57  ;;  %v3688_v50 = vor.u32 %v4069_v22, %v3685_v62  ;;  %v3795_v4 = vld [vmem:[%s5889_s7 + $0x108] sm:$0xf]  ;;  %v3813_v22 = vld [vmem:[%s5889_s7 + $0x138] sm:$0xf0] }
 0x397   : > { %v2427_v3 = vsel %vm2426_vm8, %v2416_v42, %v2424_v11  ;;  %v2429_v28 = vsel %vm2428_vm9, %v2416_v42, %v2424_v11  ;;  %v2403_v27 = vmax.f32 %v2398_v0, 0.0  ;;  %v4103_v42 = vld [vmem:[%s5889_s7 + $0x134] sm:$0xf0]  ;;  %v3796_v12 = vor.u32 %v4099_v32, %v3795_v4  ;;  %v4149_v4 = vld [vmem:[#allocation7 + $0xa8] sm:$0xff]  ;;  %v4142_v32 = vld [vmem:[#allocation7 + $0x70] sm:$0xff] }
 0x398   : > { %v2430_v10 = vrot.slane %v2429_v28, 2  ;;  %v3653_v63 = vrot.slane %v2427_v3, 9  ;;  %2953 = vmatpush.bf16.msrb.mxu3 %v3808_v29  ;;  %v3812_v39 = vor.u32 %v4103_v42, %v3811_v13  ;;  %v4105_v13 = vld [vmem:[%s5889_s7 + $0x14c] sm:$0xf]  ;;  %v3829_v42 = vld [vmem:[%s5889_s7 + $0x158] sm:$0xf0] }
 0x399   : > { %v2411_v21 = vrot.slane %v2403_v27, 4  ;;  %2976 = vmatpush.bf16.msra.mxu1 %v3860_v36 }
 0x39a   : > { %v3654_v9 = vrot.slane %v2430_v10, 9  ;;  %v2450_v51 = vmax.f32 %v2427_v3, %v3653_v63  ;;  %2991 = vmatpush.bf16.msra.mxu2 %v3704_v52 }
 0x39b   : > { %v2419_v44 = vmax.f32 %v2403_v27, %v2411_v21 }
 0x39c   : > { %v2451_v46 = vmax.f32 %v2430_v10, %v3654_v9  ;;  %v2523_v17 = vperm.slane %v2450_v51, 0  ;;  %2954 = vmatpush.bf16.msrb.mxu3 %v3792_v58  ;;  %v2524_v14 = vperm.slane %v2450_v51, 2  ;;  %v3669_v10 = vld [vmem:[%s5889_s7 + $0x18] sm:$0xf0] }
 0x39d   : > { %v2425_v37 = vrot.slane %v2419_v44, 6  ;;  %2977 = vmatpush.bf16.msra.mxu1 %v3844_v5  ;;  %v3672_v9 = vor.u32 %v4065_v25, %v3669_v10  ;;  %v4147_v25 = vld [vmem:[#allocation7 + $0x98] sm:$0xff]  ;;  %v4140_v10 = vld [vmem:[#allocation7 + $0x60] sm:$0xff] }
 0x39e   : > { %v2525_v15 = vperm.slane %v2451_v46, 0  ;;  %v2526_v24 = vperm.slane %v2451_v46, 2  ;;  %v2539_v45 = vpack.c.bf16 %v2523_v17, %v2523_v17  ;;  %v2540_v26 = vpack.c.bf16 %v2524_v14, %v2524_v14  ;;  %2992 = vmatpush.bf16.msra.mxu2 %v3688_v50  ;;  %v4113_v17 = vld [vmem:[%s5889_s7 + $0x18c] sm:$0xf]  ;;  %v4131_v50 = vld [vmem:[#allocation7 + $0x18] sm:$0xff] }
 0x39f   : > { %v2431_v38 = vsel %vm2426_vm8, %v2418_v41, %v2425_v37  ;;  %v2432_v53 = vsel %vm2428_vm9, %v2418_v41, %v2425_v37  ;;  %v4125_v41 = vld [vmem:[%s5889_s7 + $0x1ec] sm:$0xf]  ;;  %v3909_v37 = vld [vmem:[%s5889_s7 + $0x1f8] sm:$0xf0] }
 0x3a0   : > { %v2541_v23 = vpack.c.bf16 %v2525_v15, %v2525_v15  ;;  %v2542_v54 = vpack.c.bf16 %v2526_v24, %v2526_v24  ;;  %v2433_v34 = vrot.slane %v2432_v53, 2  ;;  %v3655_v8 = vrot.slane %v2431_v38, 9  ;;  %v4135_v53 = vld [vmem:[#allocation7 + $0x38] sm:$0xff]  ;;  %v4109_v14 = vld [vmem:[%s5889_s7 + $0x16c] sm:$0xf] }
 0x3a1   : > { %2978 = vmatpush.bf16.msra.mxu1 %v3828_v6  ;;  %v2564_v43 = vunpack.c.l.b16 %v2539_v45  ;;  %v2565_v31 = vunpack.c.l.b16 %v2540_v26  ;;  %v3912_v57 = vor.u32 %v4125_v41, %v3909_v37  ;;  %3308 = vmatpush.bf16.msra.mxu0 %v4135_v53  ;;  %v3845_v6 = vld [vmem:[%s5889_s7 + $0x178] sm:$0xf0]  ;;  %v4150_v26 = vld [vmem:[#allocation7 + $0xb0] sm:$0xff] }
 0x3a2   : > { %v3656_v16 = vrot.slane %v2433_v34, 9  ;;  %v2452_v47 = vmax.f32 %v2431_v38, %v3655_v8  ;;  %v2566_v11 = vunpack.c.l.b16 %v2541_v23  ;;  %v2567_v0 = vunpack.c.l.b16 %v2542_v54  ;;  %2993 = vmatpush.bf16.msra.mxu2 %v3672_v9  ;;  %v3893_v38 = vld [vmem:[%s5889_s7 + $0x1d8] sm:$0xf0]  ;;  %v4134_v23 = vld [vmem:[#allocation7 + $0x30] sm:$0xff] }
 0x3a3   : > { %v3896_v35 = vor.u32 %v4121_v7, %v3893_v38  ;;  %v3880_v54 = vor.u32 %v4117_v33, %v3877_v19  ;;  %v3848_v52 = vor.u32 %v4109_v14, %v3845_v6  ;;  %v4138_v9 = vld [vmem:[#allocation7 + $0x50] sm:$0xff] }
 0x3a4   : > { %v2453_v55 = vmax.f32 %v2433_v34, %v3656_v16  ;;  %v2527_v40 = vperm.slane %v2452_v47, 0  ;;  %v2528_v30 = vperm.slane %v2452_v47, 2  ;;  %v2572_v2 = vrot.slane %v2566_v11, 7  ;;  %v3861_v34 = vld [vmem:[%s5889_s7 + $0x198] sm:$0xf0] }
 0x3a5   : > { %v2578_v59 = vrot.slane %v2567_v0, 7  ;;  %2979 = vmatpush.bf16.msra.mxu1 %v3812_v39  ;;  %3309 = vmatpush.bf16.msra.mxu0 %v4134_v23  ;;  %v3864_v8 = vor.u32 %v4113_v17, %v3861_v34  ;;  %v3832_v16 = vor.u32 %v4105_v13, %v3829_v42  ;;  %v4101_v47 = vld [vmem:[%s5889_s7 + $0x12c] sm:$0xf]  ;;  %v3797_v0 = vld [vmem:[%s5889_s7 + $0x118] sm:$0xf0]  ;;  %v4154_v34 = vld [vmem:[#allocation7 + $0xd0] sm:$0xff] }
 0x3a6   : > { %v2529_v3 = vperm.slane %v2453_v55, 0  ;;  %v2530_v28 = vperm.slane %v2453_v55, 2  ;;  %v2543_v27 = vpack.c.bf16 %v2527_v40, %v2527_v40  ;;  %v2544_v18 = vpack.c.bf16 %v2528_v30, %v2528_v30  ;;  %v4097_v11 = vld [vmem:[%s5889_s7 + $0x10c] sm:$0xf]  ;;  %v4151_v40 = vld [vmem:[#allocation7 + $0xb8] sm:$0xff]  ;;  %v4132_v30 = vld [vmem:[#allocation7 + $0x20] sm:$0xff] }
 0x3a7   : > { %v2573_v44 = vsel %vm1900_vm0, %v2572_v2, %v2564_v43  ;;  %v2579_v60 = vsel %vm1900_vm0, %v2578_v59, %v2565_v31  ;;  %v3816_v62 = vor.u32 %v4101_v47, %v3813_v22  ;;  %v3800_v45 = vor.u32 %v4097_v11, %v3797_v0  ;;  %v4133_v55 = vld [vmem:[#allocation7 + $0x28] sm:$0xff]  ;;  %v4143_v39 = vld [vmem:[#allocation7 + $0x78] sm:$0xff]  ;;  %v4128_v2 = vld [vmem:[#allocation7] sm:$0xff] }
 0x3a8   : > { %v2545_v20 = vpack.c.bf16 %v2529_v3, %v2529_v3  ;;  %v2546_v63 = vpack.c.bf16 %v2530_v28, %v2530_v28  ;;  %v2568_v21 = vunpack.c.l.b16 %v2543_v27  ;;  %v2569_v29 = vunpack.c.l.b16 %v2544_v18  ;;  %v4130_v3 = vld [vmem:[#allocation7 + $0x10] sm:$0xff]  ;;  %v4148_v28 = vld [vmem:[#allocation7 + $0xa0] sm:$0xff]  ;;  %v4141_v27 = vld [vmem:[#allocation7 + $0x68] sm:$0xff] }
 0x3a9   : > { %2980 = vmatpush.bf16.msra.mxu1 %v3796_v12  ;;  %3310 = vmatpush.bf16.msra.mxu0 %v4133_v55  ;;  %v4129_v18 = vld [vmem:[#allocation7 + $0x8] sm:$0xff]  ;;  %v4146_v59 = vld [vmem:[#allocation7 + $0x90] sm:$0xff]  ;;  %v5839_v43 = vld [vmem:[%s5890_s8] sm:$0xf] }
 0x3aa   : > { %v2574_v36 = vrot.slane %v2568_v21, 6  ;;  %v2580_v61 = vrot.slane %v2569_v29, 6  ;;  %v2570_v49 = vunpack.c.l.b16 %v2545_v20  ;;  %v2571_v56 = vunpack.c.l.b16 %v2546_v63  ;;  %v4139_v21 = vld [vmem:[#allocation7 + $0x58] sm:$0xff]  ;;  %v4145_v12 = vld [vmem:[#allocation7 + $0x88] sm:$0xff]  ;;  %v4152_v55 = vld [vmem:[#allocation7 + $0xc0] sm:$0xff] }
 0x3ab   : > { %v4159_v29 = vld [vmem:[#allocation7 + $0xf8] sm:$0xff]  ;;  %v2548_v31 = vperm.slane %v5839_v43, 0  ;;  %v2550_v41 = vperm.slane %v5839_v43, 2  ;;  %v2549_v33 = vperm.slane %v5839_v43, 1  ;;  %v4153_v47 = vld [vmem:[#allocation7 + $0xc8] sm:$0xff] }
 0x3ac   : > { %v2575_v1 = vsel %vm1903_vm1, %v2574_v36, %v2573_v44  ;;  %v2576_v48 = vrot.slane %v2570_v49, 5  ;;  %v2581_v46 = vsel %vm1903_vm1, %v2580_v61, %v2579_v60  ;;  %v2582_v51 = vrot.slane %v2571_v56, 5  ;;  %v4158_v36 = vld [vmem:[#allocation7 + $0xf0] sm:$0xff]  ;;  %v4144_v61 = vld [vmem:[#allocation7 + $0x80] sm:$0xff]  ;;  %v4137_v60 = vld [vmem:[#allocation7 + $0x48] sm:$0xff] }
 0x3ad   : > { %3311 = vmatpush.bf16.msra.mxu0 %v4132_v30  ;;  %v4155_v23 = vld [vmem:[#allocation7 + $0xd8] sm:$0xff] }
 0x3ae   : > { %v2577_v58 = vsel %vm1906_vm2, %v2576_v48, %v2575_v1  ;;  %v2583_v15 = vsel %vm1906_vm2, %v2582_v51, %v2581_v46  ;;  %v4157_v1 = vld [vmem:[#allocation7 + $0xe8] sm:$0xff] }
 0x3af   : > { %v2584_v24 = vpack.c.b16 %v2577_v58, %v2577_v58  ;;  %v2585_v5 = vpack.c.b16 %v2583_v15, %v2583_v15  ;;  %v4136_v58 = vld [vmem:[#allocation7 + $0x40] sm:$0xff] }
 0x3b0   : > { %v4156_v15 = vld [vmem:[#allocation7 + $0xe0] sm:$0xff] }
 0x3b1   : > { %2916 = vmatmul.bf16.vlgmr.msra.gmra.mxu3 %v2584_v24  ;;  %2929 = vmatmul.bf16.vlgmr.msrb.gmra.mxu1 %v2585_v5 }
 0x3b2   : > { %2942 = vmatmul.bf16.vlgmr.msrb.gmra.mxu2 %v2584_v24  ;;  %2968 = vmatmul.bf16.vlgmr.msrb.gmra.mxu0 %v2584_v24 }
 0x3b3   : > { %2999 = vmatpush.bf16.msra.mxu3 %v3912_v57  ;;  %3334 = vmatpush.bf16.msrb.mxu2 %v4151_v40 }
 0x3b4   : > { %3321 = vmatpush.bf16.msrb.mxu1 %v4143_v39  ;;  %3312 = vmatpush.bf16.msra.mxu0 %v4131_v50 }
 0x3b7   : > { %3000 = vmatpush.bf16.msra.mxu3 %v3896_v35  ;;  %3335 = vmatpush.bf16.msrb.mxu2 %v4150_v26 }
 0x3b8   : > { %3322 = vmatpush.bf16.msrb.mxu1 %v4142_v32  ;;  %3313 = vmatpush.bf16.msra.mxu0 %v4130_v3  ;;  %v2551_v32 = vperm.slane %v5839_v43, 3 }
 0x3bb   : > { %3001 = vmatpush.bf16.msra.mxu3 %v3880_v54  ;;  %3336 = vmatpush.bf16.msrb.mxu2 %v4149_v4 }
 0x3bc   : > { %3323 = vmatpush.bf16.msrb.mxu1 %v4141_v27  ;;  %3314 = vmatpush.bf16.msra.mxu0 %v4129_v18 }
 0x3bf   : > { %3002 = vmatpush.bf16.msra.mxu3 %v3864_v8  ;;  %3337 = vmatpush.bf16.msrb.mxu2 %v4148_v28 }
 0x3c0   : > { %3324 = vmatpush.bf16.msrb.mxu1 %v4140_v10  ;;  %3315 = vmatpush.bf16.msra.mxu0 %v4128_v2 }
 0x3c1   : > { %2955 = vmatmul.bf16.vlgmr.msrb.gmra.mxu3 %v2585_v5  ;;  %2981 = vmatmul.bf16.vlgmr.msra.gmra.mxu1 %v2585_v5 }
 0x3c2   : > { %2994 = vmatmul.bf16.vlgmr.msra.gmra.mxu2 %v2584_v24 }
 0x3c3   : > { %3003 = vmatpush.bf16.msra.mxu3 %v3848_v52  ;;  %3338 = vmatpush.bf16.msrb.mxu2 %v4147_v25 }
 0x3c4   : > { %3325 = vmatpush.bf16.msrb.mxu1 %v4139_v21 }
 0x3c7   : > { %3004 = vmatpush.bf16.msra.mxu3 %v3832_v16  ;;  %3339 = vmatpush.bf16.msrb.mxu2 %v4146_v59 }
 0x3c8   : > { %3326 = vmatpush.bf16.msrb.mxu1 %v4138_v9 }
 0x3cb   : > { %3005 = vmatpush.bf16.msra.mxu3 %v3816_v62  ;;  %3340 = vmatpush.bf16.msrb.mxu2 %v4145_v12 }
 0x3cc   : > { %3327 = vmatpush.bf16.msrb.mxu1 %v4137_v60 }
 0x3cf   : > { %3006 = vmatpush.bf16.msra.mxu3 %v3800_v45  ;;  %3341 = vmatpush.bf16.msrb.mxu2 %v4144_v61 }
 0x3d0   : > { %3328 = vmatpush.bf16.msrb.mxu1 %v4136_v58 }
 0x3d2   : > { %3007 = vmatmul.bf16.vlgmr.msra.gmra.mxu3 %v2585_v5 }
 0x3d3   : > { %3347 = vmatpush.bf16.msrb.mxu3 %v4159_v29 }
 0x3d7   : > { %3348 = vmatpush.bf16.msrb.mxu3 %v4158_v36 }
 0x3db   : > { %3349 = vmatpush.bf16.msrb.mxu3 %v4157_v1 }
 0x3df   : > { %3350 = vmatpush.bf16.msrb.mxu3 %v4156_v15 }
 0x3e3   : > { %3351 = vmatpush.bf16.msrb.mxu3 %v4155_v23 }
 0x3e7   : > { %3352 = vmatpush.bf16.msrb.mxu3 %v4154_v34 }
 0x3eb   : > { %3353 = vmatpush.bf16.msrb.mxu3 %v4153_v47 }
 0x3ef   : > { %3354 = vmatpush.bf16.msrb.mxu3 %v4152_v55 }
 0x42e   : > { %v2930_v20 = vpop.f32.mrf.mxu1 }
 0x42f   : > { %v2969_v63 = vpop.f32.mrf.mxu0 }
 0x430   : > { %v2970_v57 = vadd.f32 %v2969_v63, %v2550_v41 }
 0x434   : > { %v2917_v49 = vpop.f32.mrf.mxu3 }
 0x435   : > { %v2918_v56 = vadd.f32 %v2917_v49, %v2548_v31  ;;  %v2943_v44 = vpop.f32.mrf.mxu2 }
 0x436   : > { %v2932_v48 = vpop.f32.mrf.mxu1  ;;  %v2944_v8 = vadd.f32 %v2943_v44, %v2549_v33 }
 0x437   : > { %v2931_v46 = vadd.f32 %v2930_v20, %v2918_v56  ;;  %v2971_v51 = vpop.f32.mrf.mxu0 }
 0x439   : > { %v3012_v37 = vmax.f32 %v2931_v46, 0.0 }
 0x43b   : > { %v3020_v24 = vrot.slane %v3012_v37, 2 }
 0x43c   : > { %v2919_v5 = vpop.f32.mrf.mxu3 }
 0x43d   : > { %v3028_v7 = vmax.f32 %v3012_v37, %v3020_v24  ;;  %v2945_v38 = vpop.f32.mrf.mxu2 }
 0x43e   : > { %v2982_v53 = vpop.f32.mrf.mxu1 }
 0x43f   : > { %v3036_v35 = vrot.slane %v3028_v7, 1  ;;  %v2983_v19 = vadd.f32 %v2982_v53, %v2970_v57 }
 0x441   : > { %v3044_v54 = vmax.f32 %v3028_v7, %v3036_v35  ;;  %v3014_v17 = vmax.f32 %v2983_v19, 0.0 }
 0x443   : > { %v3022_v14 = vrot.slane %v3014_v17, 2  ;;  %v3048_v6 = vpack.c.bf16 %v3044_v54, %v3044_v54 }
 0x444   : > { %v2956_v52 = vpop.f32.mrf.mxu3 }
 0x445   : > { %v3030_v13 = vmax.f32 %v3014_v17, %v3022_v14  ;;  %v2957_v42 = vadd.f32 %v2956_v52, %v2944_v8  ;;  %v2995_v16 = vpop.f32.mrf.mxu2  ;;  %3316 = vmatmul.bf16.vlgmr.msra.gmra.mxu0 %v3048_v6 }
 0x446   : > { %v2984_v22 = vpop.f32.mrf.mxu1  ;;  %v2996_v28 = vadd.f32 %v2995_v16, %v2551_v32 }
 0x447   : > { %v3038_v62 = vrot.slane %v3030_v13, 1  ;;  %v3013_v11 = vmax.f32 %v2957_v42, 0.0 }
 0x449   : > { %v3046_v0 = vmax.f32 %v3030_v13, %v3038_v62  ;;  %v3021_v45 = vrot.slane %v3013_v11, 2 }
 0x44b   : > { %v3050_v40 = vpack.c.bf16 %v3046_v0, %v3046_v0  ;;  %v3029_v30 = vmax.f32 %v3013_v11, %v3021_v45 }
 0x44c   : > { %v2958_v26 = vpop.f32.mrf.mxu3 }
 0x44d   : > { %v3037_v39 = vrot.slane %v3029_v30, 1  ;;  %v2997_v50 = vpop.f32.mrf.mxu2  ;;  %3342 = vmatmul.bf16.vlgmr.msrb.gmra.mxu2 %v3050_v40 }
 0x44f   : > { %v3045_v4 = vmax.f32 %v3029_v30, %v3037_v39 }
 0x451   : > { %v3049_v3 = vpack.c.bf16 %v3045_v4, %v3045_v4 }
 0x453   : > { %3329 = vmatmul.bf16.vlgmr.msrb.gmra.mxu1 %v3049_v3 }
 0x455   : > { %v3008_v27 = vpop.f32.mrf.mxu3 }
 0x456   : > { %v3009_v18 = vadd.f32 %v3008_v27, %v2996_v28 }
 0x458   : > { %v3015_v25 = vmax.f32 %v3009_v18, 0.0 }
 0x45a   : > { %v3023_v10 = vrot.slane %v3015_v25, 2 }
 0x45c   : > { %v3031_v2 = vmax.f32 %v3015_v25, %v3023_v10 }
 0x45d   : > { %v3010_v59 = vpop.f32.mrf.mxu3 }
 0x45e   : > { %v3039_v20 = vrot.slane %v3031_v2, 1 }
 0x460   : > { %v3047_v63 = vmax.f32 %v3031_v2, %v3039_v20 }
 0x462   : > { %v3051_v21 = vpack.c.bf16 %v3047_v63, %v3047_v63 }
 0x464   : > { %3355 = vmatmul.bf16.vlgmr.msrb.gmra.mxu3 %v3051_v21 }
 0x4c2   : > { %v3317_v29 = vpop.f32.mrf.mxu0 }
 0x4ca   : > { %v3319_v31 = vpop.f32.mrf.mxu0 }
 0x4d0   : > { %v3330_v12 = vpop.f32.mrf.mxu1  ;;  %v3343_v9 = vpop.f32.mrf.mxu2 }
 0x4d1   : > { %v3331_v61 = vadd.f32 %v3330_v12, %v3317_v29 }
 0x4d3   : > { %v3344_v49 = vadd.f32 %v3343_v9, %v3331_v61 }
 0x4d8   : > { %v3332_v43 = vpop.f32.mrf.mxu1  ;;  %v3345_v36 = vpop.f32.mrf.mxu2 }
 0x4e7   : > { %v3356_v56 = vpop.f32.mrf.mxu3 }
 0x4e8   : > { %v3357_v44 = vadd.f32 %v3356_v56, %v3344_v49 }
 0x4ea   : > { %3360 = vst [vmem:[%s426_s20] sm:$0x1] %v3357_v44 }
 0x4eb   : > { %4445 = shalt.err (!%p4442_p9)
}
 0x4ec   : > { %4172 = dma.vmem_to_hbm [thread:$0]  (%p4612_p4), %s3374_s22, 16, %s3376_s19, %s3362_s24  }
 0x4ef   : > { %v3358_v60 = vpop.f32.mrf.mxu3 }
 0x4f0 PF: > { %s5932_s17 = sld [smem:[#allocation15_spill]] }
 0x4f1   : > { %s5933_s18 = sld [smem:[#allocation12_spill]] }
 0x4f6   : > { %p4194_p10 = scmp.ge.s32.totalorder %s5932_s17, 2 }
 0x4f7   : > { %s3387_s23 = sand.u32 1, %s5933_s18  }
 0x4f8   : > { %p4185_p11 = pnand %p4194_p10, %p4619_p8  ;;  %s3388_s25 = scalar_lea.sflag [#allocation4], %s3387_s23 }
 0x4fa   : > { %p4186_p12 = pneg %p4185_p11 }
 0x4fc   : > { %4479 = dma.done.wait (%p4186_p12), %s3388_s25, 16  }
 0x4fd   : > { %4481 = vsyncadd (%p4186_p12), %s3388_s25, 4294967280  ;;  %s25_s18 = sadd.s32 1, %s5932_s17   ;;  %s5935_s26 = sld [smem:[#allocation13_spill]] }
 0x4fe   : > { %p22_p13 = scmp.ge.s32.totalorder %s25_s18, 4   ;;  %s5936_s15 = sld [smem:[#allocation19_spill]] }
 0x4ff   : > { %s5937_s16 = sld [smem:[#allocation14_spill]]  ;;  %s5939_s13 = smov %s4488_s14 }
 0x500   : > { %s5938_s17 = sld [smem:[#allocation16_spill]]  ;;  %24 = sbr.rel (!%p22_p13) target bundleno = 8 (0x8), region = 108 }
 0x503   : > { %s5940_s14 = smov %s5935_s26 }
 0x505   :  { %3393 = vsyncpa [#allocation3], 1 }
 0x506   :  { %3395 = vsyncpa [#allocation3 + $0x1], 1 }
 0x507   :  { %3396 = vsyncpa [#allocation6], 1 }
 0x508   :  { %3397 = vsyncpa [#allocation4], 1 }
 0x509   :  { %3399 = vsyncpa [#allocation4 + $0x1], 1 }

</bundles_post_ra>
